<compile_context>
chip_gen: v7x
topology: tpu7x:2x2x1
jax: 0.10.0
libtpu: 0.0.40
codegen_flags: <defaults>
</compile_context>

<pallas_src>
import functools

import jax
import jax.numpy as jnp
from jax.experimental import pallas as pl
from jax.experimental.pallas import tpu as pltpu

# ---------------- model config (small, consistent with the module) ----------------
B = 2            # batch
S = 8            # sequence length
H = 128          # hidden size ("768" analogue)
NUM_HEADS = 4
HEAD_DIM = H // NUM_HEADS
FFN = 4 * H
NUM_LAYERS = 2
VOCAB = 64
NUM_CLASSES = 6
M_DOLLS = [32, 64, 128]        # MRL truncation sizes (must be <= H)
MRL_OUT_PAD = 128              # lane-dense padded output width (>= len(M_DOLLS)*NUM_CLASSES)
LN_EPS = 1e-12


# ---------------- in-kernel helpers ----------------
def _layer_norm(x, gamma, beta):
    # Variance as E[x^2] - mu^2: the two cross-lane reductions are independent and can
    # overlap on the XLU (review item), instead of the serial mu -> (x-mu)^2 -> mean chain.
    mu = jnp.mean(x, axis=-1, keepdims=True)
    ms = jnp.mean(x * x, axis=-1, keepdims=True)
    var = ms - mu * mu
    return (x - mu) * jax.lax.rsqrt(var + LN_EPS) * gamma + beta


# ---------------- fused Pallas kernel: embedding + 2 encoder layers + merged MRL heads ----------------
def fused_kernel(ids_ref, mask_ref,
                 wemb_ref, pemb_ref, embg_ref, embb_ref,
                 wqkv_ref, bqkv_ref, wo_ref, bo_ref,
                 ln1g_ref, ln1b_ref,
                 w1_ref, b1_ref, w2_ref, b2_ref,
                 ln2g_ref, ln2b_ref,
                 wmrl_ref, bmrl_ref,
                 out_ref, *,
                 num_layers, num_heads, head_dim, seq, vocab):
    hidden = num_heads * head_dim

    # --- embedding: one-hot gather as a tiny matmul (fully vectorized, no dynamic indexing) ---
    ids = ids_ref[...].reshape(seq, 1)                               # (S, 1) int32
    onehot = (jax.lax.broadcasted_iota(jnp.int32, (seq, vocab), 1) == ids).astype(jnp.float32)
    x = jnp.dot(onehot, wemb_ref[...],
                preferred_element_type=jnp.float32) + pemb_ref[...]  # (S, H)
    x = _layer_norm(x, embg_ref[...], embb_ref[...])

    # additive key-mask bias computed in-kernel; masked keys get exactly -1e9
    bias = jnp.where(mask_ref[...] == 0, jnp.float32(-1e9), jnp.float32(0.0))   # (1, 1, S)

    for li in range(num_layers):                 # static unroll over the 2 layers
        # --- fused QKV projection: one (S, H) @ (H, 3H) matmul (bf16 in, f32 acc) ---
        wqkv = wqkv_ref[li]
        qkv = jnp.dot(x.astype(wqkv.dtype), wqkv,
                      preferred_element_type=jnp.float32) + bqkv_ref[li]        # (S, 3H)
        q = qkv[:, 0 * hidden:1 * hidden]        # vreg-aligned 128-lane slices (cheap)
        k = qkv[:, 1 * hidden:2 * hidden]
        v = qkv[:, 2 * hidden:3 * hidden]
        # NOTE: the 1/sqrt(head_dim) score scale is folded into the Q weights at init
        #       (Q bias is zero, so no bias rescale is needed).

        # --- heads stacked into one leading batch dim -> ONE batched einsum / softmax / ctx ---
        q_h = jnp.stack([q[:, h * head_dim:(h + 1) * head_dim] for h in range(num_heads)], axis=0)
        k_h = jnp.stack([k[:, h * head_dim:(h + 1) * head_dim] for h in range(num_heads)], axis=0)
        v_h = jnp.stack([v[:, h * head_dim:(h + 1) * head_dim] for h in range(num_heads)], axis=0)
        # (num_heads, S, head_dim)

        s = jnp.einsum('hqd,hkd->hqk', q_h, k_h,
                       preferred_element_type=jnp.float32)           # (num_heads, S, S)
        s = s + bias                                                  # broadcast over heads/queries
        # No max-subtraction: unmasked scores are O(1) after the folded 1/sqrt(d) scale and
        # masked entries are exactly -1e9 (exp underflows to 0), so plain exp is numerically safe.
        p = jnp.exp(s)
        p = p * pl.reciprocal(jnp.sum(p, axis=-1, keepdims=True), approx=True)
        ctx_h = jnp.einsum('hqk,hkd->hqd', p, v_h,
                           preferred_element_type=jnp.float32)        # (num_heads, S, head_dim)
        ctx = jnp.concatenate([ctx_h[h] for h in range(num_heads)], axis=-1)    # (S, H)

        wo = wo_ref[li]
        attn = jnp.dot(ctx.astype(wo.dtype), wo,
                       preferred_element_type=jnp.float32) + bo_ref[li]
        h1 = _layer_norm(x + attn, ln1g_ref[li], ln1b_ref[li])

        # --- FFN ---
        w1 = w1_ref[li]
        f = jnp.dot(h1.astype(w1.dtype), w1,
                    preferred_element_type=jnp.float32) + b1_ref[li]
        # TODO(synk): PyTorch nn.GELU defaults to the exact erf GELU; tanh approximation used here.
        f = jax.nn.gelu(f)
        w2 = w2_ref[li]
        f = jnp.dot(f.astype(w2.dtype), w2,
                    preferred_element_type=jnp.float32) + b2_ref[li]
        x = _layer_norm(h1 + f, ln2g_ref[li], ln2b_ref[li])

    # --- CLS pooling + merged (lane-padded) MRL heads: one lane-dense bf16 matmul ---
    cls = x[0:1, :]                                                   # (1, H)
    wmrl = wmrl_ref[...]
    logits = jnp.dot(cls.astype(wmrl.dtype), wmrl,
                     preferred_element_type=jnp.float32) + bmrl_ref[...]        # (1, MRL_OUT_PAD)
    out_ref[...] = logits[None].astype(out_ref.dtype)                 # (1, 1, MRL_OUT_PAD)


# ---------------- pallas_call wrapper ----------------
def _const_spec(arr):
    """Whole-array block, constant index map (weight stays VMEM-resident across grid steps)."""
    ndim = arr.ndim
    return pl.BlockSpec(arr.shape, lambda b, _n=ndim: (0,) * _n)


def fused_forward(params, ids3, mask3):
    kernel = functools.partial(fused_kernel,
                               num_layers=NUM_LAYERS, num_heads=NUM_HEADS,
                               head_dim=HEAD_DIM, seq=S, vocab=VOCAB)
    weights = (params['word_emb'], params['pos_emb'], params['emb_ln_g'], params['emb_ln_b'],
               params['wqkv'], params['bqkv'], params['wo'], params['bo'],
               params['ln1g'], params['ln1b'], params['w1'], params['b1'],
               params['w2'], params['b2'], params['ln2g'], params['ln2b'],
               params['wmrl'], params['bmrl'])
    in_specs = ([pl.BlockSpec((1, S, 1), lambda b: (b, 0, 0)),       # input_ids   (per-batch block)
                 pl.BlockSpec((1, 1, S), lambda b: (b, 0, 0))]       # attn mask   (per-batch block)
                + [_const_spec(w) for w in weights])                 # weights     (broadcast)
    out = pl.pallas_call(
        kernel,
        grid=(B,),                                                   # one sequence per grid step;
        out_shape=jax.ShapeDtypeStruct((B, 1, MRL_OUT_PAD), jnp.float32),
        in_specs=in_specs,
        out_specs=pl.BlockSpec((1, 1, MRL_OUT_PAD), lambda b: (b, 0, 0)),
        compiler_params=pltpu.CompilerParams(
            dimension_semantics=("parallel",)),                      # v7x: one batch per TensorCore
    )(ids3, mask3, *weights)
    return out[:, 0, :]                                              # (B, MRL_OUT_PAD)


# ---------------- parameter init (deterministic, synthetic) ----------------
def init_params(key):
    def nrm(k, shape, scale=0.02):
        return scale * jax.random.normal(k, shape, dtype=jnp.float32)

    wdt = jnp.bfloat16   # matmul weights stored bf16; elementwise / accumulation stay f32

    keys = jax.random.split(key, 4 + NUM_LAYERS)
    params = {
        'word_emb': nrm(keys[0], (VOCAB, H)),          # kept f32: one-hot gather stays exact
        'pos_emb': nrm(keys[1], (S, H)),
        'emb_ln_g': jnp.ones((1, H), jnp.float32),
        'emb_ln_b': jnp.zeros((1, H), jnp.float32),
    }

    q_scale = 1.0 / jnp.sqrt(jnp.float32(HEAD_DIM))
    wqkv, bqkv, wo, bo = [], [], [], []
    ln1g, ln1b, w1, b1, w2, b2, ln2g, ln2b = [], [], [], [], [], [], [], []
    for li in range(NUM_LAYERS):
        ks = jax.random.split(keys[2 + li], 6)
        wq = nrm(ks[0], (H, H)) * q_scale          # fold attention scale into Q projection (b_q == 0)
        wk = nrm(ks[1], (H, H))
        wv = nrm(ks[2], (H, H))
        wqkv.append(jnp.concatenate([wq, wk, wv], axis=1))          # (H, 3H)
        bqkv.append(jnp.zeros((1, 3 * H), jnp.float32))
        wo.append(nrm(ks[3], (H, H)))
        bo.append(jnp.zeros((1, H), jnp.float32))
        ln1g.append(jnp.ones((1, H), jnp.float32)); ln1b.append(jnp.zeros((1, H), jnp.float32))
        w1.append(nrm(ks[4], (H, FFN))); b1.append(jnp.zeros((1, FFN), jnp.float32))
        w2.append(nrm(ks[5], (FFN, H))); b2.append(jnp.zeros((1, H), jnp.float32))
        ln2g.append(jnp.ones((1, H), jnp.float32)); ln2b.append(jnp.zeros((1, H), jnp.float32))

    params.update(
        wqkv=jnp.stack(wqkv).astype(wdt), bqkv=jnp.stack(bqkv),
        wo=jnp.stack(wo).astype(wdt), bo=jnp.stack(bo),
        ln1g=jnp.stack(ln1g), ln1b=jnp.stack(ln1b),
        w1=jnp.stack(w1).astype(wdt), b1=jnp.stack(b1),
        w2=jnp.stack(w2).astype(wdt), b2=jnp.stack(b2),
        ln2g=jnp.stack(ln2g), ln2b=jnp.stack(ln2b),
    )

    # Merged MRL heads: head i occupies output columns [i*C, (i+1)*C); only its first
    # `doll` input rows are non-zero, so cls @ wmrl == cls[:, :doll] @ W_doll per head.
    hk = jax.random.split(keys[2 + NUM_LAYERS], len(M_DOLLS))
    wmrl = jnp.zeros((H, MRL_OUT_PAD), jnp.float32)
    bmrl = jnp.zeros((1, MRL_OUT_PAD), jnp.float32)
    for i, doll in enumerate(M_DOLLS):
        w_i = nrm(hk[i], (doll, NUM_CLASSES))
        wmrl = wmrl.at[:doll, i * NUM_CLASSES:(i + 1) * NUM_CLASSES].set(w_i)
    params['wmrl'] = wmrl.astype(wdt)              # bf16 like the other matmul weights
    params['bmrl'] = bmrl
    return params


# ---------------- forward (EmotionClassifier.forward semantics) ----------------
@jax.jit
def emotion_classifier_forward(params, input_ids, attention_mask):
    # Only metadata reshapes here — gather, embed LN, mask bias and all encoder math
    # happen inside the single fused Pallas kernel.
    ids3 = input_ids.astype(jnp.int32).reshape(B, S, 1)
    mask3 = attention_mask.astype(jnp.int32).reshape(B, 1, S)

    out = fused_forward(params, ids3, mask3)                       # (B, MRL_OUT_PAD)

    # split the lane-padded merged-head output back into the MRL list-of-logits
    return [out[:, i * NUM_CLASSES:(i + 1) * NUM_CLASSES] for i in range(len(M_DOLLS))]


# ---------------- main ----------------
if __name__ == "__main__":
    key = jax.random.PRNGKey(0)
    pkey, ikey = jax.random.split(key)

    params = init_params(pkey)

    input_ids = jax.random.randint(ikey, (B, S), 0, VOCAB, dtype=jnp.int32)
    attention_mask = jnp.array(
        [[1] * S,
         [1] * (S - 2) + [0] * 2], dtype=jnp.int32)                # second sequence is padded

    logits_list = emotion_classifier_forward(params, input_ids, attention_mask)
    for doll, logits in zip(M_DOLLS, logits_list):
        jax.block_until_ready(logits)
        assert logits.shape == (B, NUM_CLASSES), (doll, logits.shape)

    print("KERNEL_OK")
</pallas_src>

<mosaic_0001>
module attributes {stable_mosaic.version = 11 : i64} {
  func.func @fused_kernel(%arg0: i32, %arg1: memref<1x8x1xi32, #tpu.memory_space<vmem>>, %arg2: memref<1x1x8xi32, #tpu.memory_space<vmem>>, %arg3: memref<64x128xf32, #tpu.memory_space<vmem>>, %arg4: memref<8x128xf32, #tpu.memory_space<vmem>>, %arg5: memref<1x128xf32, #tpu.memory_space<vmem>>, %arg6: memref<1x128xf32, #tpu.memory_space<vmem>>, %arg7: memref<2x128x384xbf16, #tpu.memory_space<vmem>>, %arg8: memref<2x1x384xf32, #tpu.memory_space<vmem>>, %arg9: memref<2x128x128xbf16, #tpu.memory_space<vmem>>, %arg10: memref<2x1x128xf32, #tpu.memory_space<vmem>>, %arg11: memref<2x1x128xf32, #tpu.memory_space<vmem>>, %arg12: memref<2x1x128xf32, #tpu.memory_space<vmem>>, %arg13: memref<2x128x512xbf16, #tpu.memory_space<vmem>>, %arg14: memref<2x1x512xf32, #tpu.memory_space<vmem>>, %arg15: memref<2x512x128xbf16, #tpu.memory_space<vmem>>, %arg16: memref<2x1x128xf32, #tpu.memory_space<vmem>>, %arg17: memref<2x1x128xf32, #tpu.memory_space<vmem>>, %arg18: memref<2x1x128xf32, #tpu.memory_space<vmem>>, %arg19: memref<128x128xbf16, #tpu.memory_space<vmem>>, %arg20: memref<1x128xf32, #tpu.memory_space<vmem>>, %arg21: memref<1x1x128xf32, #tpu.memory_space<vmem>>) attributes {dimension_semantics = [#tpu.dimension_semantics<parallel>], iteration_bounds = array<i64: 2>, scalar_prefetch = 0 : i64, scratch_operands = 0 : i64, tpu.core_type = #tpu.core_type<tc>, window_params = [{transform_indices = @transform_0, window_bounds = array<i64: 1, 8, 1>}, {transform_indices = @transform_1, window_bounds = array<i64: 1, 1, 8>}, {pipeline_mode = #tpu.pipeline_mode<synchronous>, transform_indices = @transform_2, window_bounds = array<i64: 64, 128>}, {pipeline_mode = #tpu.pipeline_mode<synchronous>, transform_indices = @transform_3, window_bounds = array<i64: 8, 128>}, {pipeline_mode = #tpu.pipeline_mode<synchronous>, transform_indices = @transform_4, window_bounds = array<i64: 1, 128>}, {pipeline_mode = #tpu.pipeline_mode<synchronous>, transform_indices = @transform_5, window_bounds = array<i64: 1, 128>}, {pipeline_mode = #tpu.pipeline_mode<synchronous>, transform_indices = @transform_6, window_bounds = array<i64: 2, 128, 384>}, {pipeline_mode = #tpu.pipeline_mode<synchronous>, transform_indices = @transform_7, window_bounds = array<i64: 2, 1, 384>}, {pipeline_mode = #tpu.pipeline_mode<synchronous>, transform_indices = @transform_8, window_bounds = array<i64: 2, 128, 128>}, {pipeline_mode = #tpu.pipeline_mode<synchronous>, transform_indices = @transform_9, window_bounds = array<i64: 2, 1, 128>}, {pipeline_mode = #tpu.pipeline_mode<synchronous>, transform_indices = @transform_10, window_bounds = array<i64: 2, 1, 128>}, {pipeline_mode = #tpu.pipeline_mode<synchronous>, transform_indices = @transform_11, window_bounds = array<i64: 2, 1, 128>}, {pipeline_mode = #tpu.pipeline_mode<synchronous>, transform_indices = @transform_12, window_bounds = array<i64: 2, 128, 512>}, {pipeline_mode = #tpu.pipeline_mode<synchronous>, transform_indices = @transform_13, window_bounds = array<i64: 2, 1, 512>}, {pipeline_mode = #tpu.pipeline_mode<synchronous>, transform_indices = @transform_14, window_bounds = array<i64: 2, 512, 128>}, {pipeline_mode = #tpu.pipeline_mode<synchronous>, transform_indices = @transform_15, window_bounds = array<i64: 2, 1, 128>}, {pipeline_mode = #tpu.pipeline_mode<synchronous>, transform_indices = @transform_16, window_bounds = array<i64: 2, 1, 128>}, {pipeline_mode = #tpu.pipeline_mode<synchronous>, transform_indices = @transform_17, window_bounds = array<i64: 2, 1, 128>}, {pipeline_mode = #tpu.pipeline_mode<synchronous>, transform_indices = @transform_18, window_bounds = array<i64: 128, 128>}, {pipeline_mode = #tpu.pipeline_mode<synchronous>, transform_indices = @transform_19, window_bounds = array<i64: 1, 128>}, {transform_indices = @transform_20, window_bounds = array<i64: 1, 1, 128>}]} {
    %c0 = arith.constant 0 : index
    %c0_0 = arith.constant 0 : index
    %c0_1 = arith.constant 0 : index
    %0 = vector.load %arg1[%c0, %c0_0, %c0_1] : memref<1x8x1xi32, #tpu.memory_space<vmem>>, vector<1x8x1xi32>
    %1 = vector.shape_cast %0 : vector<1x8x1xi32> to vector<8x1xi32>
    %2 = tpu.iota {dimensions = array<i32: 1>} : vector<8x64xi32>
    %3 = vector.broadcast %1 : vector<8x1xi32> to vector<8x64xi32>
    %4 = arith.cmpi eq, %2, %3 : vector<8x64xi32>
    %5 = arith.extui %4 : vector<8x64xi1> to vector<8x64xi32>
    %6 = arith.sitofp %5 : vector<8x64xi32> to vector<8x64xf32>
    %c0_2 = arith.constant 0 : index
    %c0_3 = arith.constant 0 : index
    %7 = vector.load %arg3[%c0_2, %c0_3] : memref<64x128xf32, #tpu.memory_space<vmem>>, vector<64x128xf32>
    %cst = arith.constant dense<0.000000e+00> : vector<8x128xf32>
    %8 = tpu.matmul %6, %7, %cst {dimension_numbers = #tpu.dot_dimension_numbers<[1], [0], [0], [1], [0, 0, 1, 1], [], []>} : vector<8x64xf32>, vector<64x128xf32>, vector<8x128xf32> -> vector<8x128xf32>
    %c0_4 = arith.constant 0 : index
    %c0_5 = arith.constant 0 : index
    %9 = vector.load %arg4[%c0_4, %c0_5] : memref<8x128xf32, #tpu.memory_space<vmem>>, vector<8x128xf32>
    %10 = arith.addf %8, %9 : vector<8x128xf32>
    %c0_6 = arith.constant 0 : index
    %c0_7 = arith.constant 0 : index
    %11 = vector.load %arg5[%c0_6, %c0_7] : memref<1x128xf32, #tpu.memory_space<vmem>>, vector<1x128xf32>
    %c0_8 = arith.constant 0 : index
    %c0_9 = arith.constant 0 : index
    %12 = vector.load %arg6[%c0_8, %c0_9] : memref<1x128xf32, #tpu.memory_space<vmem>>, vector<1x128xf32>
    %cst_10 = arith.constant dense<0.000000e+00> : vector<8xf32>
    %13 = vector.multi_reduction <add>, %10, %cst_10 [1] : vector<8x128xf32> to vector<8xf32>
    %14 = vector.shape_cast %13 : vector<8xf32> to vector<8x1xf32>
    %cst_11 = arith.constant 1.280000e+02 : f32
    %15 = vector.broadcast %cst_11 : f32 to vector<8x1xf32>
    %16 = arith.divf %14, %15 : vector<8x1xf32>
    %17 = arith.mulf %10, %10 : vector<8x128xf32>
    %cst_12 = arith.constant dense<0.000000e+00> : vector<8xf32>
    %18 = vector.multi_reduction <add>, %17, %cst_12 [1] : vector<8x128xf32> to vector<8xf32>
    %19 = vector.shape_cast %18 : vector<8xf32> to vector<8x1xf32>
    %cst_13 = arith.constant 1.280000e+02 : f32
    %20 = vector.broadcast %cst_13 : f32 to vector<8x1xf32>
    %21 = arith.divf %19, %20 : vector<8x1xf32>
    %22 = arith.mulf %16, %16 : vector<8x1xf32>
    %23 = arith.subf %21, %22 : vector<8x1xf32>
    %24 = vector.broadcast %16 : vector<8x1xf32> to vector<8x128xf32>
    %25 = arith.subf %10, %24 : vector<8x128xf32>
    %cst_14 = arith.constant 9.99999996E-13 : f32
    %26 = vector.broadcast %cst_14 : f32 to vector<8x1xf32>
    %27 = arith.addf %23, %26 : vector<8x1xf32>
    %28 = math.rsqrt %27 : vector<8x1xf32>
    %29 = vector.broadcast %28 : vector<8x1xf32> to vector<8x128xf32>
    %30 = arith.mulf %25, %29 : vector<8x128xf32>
    %31 = vector.broadcast %11 : vector<1x128xf32> to vector<8x128xf32>
    %32 = arith.mulf %30, %31 : vector<8x128xf32>
    %33 = vector.broadcast %12 : vector<1x128xf32> to vector<8x128xf32>
    %34 = arith.addf %32, %33 : vector<8x128xf32>
    %c0_15 = arith.constant 0 : index
    %c0_16 = arith.constant 0 : index
    %c0_17 = arith.constant 0 : index
    %35 = vector.load %arg2[%c0_15, %c0_16, %c0_17] : memref<1x1x8xi32, #tpu.memory_space<vmem>>, vector<1x1x8xi32>
    %c0_i32 = arith.constant 0 : i32
    %36 = vector.broadcast %c0_i32 : i32 to vector<1x1x8xi32>
    %37 = arith.cmpi eq, %35, %36 : vector<1x1x8xi32>
    %cst_18 = arith.constant -1.000000e+09 : f32
    %cst_19 = arith.constant 0.000000e+00 : f32
    %38 = vector.broadcast %cst_18 : f32 to vector<1x1x8xf32>
    %39 = vector.broadcast %cst_19 : f32 to vector<1x1x8xf32>
    %40 = arith.select %37, %38, %39 : vector<1x1x8xi1>, vector<1x1x8xf32>
    %c0_20 = arith.constant 0 : index
    %c0_21 = arith.constant 0 : index
    %c0_22 = arith.constant 0 : index
    %41 = vector.load %arg7[%c0_20, %c0_21, %c0_22] : memref<2x128x384xbf16, #tpu.memory_space<vmem>>, vector<1x128x384xbf16>
    %42 = vector.shape_cast %41 : vector<1x128x384xbf16> to vector<128x384xbf16>
    %43 = arith.truncf %34 : vector<8x128xf32> to vector<8x128xbf16>
    %cst_23 = arith.constant dense<0.000000e+00> : vector<8x384xf32>
    %44 = tpu.matmul %43, %42, %cst_23 {dimension_numbers = #tpu.dot_dimension_numbers<[1], [0], [0], [1], [0, 0, 1, 1], [], []>} : vector<8x128xbf16>, vector<128x384xbf16>, vector<8x384xf32> -> vector<8x384xf32>
    %c0_24 = arith.constant 0 : index
    %c0_25 = arith.constant 0 : index
    %c0_26 = arith.constant 0 : index
    %45 = vector.load %arg8[%c0_24, %c0_25, %c0_26] : memref<2x1x384xf32, #tpu.memory_space<vmem>>, vector<1x1x384xf32>
    %46 = vector.shape_cast %45 : vector<1x1x384xf32> to vector<1x384xf32>
    %47 = vector.broadcast %46 : vector<1x384xf32> to vector<8x384xf32>
    %48 = arith.addf %44, %47 : vector<8x384xf32>
    %49 = vector.extract_strided_slice %48 {offsets = [0, 0], sizes = [8, 128], strides = [1, 1]} : vector<8x384xf32> to vector<8x128xf32>
    %50 = vector.extract_strided_slice %48 {offsets = [0, 128], sizes = [8, 128], strides = [1, 1]} : vector<8x384xf32> to vector<8x128xf32>
    %51 = vector.extract_strided_slice %48 {offsets = [0, 256], sizes = [8, 128], strides = [1, 1]} : vector<8x384xf32> to vector<8x128xf32>
    %52 = vector.extract_strided_slice %49 {offsets = [0, 0], sizes = [8, 32], strides = [1, 1]} : vector<8x128xf32> to vector<8x32xf32>
    %53 = vector.extract_strided_slice %49 {offsets = [0, 32], sizes = [8, 32], strides = [1, 1]} : vector<8x128xf32> to vector<8x32xf32>
    %54 = vector.extract_strided_slice %49 {offsets = [0, 64], sizes = [8, 32], strides = [1, 1]} : vector<8x128xf32> to vector<8x32xf32>
    %55 = vector.extract_strided_slice %49 {offsets = [0, 96], sizes = [8, 32], strides = [1, 1]} : vector<8x128xf32> to vector<8x32xf32>
    %56 = vector.shape_cast %52 : vector<8x32xf32> to vector<1x8x32xf32>
    %57 = vector.shape_cast %53 : vector<8x32xf32> to vector<1x8x32xf32>
    %58 = vector.shape_cast %54 : vector<8x32xf32> to vector<1x8x32xf32>
    %59 = vector.shape_cast %55 : vector<8x32xf32> to vector<1x8x32xf32>
    %60 = tpu.concatenate %56, %57, %58, %59 in 0 : vector<1x8x32xf32>, vector<1x8x32xf32>, vector<1x8x32xf32>, vector<1x8x32xf32> -> vector<4x8x32xf32>
    %61 = vector.extract_strided_slice %50 {offsets = [0, 0], sizes = [8, 32], strides = [1, 1]} : vector<8x128xf32> to vector<8x32xf32>
    %62 = vector.extract_strided_slice %50 {offsets = [0, 32], sizes = [8, 32], strides = [1, 1]} : vector<8x128xf32> to vector<8x32xf32>
    %63 = vector.extract_strided_slice %50 {offsets = [0, 64], sizes = [8, 32], strides = [1, 1]} : vector<8x128xf32> to vector<8x32xf32>
    %64 = vector.extract_strided_slice %50 {offsets = [0, 96], sizes = [8, 32], strides = [1, 1]} : vector<8x128xf32> to vector<8x32xf32>
    %65 = vector.shape_cast %61 : vector<8x32xf32> to vector<1x8x32xf32>
    %66 = vector.shape_cast %62 : vector<8x32xf32> to vector<1x8x32xf32>
    %67 = vector.shape_cast %63 : vector<8x32xf32> to vector<1x8x32xf32>
    %68 = vector.shape_cast %64 : vector<8x32xf32> to vector<1x8x32xf32>
    %69 = tpu.concatenate %65, %66, %67, %68 in 0 : vector<1x8x32xf32>, vector<1x8x32xf32>, vector<1x8x32xf32>, vector<1x8x32xf32> -> vector<4x8x32xf32>
    %70 = vector.extract_strided_slice %51 {offsets = [0, 0], sizes = [8, 32], strides = [1, 1]} : vector<8x128xf32> to vector<8x32xf32>
    %71 = vector.extract_strided_slice %51 {offsets = [0, 32], sizes = [8, 32], strides = [1, 1]} : vector<8x128xf32> to vector<8x32xf32>
    %72 = vector.extract_strided_slice %51 {offsets = [0, 64], sizes = [8, 32], strides = [1, 1]} : vector<8x128xf32> to vector<8x32xf32>
    %73 = vector.extract_strided_slice %51 {offsets = [0, 96], sizes = [8, 32], strides = [1, 1]} : vector<8x128xf32> to vector<8x32xf32>
    %74 = vector.shape_cast %70 : vector<8x32xf32> to vector<1x8x32xf32>
    %75 = vector.shape_cast %71 : vector<8x32xf32> to vector<1x8x32xf32>
    %76 = vector.shape_cast %72 : vector<8x32xf32> to vector<1x8x32xf32>
    %77 = vector.shape_cast %73 : vector<8x32xf32> to vector<1x8x32xf32>
    %78 = tpu.concatenate %74, %75, %76, %77 in 0 : vector<1x8x32xf32>, vector<1x8x32xf32>, vector<1x8x32xf32>, vector<1x8x32xf32> -> vector<4x8x32xf32>
    "tpu.trace_start"() <{level = 10 : i32, message = "hqd,hkd->hqk"}> : () -> ()
    %cst_27 = arith.constant dense<0.000000e+00> : vector<4x8x8xf32>
    %79 = tpu.matmul %60, %69, %cst_27 {dimension_numbers = #tpu.dot_dimension_numbers<[2], [2], [1], [1], [0, 0, 0, 1, 1, 1], [0], [0]>} : vector<4x8x32xf32>, vector<4x8x32xf32>, vector<4x8x8xf32> -> vector<4x8x8xf32>
    "tpu.trace_stop"() : () -> ()
    %80 = vector.broadcast %40 : vector<1x1x8xf32> to vector<4x8x8xf32>
    %81 = arith.addf %79, %80 : vector<4x8x8xf32>
    %82 = math.exp %81 : vector<4x8x8xf32>
    %cst_28 = arith.constant dense<0.000000e+00> : vector<4x8xf32>
    %83 = vector.multi_reduction <add>, %82, %cst_28 [2] : vector<4x8x8xf32> to vector<4x8xf32>
    %84 = vector.shape_cast %83 : vector<4x8xf32> to vector<4x8x1xf32>
    %85 = tpu.reciprocal %84 {approx = true} : vector<4x8x1xf32> -> vector<4x8x1xf32>
    %86 = vector.broadcast %85 : vector<4x8x1xf32> to vector<4x8x8xf32>
    %87 = arith.mulf %82, %86 : vector<4x8x8xf32>
    "tpu.trace_start"() <{level = 10 : i32, message = "hqk,hkd->hqd"}> : () -> ()
    %cst_29 = arith.constant dense<0.000000e+00> : vector<4x8x32xf32>
    %88 = tpu.matmul %87, %78, %cst_29 {dimension_numbers = #tpu.dot_dimension_numbers<[2], [1], [1], [2], [0, 0, 0, 1, 1, 2], [0], [0]>} : vector<4x8x8xf32>, vector<4x8x32xf32>, vector<4x8x32xf32> -> vector<4x8x32xf32>
    "tpu.trace_stop"() : () -> ()
    %89 = vector.extract_strided_slice %88 {offsets = [0, 0, 0], sizes = [1, 8, 32], strides = [1, 1, 1]} : vector<4x8x32xf32> to vector<1x8x32xf32>
    %90 = vector.shape_cast %89 : vector<1x8x32xf32> to vector<8x32xf32>
    %91 = vector.extract_strided_slice %88 {offsets = [1, 0, 0], sizes = [1, 8, 32], strides = [1, 1, 1]} : vector<4x8x32xf32> to vector<1x8x32xf32>
    %92 = vector.shape_cast %91 : vector<1x8x32xf32> to vector<8x32xf32>
    %93 = vector.extract_strided_slice %88 {offsets = [2, 0, 0], sizes = [1, 8, 32], strides = [1, 1, 1]} : vector<4x8x32xf32> to vector<1x8x32xf32>
    %94 = vector.shape_cast %93 : vector<1x8x32xf32> to vector<8x32xf32>
    %95 = vector.extract_strided_slice %88 {offsets = [3, 0, 0], sizes = [1, 8, 32], strides = [1, 1, 1]} : vector<4x8x32xf32> to vector<1x8x32xf32>
    %96 = vector.shape_cast %95 : vector<1x8x32xf32> to vector<8x32xf32>
    %97 = tpu.concatenate %90, %92, %94, %96 in 1 : vector<8x32xf32>, vector<8x32xf32>, vector<8x32xf32>, vector<8x32xf32> -> vector<8x128xf32>
    %c0_30 = arith.constant 0 : index
    %c0_31 = arith.constant 0 : index
    %c0_32 = arith.constant 0 : index
    %98 = vector.load %arg9[%c0_30, %c0_31, %c0_32] : memref<2x128x128xbf16, #tpu.memory_space<vmem>>, vector<1x128x128xbf16>
    %99 = vector.shape_cast %98 : vector<1x128x128xbf16> to vector<128x128xbf16>
    %100 = arith.truncf %97 : vector<8x128xf32> to vector<8x128xbf16>
    %cst_33 = arith.constant dense<0.000000e+00> : vector<8x128xf32>
    %101 = tpu.matmul %100, %99, %cst_33 {dimension_numbers = #tpu.dot_dimension_numbers<[1], [0], [0], [1], [0, 0, 1, 1], [], []>} : vector<8x128xbf16>, vector<128x128xbf16>, vector<8x128xf32> -> vector<8x128xf32>
    %c0_34 = arith.constant 0 : index
    %c0_35 = arith.constant 0 : index
    %c0_36 = arith.constant 0 : index
    %102 = vector.load %arg10[%c0_34, %c0_35, %c0_36] : memref<2x1x128xf32, #tpu.memory_space<vmem>>, vector<1x1x128xf32>
    %103 = vector.shape_cast %102 : vector<1x1x128xf32> to vector<1x128xf32>
    %104 = vector.broadcast %103 : vector<1x128xf32> to vector<8x128xf32>
    %105 = arith.addf %101, %104 : vector<8x128xf32>
    %106 = arith.addf %34, %105 : vector<8x128xf32>
    %c0_37 = arith.constant 0 : index
    %c0_38 = arith.constant 0 : index
    %c0_39 = arith.constant 0 : index
    %107 = vector.load %arg11[%c0_37, %c0_38, %c0_39] : memref<2x1x128xf32, #tpu.memory_space<vmem>>, vector<1x1x128xf32>
    %108 = vector.shape_cast %107 : vector<1x1x128xf32> to vector<1x128xf32>
    %c0_40 = arith.constant 0 : index
    %c0_41 = arith.constant 0 : index
    %c0_42 = arith.constant 0 : index
    %109 = vector.load %arg12[%c0_40, %c0_41, %c0_42] : memref<2x1x128xf32, #tpu.memory_space<vmem>>, vector<1x1x128xf32>
    %110 = vector.shape_cast %109 : vector<1x1x128xf32> to vector<1x128xf32>
    %cst_43 = arith.constant dense<0.000000e+00> : vector<8xf32>
    %111 = vector.multi_reduction <add>, %106, %cst_43 [1] : vector<8x128xf32> to vector<8xf32>
    %112 = vector.shape_cast %111 : vector<8xf32> to vector<8x1xf32>
    %cst_44 = arith.constant 1.280000e+02 : f32
    %113 = vector.broadcast %cst_44 : f32 to vector<8x1xf32>
    %114 = arith.divf %112, %113 : vector<8x1xf32>
    %115 = arith.mulf %106, %106 : vector<8x128xf32>
    %cst_45 = arith.constant dense<0.000000e+00> : vector<8xf32>
    %116 = vector.multi_reduction <add>, %115, %cst_45 [1] : vector<8x128xf32> to vector<8xf32>
    %117 = vector.shape_cast %116 : vector<8xf32> to vector<8x1xf32>
    %cst_46 = arith.constant 1.280000e+02 : f32
    %118 = vector.broadcast %cst_46 : f32 to vector<8x1xf32>
    %119 = arith.divf %117, %118 : vector<8x1xf32>
    %120 = arith.mulf %114, %114 : vector<8x1xf32>
    %121 = arith.subf %119, %120 : vector<8x1xf32>
    %122 = vector.broadcast %114 : vector<8x1xf32> to vector<8x128xf32>
    %123 = arith.subf %106, %122 : vector<8x128xf32>
    %cst_47 = arith.constant 9.99999996E-13 : f32
    %124 = vector.broadcast %cst_47 : f32 to vector<8x1xf32>
    %125 = arith.addf %121, %124 : vector<8x1xf32>
    %126 = math.rsqrt %125 : vector<8x1xf32>
    %127 = vector.broadcast %126 : vector<8x1xf32> to vector<8x128xf32>
    %128 = arith.mulf %123, %127 : vector<8x128xf32>
    %129 = vector.broadcast %108 : vector<1x128xf32> to vector<8x128xf32>
    %130 = arith.mulf %128, %129 : vector<8x128xf32>
    %131 = vector.broadcast %110 : vector<1x128xf32> to vector<8x128xf32>
    %132 = arith.addf %130, %131 : vector<8x128xf32>
    %c0_48 = arith.constant 0 : index
    %c0_49 = arith.constant 0 : index
    %c0_50 = arith.constant 0 : index
    %133 = vector.load %arg13[%c0_48, %c0_49, %c0_50] : memref<2x128x512xbf16, #tpu.memory_space<vmem>>, vector<1x128x512xbf16>
    %134 = vector.shape_cast %133 : vector<1x128x512xbf16> to vector<128x512xbf16>
    %135 = arith.truncf %132 : vector<8x128xf32> to vector<8x128xbf16>
    %cst_51 = arith.constant dense<0.000000e+00> : vector<8x512xf32>
    %136 = tpu.matmul %135, %134, %cst_51 {dimension_numbers = #tpu.dot_dimension_numbers<[1], [0], [0], [1], [0, 0, 1, 1], [], []>} : vector<8x128xbf16>, vector<128x512xbf16>, vector<8x512xf32> -> vector<8x512xf32>
    %c0_52 = arith.constant 0 : index
    %c0_53 = arith.constant 0 : index
    %c0_54 = arith.constant 0 : index
    %137 = vector.load %arg14[%c0_52, %c0_53, %c0_54] : memref<2x1x512xf32, #tpu.memory_space<vmem>>, vector<1x1x512xf32>
    %138 = vector.shape_cast %137 : vector<1x1x512xf32> to vector<1x512xf32>
    %139 = vector.broadcast %138 : vector<1x512xf32> to vector<8x512xf32>
    %140 = arith.addf %136, %139 : vector<8x512xf32>
    %141 = arith.mulf %140, %140 : vector<8x512xf32>
    %142 = arith.mulf %140, %141 : vector<8x512xf32>
    %cst_55 = arith.constant 4.471500e-02 : f32
    %143 = vector.broadcast %cst_55 : f32 to vector<8x512xf32>
    %144 = arith.mulf %143, %142 : vector<8x512xf32>
    %145 = arith.addf %140, %144 : vector<8x512xf32>
    %cst_56 = arith.constant 0.797884583 : f32
    %146 = vector.broadcast %cst_56 : f32 to vector<8x512xf32>
    %147 = arith.mulf %146, %145 : vector<8x512xf32>
    %148 = math.tanh %147 : vector<8x512xf32>
    %cst_57 = arith.constant 1.000000e+00 : f32
    %149 = vector.broadcast %cst_57 : f32 to vector<8x512xf32>
    %150 = arith.addf %149, %148 : vector<8x512xf32>
    %cst_58 = arith.constant 5.000000e-01 : f32
    %151 = vector.broadcast %cst_58 : f32 to vector<8x512xf32>
    %152 = arith.mulf %151, %150 : vector<8x512xf32>
    %153 = arith.mulf %140, %152 : vector<8x512xf32>
    %c0_59 = arith.constant 0 : index
    %c0_60 = arith.constant 0 : index
    %c0_61 = arith.constant 0 : index
    %154 = vector.load %arg15[%c0_59, %c0_60, %c0_61] : memref<2x512x128xbf16, #tpu.memory_space<vmem>>, vector<1x512x128xbf16>
    %155 = vector.shape_cast %154 : vector<1x512x128xbf16> to vector<512x128xbf16>
    %156 = arith.truncf %153 : vector<8x512xf32> to vector<8x512xbf16>
    %cst_62 = arith.constant dense<0.000000e+00> : vector<8x128xf32>
    %157 = tpu.matmul %156, %155, %cst_62 {dimension_numbers = #tpu.dot_dimension_numbers<[1], [0], [0], [1], [0, 0, 1, 1], [], []>} : vector<8x512xbf16>, vector<512x128xbf16>, vector<8x128xf32> -> vector<8x128xf32>
    %c0_63 = arith.constant 0 : index
    %c0_64 = arith.constant 0 : index
    %c0_65 = arith.constant 0 : index
    %158 = vector.load %arg16[%c0_63, %c0_64, %c0_65] : memref<2x1x128xf32, #tpu.memory_space<vmem>>, vector<1x1x128xf32>
    %159 = vector.shape_cast %158 : vector<1x1x128xf32> to vector<1x128xf32>
    %160 = vector.broadcast %159 : vector<1x128xf32> to vector<8x128xf32>
    %161 = arith.addf %157, %160 : vector<8x128xf32>
    %162 = arith.addf %132, %161 : vector<8x128xf32>
    %c0_66 = arith.constant 0 : index
    %c0_67 = arith.constant 0 : index
    %c0_68 = arith.constant 0 : index
    %163 = vector.load %arg17[%c0_66, %c0_67, %c0_68] : memref<2x1x128xf32, #tpu.memory_space<vmem>>, vector<1x1x128xf32>
    %164 = vector.shape_cast %163 : vector<1x1x128xf32> to vector<1x128xf32>
    %c0_69 = arith.constant 0 : index
    %c0_70 = arith.constant 0 : index
    %c0_71 = arith.constant 0 : index
    %165 = vector.load %arg18[%c0_69, %c0_70, %c0_71] : memref<2x1x128xf32, #tpu.memory_space<vmem>>, vector<1x1x128xf32>
    %166 = vector.shape_cast %165 : vector<1x1x128xf32> to vector<1x128xf32>
    %cst_72 = arith.constant dense<0.000000e+00> : vector<8xf32>
    %167 = vector.multi_reduction <add>, %162, %cst_72 [1] : vector<8x128xf32> to vector<8xf32>
    %168 = vector.shape_cast %167 : vector<8xf32> to vector<8x1xf32>
    %cst_73 = arith.constant 1.280000e+02 : f32
    %169 = vector.broadcast %cst_73 : f32 to vector<8x1xf32>
    %170 = arith.divf %168, %169 : vector<8x1xf32>
    %171 = arith.mulf %162, %162 : vector<8x128xf32>
    %cst_74 = arith.constant dense<0.000000e+00> : vector<8xf32>
    %172 = vector.multi_reduction <add>, %171, %cst_74 [1] : vector<8x128xf32> to vector<8xf32>
    %173 = vector.shape_cast %172 : vector<8xf32> to vector<8x1xf32>
    %cst_75 = arith.constant 1.280000e+02 : f32
    %174 = vector.broadcast %cst_75 : f32 to vector<8x1xf32>
    %175 = arith.divf %173, %174 : vector<8x1xf32>
    %176 = arith.mulf %170, %170 : vector<8x1xf32>
    %177 = arith.subf %175, %176 : vector<8x1xf32>
    %178 = vector.broadcast %170 : vector<8x1xf32> to vector<8x128xf32>
    %179 = arith.subf %162, %178 : vector<8x128xf32>
    %cst_76 = arith.constant 9.99999996E-13 : f32
    %180 = vector.broadcast %cst_76 : f32 to vector<8x1xf32>
    %181 = arith.addf %177, %180 : vector<8x1xf32>
    %182 = math.rsqrt %181 : vector<8x1xf32>
    %183 = vector.broadcast %182 : vector<8x1xf32> to vector<8x128xf32>
    %184 = arith.mulf %179, %183 : vector<8x128xf32>
    %185 = vector.broadcast %164 : vector<1x128xf32> to vector<8x128xf32>
    %186 = arith.mulf %184, %185 : vector<8x128xf32>
    %187 = vector.broadcast %166 : vector<1x128xf32> to vector<8x128xf32>
    %188 = arith.addf %186, %187 : vector<8x128xf32>
    %c1 = arith.constant 1 : index
    %c0_77 = arith.constant 0 : index
    %c0_78 = arith.constant 0 : index
    %189 = vector.load %arg7[%c1, %c0_77, %c0_78] : memref<2x128x384xbf16, #tpu.memory_space<vmem>>, vector<1x128x384xbf16>
    %190 = vector.shape_cast %189 : vector<1x128x384xbf16> to vector<128x384xbf16>
    %191 = arith.truncf %188 : vector<8x128xf32> to vector<8x128xbf16>
    %cst_79 = arith.constant dense<0.000000e+00> : vector<8x384xf32>
    %192 = tpu.matmul %191, %190, %cst_79 {dimension_numbers = #tpu.dot_dimension_numbers<[1], [0], [0], [1], [0, 0, 1, 1], [], []>} : vector<8x128xbf16>, vector<128x384xbf16>, vector<8x384xf32> -> vector<8x384xf32>
    %c1_80 = arith.constant 1 : index
    %c0_81 = arith.constant 0 : index
    %c0_82 = arith.constant 0 : index
    %193 = vector.load %arg8[%c1_80, %c0_81, %c0_82] : memref<2x1x384xf32, #tpu.memory_space<vmem>>, vector<1x1x384xf32>
    %194 = vector.shape_cast %193 : vector<1x1x384xf32> to vector<1x384xf32>
    %195 = vector.broadcast %194 : vector<1x384xf32> to vector<8x384xf32>
    %196 = arith.addf %192, %195 : vector<8x384xf32>
    %197 = vector.extract_strided_slice %196 {offsets = [0, 0], sizes = [8, 128], strides = [1, 1]} : vector<8x384xf32> to vector<8x128xf32>
    %198 = vector.extract_strided_slice %196 {offsets = [0, 128], sizes = [8, 128], strides = [1, 1]} : vector<8x384xf32> to vector<8x128xf32>
    %199 = vector.extract_strided_slice %196 {offsets = [0, 256], sizes = [8, 128], strides = [1, 1]} : vector<8x384xf32> to vector<8x128xf32>
    %200 = vector.extract_strided_slice %197 {offsets = [0, 0], sizes = [8, 32], strides = [1, 1]} : vector<8x128xf32> to vector<8x32xf32>
    %201 = vector.extract_strided_slice %197 {offsets = [0, 32], sizes = [8, 32], strides = [1, 1]} : vector<8x128xf32> to vector<8x32xf32>
    %202 = vector.extract_strided_slice %197 {offsets = [0, 64], sizes = [8, 32], strides = [1, 1]} : vector<8x128xf32> to vector<8x32xf32>
    %203 = vector.extract_strided_slice %197 {offsets = [0, 96], sizes = [8, 32], strides = [1, 1]} : vector<8x128xf32> to vector<8x32xf32>
    %204 = vector.shape_cast %200 : vector<8x32xf32> to vector<1x8x32xf32>
    %205 = vector.shape_cast %201 : vector<8x32xf32> to vector<1x8x32xf32>
    %206 = vector.shape_cast %202 : vector<8x32xf32> to vector<1x8x32xf32>
    %207 = vector.shape_cast %203 : vector<8x32xf32> to vector<1x8x32xf32>
    %208 = tpu.concatenate %204, %205, %206, %207 in 0 : vector<1x8x32xf32>, vector<1x8x32xf32>, vector<1x8x32xf32>, vector<1x8x32xf32> -> vector<4x8x32xf32>
    %209 = vector.extract_strided_slice %198 {offsets = [0, 0], sizes = [8, 32], strides = [1, 1]} : vector<8x128xf32> to vector<8x32xf32>
    %210 = vector.extract_strided_slice %198 {offsets = [0, 32], sizes = [8, 32], strides = [1, 1]} : vector<8x128xf32> to vector<8x32xf32>
    %211 = vector.extract_strided_slice %198 {offsets = [0, 64], sizes = [8, 32], strides = [1, 1]} : vector<8x128xf32> to vector<8x32xf32>
    %212 = vector.extract_strided_slice %198 {offsets = [0, 96], sizes = [8, 32], strides = [1, 1]} : vector<8x128xf32> to vector<8x32xf32>
    %213 = vector.shape_cast %209 : vector<8x32xf32> to vector<1x8x32xf32>
    %214 = vector.shape_cast %210 : vector<8x32xf32> to vector<1x8x32xf32>
    %215 = vector.shape_cast %211 : vector<8x32xf32> to vector<1x8x32xf32>
    %216 = vector.shape_cast %212 : vector<8x32xf32> to vector<1x8x32xf32>
    %217 = tpu.concatenate %213, %214, %215, %216 in 0 : vector<1x8x32xf32>, vector<1x8x32xf32>, vector<1x8x32xf32>, vector<1x8x32xf32> -> vector<4x8x32xf32>
    %218 = vector.extract_strided_slice %199 {offsets = [0, 0], sizes = [8, 32], strides = [1, 1]} : vector<8x128xf32> to vector<8x32xf32>
    %219 = vector.extract_strided_slice %199 {offsets = [0, 32], sizes = [8, 32], strides = [1, 1]} : vector<8x128xf32> to vector<8x32xf32>
    %220 = vector.extract_strided_slice %199 {offsets = [0, 64], sizes = [8, 32], strides = [1, 1]} : vector<8x128xf32> to vector<8x32xf32>
    %221 = vector.extract_strided_slice %199 {offsets = [0, 96], sizes = [8, 32], strides = [1, 1]} : vector<8x128xf32> to vector<8x32xf32>
    %222 = vector.shape_cast %218 : vector<8x32xf32> to vector<1x8x32xf32>
    %223 = vector.shape_cast %219 : vector<8x32xf32> to vector<1x8x32xf32>
    %224 = vector.shape_cast %220 : vector<8x32xf32> to vector<1x8x32xf32>
    %225 = vector.shape_cast %221 : vector<8x32xf32> to vector<1x8x32xf32>
    %226 = tpu.concatenate %222, %223, %224, %225 in 0 : vector<1x8x32xf32>, vector<1x8x32xf32>, vector<1x8x32xf32>, vector<1x8x32xf32> -> vector<4x8x32xf32>
    "tpu.trace_start"() <{level = 10 : i32, message = "hqd,hkd->hqk"}> : () -> ()
    %cst_83 = arith.constant dense<0.000000e+00> : vector<4x8x8xf32>
    %227 = tpu.matmul %208, %217, %cst_83 {dimension_numbers = #tpu.dot_dimension_numbers<[2], [2], [1], [1], [0, 0, 0, 1, 1, 1], [0], [0]>} : vector<4x8x32xf32>, vector<4x8x32xf32>, vector<4x8x8xf32> -> vector<4x8x8xf32>
    "tpu.trace_stop"() : () -> ()
    %228 = vector.broadcast %40 : vector<1x1x8xf32> to vector<4x8x8xf32>
    %229 = arith.addf %227, %228 : vector<4x8x8xf32>
    %230 = math.exp %229 : vector<4x8x8xf32>
    %cst_84 = arith.constant dense<0.000000e+00> : vector<4x8xf32>
    %231 = vector.multi_reduction <add>, %230, %cst_84 [2] : vector<4x8x8xf32> to vector<4x8xf32>
    %232 = vector.shape_cast %231 : vector<4x8xf32> to vector<4x8x1xf32>
    %233 = tpu.reciprocal %232 {approx = true} : vector<4x8x1xf32> -> vector<4x8x1xf32>
    %234 = vector.broadcast %233 : vector<4x8x1xf32> to vector<4x8x8xf32>
    %235 = arith.mulf %230, %234 : vector<4x8x8xf32>
    "tpu.trace_start"() <{level = 10 : i32, message = "hqk,hkd->hqd"}> : () -> ()
    %cst_85 = arith.constant dense<0.000000e+00> : vector<4x8x32xf32>
    %236 = tpu.matmul %235, %226, %cst_85 {dimension_numbers = #tpu.dot_dimension_numbers<[2], [1], [1], [2], [0, 0, 0, 1, 1, 2], [0], [0]>} : vector<4x8x8xf32>, vector<4x8x32xf32>, vector<4x8x32xf32> -> vector<4x8x32xf32>
    "tpu.trace_stop"() : () -> ()
    %237 = vector.extract_strided_slice %236 {offsets = [0, 0, 0], sizes = [1, 8, 32], strides = [1, 1, 1]} : vector<4x8x32xf32> to vector<1x8x32xf32>
    %238 = vector.shape_cast %237 : vector<1x8x32xf32> to vector<8x32xf32>
    %239 = vector.extract_strided_slice %236 {offsets = [1, 0, 0], sizes = [1, 8, 32], strides = [1, 1, 1]} : vector<4x8x32xf32> to vector<1x8x32xf32>
    %240 = vector.shape_cast %239 : vector<1x8x32xf32> to vector<8x32xf32>
    %241 = vector.extract_strided_slice %236 {offsets = [2, 0, 0], sizes = [1, 8, 32], strides = [1, 1, 1]} : vector<4x8x32xf32> to vector<1x8x32xf32>
    %242 = vector.shape_cast %241 : vector<1x8x32xf32> to vector<8x32xf32>
    %243 = vector.extract_strided_slice %236 {offsets = [3, 0, 0], sizes = [1, 8, 32], strides = [1, 1, 1]} : vector<4x8x32xf32> to vector<1x8x32xf32>
    %244 = vector.shape_cast %243 : vector<1x8x32xf32> to vector<8x32xf32>
    %245 = tpu.concatenate %238, %240, %242, %244 in 1 : vector<8x32xf32>, vector<8x32xf32>, vector<8x32xf32>, vector<8x32xf32> -> vector<8x128xf32>
    %c1_86 = arith.constant 1 : index
    %c0_87 = arith.constant 0 : index
    %c0_88 = arith.constant 0 : index
    %246 = vector.load %arg9[%c1_86, %c0_87, %c0_88] : memref<2x128x128xbf16, #tpu.memory_space<vmem>>, vector<1x128x128xbf16>
    %247 = vector.shape_cast %246 : vector<1x128x128xbf16> to vector<128x128xbf16>
    %248 = arith.truncf %245 : vector<8x128xf32> to vector<8x128xbf16>
    %cst_89 = arith.constant dense<0.000000e+00> : vector<8x128xf32>
    %249 = tpu.matmul %248, %247, %cst_89 {dimension_numbers = #tpu.dot_dimension_numbers<[1], [0], [0], [1], [0, 0, 1, 1], [], []>} : vector<8x128xbf16>, vector<128x128xbf16>, vector<8x128xf32> -> vector<8x128xf32>
    %c1_90 = arith.constant 1 : index
    %c0_91 = arith.constant 0 : index
    %c0_92 = arith.constant 0 : index
    %250 = vector.load %arg10[%c1_90, %c0_91, %c0_92] : memref<2x1x128xf32, #tpu.memory_space<vmem>>, vector<1x1x128xf32>
    %251 = vector.shape_cast %250 : vector<1x1x128xf32> to vector<1x128xf32>
    %252 = vector.broadcast %251 : vector<1x128xf32> to vector<8x128xf32>
    %253 = arith.addf %249, %252 : vector<8x128xf32>
    %254 = arith.addf %188, %253 : vector<8x128xf32>
    %c1_93 = arith.constant 1 : index
    %c0_94 = arith.constant 0 : index
    %c0_95 = arith.constant 0 : index
    %255 = vector.load %arg11[%c1_93, %c0_94, %c0_95] : memref<2x1x128xf32, #tpu.memory_space<vmem>>, vector<1x1x128xf32>
    %256 = vector.shape_cast %255 : vector<1x1x128xf32> to vector<1x128xf32>
    %c1_96 = arith.constant 1 : index
    %c0_97 = arith.constant 0 : index
    %c0_98 = arith.constant 0 : index
    %257 = vector.load %arg12[%c1_96, %c0_97, %c0_98] : memref<2x1x128xf32, #tpu.memory_space<vmem>>, vector<1x1x128xf32>
    %258 = vector.shape_cast %257 : vector<1x1x128xf32> to vector<1x128xf32>
    %cst_99 = arith.constant dense<0.000000e+00> : vector<8xf32>
    %259 = vector.multi_reduction <add>, %254, %cst_99 [1] : vector<8x128xf32> to vector<8xf32>
    %260 = vector.shape_cast %259 : vector<8xf32> to vector<8x1xf32>
    %cst_100 = arith.constant 1.280000e+02 : f32
    %261 = vector.broadcast %cst_100 : f32 to vector<8x1xf32>
    %262 = arith.divf %260, %261 : vector<8x1xf32>
    %263 = arith.mulf %254, %254 : vector<8x128xf32>
    %cst_101 = arith.constant dense<0.000000e+00> : vector<8xf32>
    %264 = vector.multi_reduction <add>, %263, %cst_101 [1] : vector<8x128xf32> to vector<8xf32>
    %265 = vector.shape_cast %264 : vector<8xf32> to vector<8x1xf32>
    %cst_102 = arith.constant 1.280000e+02 : f32
    %266 = vector.broadcast %cst_102 : f32 to vector<8x1xf32>
    %267 = arith.divf %265, %266 : vector<8x1xf32>
    %268 = arith.mulf %262, %262 : vector<8x1xf32>
    %269 = arith.subf %267, %268 : vector<8x1xf32>
    %270 = vector.broadcast %262 : vector<8x1xf32> to vector<8x128xf32>
    %271 = arith.subf %254, %270 : vector<8x128xf32>
    %cst_103 = arith.constant 9.99999996E-13 : f32
    %272 = vector.broadcast %cst_103 : f32 to vector<8x1xf32>
    %273 = arith.addf %269, %272 : vector<8x1xf32>
    %274 = math.rsqrt %273 : vector<8x1xf32>
    %275 = vector.broadcast %274 : vector<8x1xf32> to vector<8x128xf32>
    %276 = arith.mulf %271, %275 : vector<8x128xf32>
    %277 = vector.broadcast %256 : vector<1x128xf32> to vector<8x128xf32>
    %278 = arith.mulf %276, %277 : vector<8x128xf32>
    %279 = vector.broadcast %258 : vector<1x128xf32> to vector<8x128xf32>
    %280 = arith.addf %278, %279 : vector<8x128xf32>
    %c1_104 = arith.constant 1 : index
    %c0_105 = arith.constant 0 : index
    %c0_106 = arith.constant 0 : index
    %281 = vector.load %arg13[%c1_104, %c0_105, %c0_106] : memref<2x128x512xbf16, #tpu.memory_space<vmem>>, vector<1x128x512xbf16>
    %282 = vector.shape_cast %281 : vector<1x128x512xbf16> to vector<128x512xbf16>
    %283 = arith.truncf %280 : vector<8x128xf32> to vector<8x128xbf16>
    %cst_107 = arith.constant dense<0.000000e+00> : vector<8x512xf32>
    %284 = tpu.matmul %283, %282, %cst_107 {dimension_numbers = #tpu.dot_dimension_numbers<[1], [0], [0], [1], [0, 0, 1, 1], [], []>} : vector<8x128xbf16>, vector<128x512xbf16>, vector<8x512xf32> -> vector<8x512xf32>
    %c1_108 = arith.constant 1 : index
    %c0_109 = arith.constant 0 : index
    %c0_110 = arith.constant 0 : index
    %285 = vector.load %arg14[%c1_108, %c0_109, %c0_110] : memref<2x1x512xf32, #tpu.memory_space<vmem>>, vector<1x1x512xf32>
    %286 = vector.shape_cast %285 : vector<1x1x512xf32> to vector<1x512xf32>
    %287 = vector.broadcast %286 : vector<1x512xf32> to vector<8x512xf32>
    %288 = arith.addf %284, %287 : vector<8x512xf32>
    %289 = arith.mulf %288, %288 : vector<8x512xf32>
    %290 = arith.mulf %288, %289 : vector<8x512xf32>
    %cst_111 = arith.constant 4.471500e-02 : f32
    %291 = vector.broadcast %cst_111 : f32 to vector<8x512xf32>
    %292 = arith.mulf %291, %290 : vector<8x512xf32>
    %293 = arith.addf %288, %292 : vector<8x512xf32>
    %cst_112 = arith.constant 0.797884583 : f32
    %294 = vector.broadcast %cst_112 : f32 to vector<8x512xf32>
    %295 = arith.mulf %294, %293 : vector<8x512xf32>
    %296 = math.tanh %295 : vector<8x512xf32>
    %cst_113 = arith.constant 1.000000e+00 : f32
    %297 = vector.broadcast %cst_113 : f32 to vector<8x512xf32>
    %298 = arith.addf %297, %296 : vector<8x512xf32>
    %cst_114 = arith.constant 5.000000e-01 : f32
    %299 = vector.broadcast %cst_114 : f32 to vector<8x512xf32>
    %300 = arith.mulf %299, %298 : vector<8x512xf32>
    %301 = arith.mulf %288, %300 : vector<8x512xf32>
    %c1_115 = arith.constant 1 : index
    %c0_116 = arith.constant 0 : index
    %c0_117 = arith.constant 0 : index
    %302 = vector.load %arg15[%c1_115, %c0_116, %c0_117] : memref<2x512x128xbf16, #tpu.memory_space<vmem>>, vector<1x512x128xbf16>
    %303 = vector.shape_cast %302 : vector<1x512x128xbf16> to vector<512x128xbf16>
    %304 = arith.truncf %301 : vector<8x512xf32> to vector<8x512xbf16>
    %cst_118 = arith.constant dense<0.000000e+00> : vector<8x128xf32>
    %305 = tpu.matmul %304, %303, %cst_118 {dimension_numbers = #tpu.dot_dimension_numbers<[1], [0], [0], [1], [0, 0, 1, 1], [], []>} : vector<8x512xbf16>, vector<512x128xbf16>, vector<8x128xf32> -> vector<8x128xf32>
    %c1_119 = arith.constant 1 : index
    %c0_120 = arith.constant 0 : index
    %c0_121 = arith.constant 0 : index
    %306 = vector.load %arg16[%c1_119, %c0_120, %c0_121] : memref<2x1x128xf32, #tpu.memory_space<vmem>>, vector<1x1x128xf32>
    %307 = vector.shape_cast %306 : vector<1x1x128xf32> to vector<1x128xf32>
    %308 = vector.broadcast %307 : vector<1x128xf32> to vector<8x128xf32>
    %309 = arith.addf %305, %308 : vector<8x128xf32>
    %310 = arith.addf %280, %309 : vector<8x128xf32>
    %c1_122 = arith.constant 1 : index
    %c0_123 = arith.constant 0 : index
    %c0_124 = arith.constant 0 : index
    %311 = vector.load %arg17[%c1_122, %c0_123, %c0_124] : memref<2x1x128xf32, #tpu.memory_space<vmem>>, vector<1x1x128xf32>
    %312 = vector.shape_cast %311 : vector<1x1x128xf32> to vector<1x128xf32>
    %c1_125 = arith.constant 1 : index
    %c0_126 = arith.constant 0 : index
    %c0_127 = arith.constant 0 : index
    %313 = vector.load %arg18[%c1_125, %c0_126, %c0_127] : memref<2x1x128xf32, #tpu.memory_space<vmem>>, vector<1x1x128xf32>
    %314 = vector.shape_cast %313 : vector<1x1x128xf32> to vector<1x128xf32>
    %cst_128 = arith.constant dense<0.000000e+00> : vector<8xf32>
    %315 = vector.multi_reduction <add>, %310, %cst_128 [1] : vector<8x128xf32> to vector<8xf32>
    %316 = vector.shape_cast %315 : vector<8xf32> to vector<8x1xf32>
    %cst_129 = arith.constant 1.280000e+02 : f32
    %317 = vector.broadcast %cst_129 : f32 to vector<8x1xf32>
    %318 = arith.divf %316, %317 : vector<8x1xf32>
    %319 = arith.mulf %310, %310 : vector<8x128xf32>
    %cst_130 = arith.constant dense<0.000000e+00> : vector<8xf32>
    %320 = vector.multi_reduction <add>, %319, %cst_130 [1] : vector<8x128xf32> to vector<8xf32>
    %321 = vector.shape_cast %320 : vector<8xf32> to vector<8x1xf32>
    %cst_131 = arith.constant 1.280000e+02 : f32
    %322 = vector.broadcast %cst_131 : f32 to vector<8x1xf32>
    %323 = arith.divf %321, %322 : vector<8x1xf32>
    %324 = arith.mulf %318, %318 : vector<8x1xf32>
    %325 = arith.subf %323, %324 : vector<8x1xf32>
    %326 = vector.broadcast %318 : vector<8x1xf32> to vector<8x128xf32>
    %327 = arith.subf %310, %326 : vector<8x128xf32>
    %cst_132 = arith.constant 9.99999996E-13 : f32
    %328 = vector.broadcast %cst_132 : f32 to vector<8x1xf32>
    %329 = arith.addf %325, %328 : vector<8x1xf32>
    %330 = math.rsqrt %329 : vector<8x1xf32>
    %331 = vector.broadcast %330 : vector<8x1xf32> to vector<8x128xf32>
    %332 = arith.mulf %327, %331 : vector<8x128xf32>
    %333 = vector.broadcast %312 : vector<1x128xf32> to vector<8x128xf32>
    %334 = arith.mulf %332, %333 : vector<8x128xf32>
    %335 = vector.broadcast %314 : vector<1x128xf32> to vector<8x128xf32>
    %336 = arith.addf %334, %335 : vector<8x128xf32>
    %337 = vector.extract_strided_slice %336 {offsets = [0, 0], sizes = [1, 128], strides = [1, 1]} : vector<8x128xf32> to vector<1x128xf32>
    %c0_133 = arith.constant 0 : index
    %c0_134 = arith.constant 0 : index
    %338 = vector.load %arg19[%c0_133, %c0_134] : memref<128x128xbf16, #tpu.memory_space<vmem>>, vector<128x128xbf16>
    %339 = arith.truncf %337 : vector<1x128xf32> to vector<1x128xbf16>
    %cst_135 = arith.constant dense<0.000000e+00> : vector<1x128xf32>
    %340 = tpu.matmul %339, %338, %cst_135 {dimension_numbers = #tpu.dot_dimension_numbers<[1], [0], [0], [1], [0, 0, 1, 1], [], []>} : vector<1x128xbf16>, vector<128x128xbf16>, vector<1x128xf32> -> vector<1x128xf32>
    %c0_136 = arith.constant 0 : index
    %c0_137 = arith.constant 0 : index
    %341 = vector.load %arg20[%c0_136, %c0_137] : memref<1x128xf32, #tpu.memory_space<vmem>>, vector<1x128xf32>
    %342 = arith.addf %340, %341 : vector<1x128xf32>
    %343 = vector.shape_cast %342 : vector<1x128xf32> to vector<1x1x128xf32>
    %c0_138 = arith.constant 0 : index
    %c0_139 = arith.constant 0 : index
    %c0_140 = arith.constant 0 : index
    %344 = vector.load %arg21[%c0_138, %c0_139, %c0_140] : memref<1x1x128xf32, #tpu.memory_space<vmem>>, vector<1x1x128xf32>
    tpu.vector_store %arg21[%c0_138, %c0_139, %c0_140], %343 {strides = array<i32>} : memref<1x1x128xf32, #tpu.memory_space<vmem>>, vector<1x1x128xf32>,
    return
  }
  func.func @transform_0(%arg0: i32) -> (i32, i32, i32) {
    %c0_i32 = arith.constant 0 : i32
    %c0_i32_0 = arith.constant 0 : i32
    %c0_i32_1 = arith.constant 0 : i32
    return %arg0, %c0_i32, %c0_i32_0 : i32, i32, i32
  }
  func.func @transform_1(%arg0: i32) -> (i32, i32, i32) {
    %c0_i32 = arith.constant 0 : i32
    %c0_i32_0 = arith.constant 0 : i32
    %c0_i32_1 = arith.constant 0 : i32
    return %arg0, %c0_i32, %c0_i32_0 : i32, i32, i32
  }
  func.func @transform_2(%arg0: i32) -> (i32, i32) {
    %c0_i32 = arith.constant 0 : i32
    %c0_i32_0 = arith.constant 0 : i32
    %c0_i32_1 = arith.constant 0 : i32
    return %c0_i32, %c0_i32_0 : i32, i32
  }
  func.func @transform_3(%arg0: i32) -> (i32, i32) {
    %c0_i32 = arith.constant 0 : i32
    %c0_i32_0 = arith.constant 0 : i32
    %c0_i32_1 = arith.constant 0 : i32
    return %c0_i32, %c0_i32_0 : i32, i32
  }
  func.func @transform_4(%arg0: i32) -> (i32, i32) {
    %c0_i32 = arith.constant 0 : i32
    %c0_i32_0 = arith.constant 0 : i32
    %c0_i32_1 = arith.constant 0 : i32
    return %c0_i32, %c0_i32_0 : i32, i32
  }
  func.func @transform_5(%arg0: i32) -> (i32, i32) {
    %c0_i32 = arith.constant 0 : i32
    %c0_i32_0 = arith.constant 0 : i32
    %c0_i32_1 = arith.constant 0 : i32
    return %c0_i32, %c0_i32_0 : i32, i32
  }
  func.func @transform_6(%arg0: i32) -> (i32, i32, i32) {
    %c0_i32 = arith.constant 0 : i32
    %c0_i32_0 = arith.constant 0 : i32
    %c0_i32_1 = arith.constant 0 : i32
    %c0_i32_2 = arith.constant 0 : i32
    return %c0_i32, %c0_i32_0, %c0_i32_1 : i32, i32, i32
  }
  func.func @transform_7(%arg0: i32) -> (i32, i32, i32) {
    %c0_i32 = arith.constant 0 : i32
    %c0_i32_0 = arith.constant 0 : i32
    %c0_i32_1 = arith.constant 0 : i32
    %c0_i32_2 = arith.constant 0 : i32
    return %c0_i32, %c0_i32_0, %c0_i32_1 : i32, i32, i32
  }
  func.func @transform_8(%arg0: i32) -> (i32, i32, i32) {
    %c0_i32 = arith.constant 0 : i32
    %c0_i32_0 = arith.constant 0 : i32
    %c0_i32_1 = arith.constant 0 : i32
    %c0_i32_2 = arith.constant 0 : i32
    return %c0_i32, %c0_i32_0, %c0_i32_1 : i32, i32, i32
  }
  func.func @transform_9(%arg0: i32) -> (i32, i32, i32) {
    %c0_i32 = arith.constant 0 : i32
    %c0_i32_0 = arith.constant 0 : i32
    %c0_i32_1 = arith.constant 0 : i32
    %c0_i32_2 = arith.constant 0 : i32
    return %c0_i32, %c0_i32_0, %c0_i32_1 : i32, i32, i32
  }
  func.func @transform_10(%arg0: i32) -> (i32, i32, i32) {
    %c0_i32 = arith.constant 0 : i32
    %c0_i32_0 = arith.constant 0 : i32
    %c0_i32_1 = arith.constant 0 : i32
    %c0_i32_2 = arith.constant 0 : i32
    return %c0_i32, %c0_i32_0, %c0_i32_1 : i32, i32, i32
  }
  func.func @transform_11(%arg0: i32) -> (i32, i32, i32) {
    %c0_i32 = arith.constant 0 : i32
    %c0_i32_0 = arith.constant 0 : i32
    %c0_i32_1 = arith.constant 0 : i32
    %c0_i32_2 = arith.constant 0 : i32
    return %c0_i32, %c0_i32_0, %c0_i32_1 : i32, i32, i32
  }
  func.func @transform_12(%arg0: i32) -> (i32, i32, i32) {
    %c0_i32 = arith.constant 0 : i32
    %c0_i32_0 = arith.constant 0 : i32
    %c0_i32_1 = arith.constant 0 : i32
    %c0_i32_2 = arith.constant 0 : i32
    return %c0_i32, %c0_i32_0, %c0_i32_1 : i32, i32, i32
  }
  func.func @transform_13(%arg0: i32) -> (i32, i32, i32) {
    %c0_i32 = arith.constant 0 : i32
    %c0_i32_0 = arith.constant 0 : i32
    %c0_i32_1 = arith.constant 0 : i32
    %c0_i32_2 = arith.constant 0 : i32
    return %c0_i32, %c0_i32_0, %c0_i32_1 : i32, i32, i32
  }
  func.func @transform_14(%arg0: i32) -> (i32, i32, i32) {
    %c0_i32 = arith.constant 0 : i32
    %c0_i32_0 = arith.constant 0 : i32
    %c0_i32_1 = arith.constant 0 : i32
    %c0_i32_2 = arith.constant 0 : i32
    return %c0_i32, %c0_i32_0, %c0_i32_1 : i32, i32, i32
  }
  func.func @transform_15(%arg0: i32) -> (i32, i32, i32) {
    %c0_i32 = arith.constant 0 : i32
    %c0_i32_0 = arith.constant 0 : i32
    %c0_i32_1 = arith.constant 0 : i32
    %c0_i32_2 = arith.constant 0 : i32
    return %c0_i32, %c0_i32_0, %c0_i32_1 : i32, i32, i32
  }
  func.func @transform_16(%arg0: i32) -> (i32, i32, i32) {
    %c0_i32 = arith.constant 0 : i32
    %c0_i32_0 = arith.constant 0 : i32
    %c0_i32_1 = arith.constant 0 : i32
    %c0_i32_2 = arith.constant 0 : i32
    return %c0_i32, %c0_i32_0, %c0_i32_1 : i32, i32, i32
  }
  func.func @transform_17(%arg0: i32) -> (i32, i32, i32) {
    %c0_i32 = arith.constant 0 : i32
    %c0_i32_0 = arith.constant 0 : i32
    %c0_i32_1 = arith.constant 0 : i32
    %c0_i32_2 = arith.constant 0 : i32
    return %c0_i32, %c0_i32_0, %c0_i32_1 : i32, i32, i32
  }
  func.func @transform_18(%arg0: i32) -> (i32, i32) {
    %c0_i32 = arith.constant 0 : i32
    %c0_i32_0 = arith.constant 0 : i32
    %c0_i32_1 = arith.constant 0 : i32
    return %c0_i32, %c0_i32_0 : i32, i32
  }
  func.func @transform_19(%arg0: i32) -> (i32, i32) {
    %c0_i32 = arith.constant 0 : i32
    %c0_i32_0 = arith.constant 0 : i32
    %c0_i32_1 = arith.constant 0 : i32
    return %c0_i32, %c0_i32_0 : i32, i32
  }
  func.func @transform_20(%arg0: i32) -> (i32, i32, i32) {
    %c0_i32 = arith.constant 0 : i32
    %c0_i32_0 = arith.constant 0 : i32
    %c0_i32_1 = arith.constant 0 : i32
    return %arg0, %c0_i32, %c0_i32_0 : i32, i32, i32
  }
}

</mosaic_0001>

<bundles_post_ra>
// kernel: emotion_classifier_forward.1
= control target key start
LH: loop header
LB: loop body
LE: loop exit
PB: predicated region body
PF: predicated region fallthrough
CT: control target
= control target key end

     0   :  { %s7215_s0 = inlined_call_operand.vmem [shape: s32[2,8,1], index: 0, kind: input, shape index: {}]   ;;  %s7216_s1 = inlined_call_operand.vmem [shape: s32[2,1,8], index: 1, kind: input, shape index: {}]   ;;  %s7217_s2 = inlined_call_operand.vmem [shape: f32[64,128], index: 2, kind: input, shape index: {}]   ;;  %s7218_s3 = inlined_call_operand.vmem [shape: f32[8,128], index: 3, kind: input, shape index: {}]   ;;  %s7219_s4 = inlined_call_operand.hbm [shape: f32[1,128], index: 4, kind: input, shape index: {}]   ;;  %s7220_s5 = inlined_call_operand.hbm [shape: f32[1,128], index: 5, kind: input, shape index: {}]   ;;  %s7221_s6 = inlined_call_operand.hbm [shape: bf16[2,128,384], index: 6, kind: input, shape index: {}]   ;;  %s7222_s7 = inlined_call_operand.vmem [shape: f32[2,1,384], index: 7, kind: input, shape index: {}]   ;;  %s7223_s8 = inlined_call_operand.hbm [shape: bf16[2,128,128], index: 8, kind: input, shape index: {}]   ;;  %s7224_s9 = inlined_call_operand.hbm [shape: f32[2,1,128], index: 9, kind: input, shape index: {}]   ;;  %s7225_s10 = inlined_call_operand.hbm [shape: f32[2,1,128], index: 10, kind: input, shape index: {}]   ;;  %s7226_s11 = inlined_call_operand.hbm [shape: f32[2,1,128], index: 11, kind: input, shape index: {}]   ;;  %s7227_s12 = inlined_call_operand.hbm [shape: bf16[2,128,512], index: 12, kind: input, shape index: {}]   ;;  %s7228_s13 = inlined_call_operand.vmem [shape: f32[2,1,512], index: 13, kind: input, shape index: {}]   ;;  %s7229_s14 = inlined_call_operand.hbm [shape: bf16[2,512,128], index: 14, kind: input, shape index: {}]   ;;  %s7230_s15 = inlined_call_operand.hbm [shape: f32[2,1,128], index: 15, kind: input, shape index: {}]   ;;  %s7231_s16 = inlined_call_operand.hbm [shape: f32[2,1,128], index: 16, kind: input, shape index: {}]   ;;  %s7232_s17 = inlined_call_operand.hbm [shape: f32[2,1,128], index: 17, kind: input, shape index: {}]   ;;  %s7233_s18 = inlined_call_operand.hbm [shape: bf16[128,128], index: 18, kind: input, shape index: {}]   ;;  %s7234_s19 = inlined_call_operand.hbm [shape: f32[1,128], index: 19, kind: input, shape index: {}]   ;;  %s7235_s20 = inlined_call_operand.vmem [shape: f32[2,1,128], index: 20, kind: output, shape index: {}]  }
   0x1   :  { %7252 = sst [smem:[#allocation33_spill]] %s7215_s0 }
   0x2   :  { %7253 = sst [smem:[#allocation34_spill]] %s7216_s1 }
   0x3   :  { %7254 = sst [smem:[#allocation35_spill]] %s7217_s2 }
   0x4   :  { %7255 = sst [smem:[#allocation36_spill]] %s7218_s3 }
   0x5   :  { %7256 = sst [smem:[#allocation37_spill]] %s7219_s4 }
   0x6   :  { %7257 = sst [smem:[#allocation38_spill]] %s7220_s5 }
   0x7   :  { %7258 = sst [smem:[#allocation39_spill]] %s7221_s6 }
   0x8   :  { %7259 = sst [smem:[#allocation40_spill]] %s7222_s7 }
   0x9   :  { %7260 = sst [smem:[#allocation41_spill]] %s7228_s13 }
   0xa   :  { %7261 = sst [smem:[#allocation42_spill]] %s7235_s20 }
   0xb   :  { %25 = vsyncpa [#allocation3], 0 }
   0xc   :  { %26 = vsyncpa [#allocation5], 0 }
   0xd   :  { %27 = vsyncpa [#allocation8], 0 }
   0xe   :  { %28 = vsyncpa [#allocation11], 0 }
   0xf   :  { %29 = vsyncpa [#allocation14], 0 }
  0x10   :  { %30 = vsyncpa [#allocation17], 0 }
  0x11   :  { %31 = vsyncpa [#allocation20], 0 }
  0x12   :  { %32 = vsyncpa [#allocation23], 0  ;;  %s6511_s1 = smov 0  }
  0x13 LB: > { %7262 = sst [smem:[#allocation32_spill]] %s6376_s1  ;;  %s6378_s22 = smov [#allocation4]   ;;  %s6376_s1 = sphi %s6511_s1, %s38_s1  }
  0x14   : > { %s529_s23 = sshll.u32 %s6378_s22, 4  ;;  %s6517_s24 = sadd.s32 4294967295, %s6376_s1   ;;  %s530_s23 = int_to_ptr.vmem [resolvable:$true] %s529_s23 }
  0x15   : > { %p4815_p0 = scmp.ge.s32.totalorder %s6376_s1, 1  ;;  %p499_p1 = scmp.lt.s32.totalorder %s6376_s1, 3 }
  0x16   : > { %p7238_p2 = scmp.eq.s32.totalorder %s6517_s24, 0  ;;  %s6379_s25 = smov [#allocation7]  }
  0x17   : > { %p6522_p3 = pnand %p4815_p0, %p499_p1  ;;  %s555_s3 = sshll.u32 %s6379_s25, 4  ;;  %s6528_s3 = int_to_ptr.vmem [resolvable:$true] %s555_s3 }
  0x18   : > { %s6380_s27 = smov [#allocation10]   ;;  %s7265_s5 = sld [smem:[#allocation38_spill]] }
  0x19   : > { %s7263_s2 = scalar_select %p6522_p3, 1, 0 }
  0x1a   : > { %p5532_p4 = pneg %p6522_p3  ;;  %s6536_s28 = sshll.u32 %s6380_s27, 4  ;;  %s582_s28 = int_to_ptr.vmem [resolvable:$true] %s6536_s28 }
  0x1c   : > { %p6532_p5 = pnand %p7238_p2, %p5532_p4 }
  0x1e   : > { %s5946_s30 = scalar_lea.hbm %s7265_s5, 16  ;;  %p6546_p7 = pneg %p6532_p5 }
  0x1f   : > { %p5947_p6 = scmp.ne.s32.totalorder %s7265_s5, %s5946_s30  ;;  %p5953_p10 = scmp.lt.u32.totalorder %s5946_s30, %s7265_s5 }
  0x21   : > { %p5949_p8 = pnand %p6546_p7, %p5947_p6 }
  0x23   : > { %p5950_p9 = pneg %p5949_p8 }
  0x25   : > { %p5955_p11 = pnand %p5953_p10, %p5950_p9 }
  0x27   : > { %5958 = shalt.err (!%p5955_p11)
}
  0x28   : > { %s5959_s4 = scalar_lea.vmem %s530_s23, 16  ;;  %s5966_s29 = scalar_lea.vmem %s530_s23, 32 }
  0x29   : > { %p5960_p12 = scmp.ne.s32.totalorder %s530_s23, %s5959_s4  ;;  %p5967_p1 = scmp.lt.s32.totalorder %s530_s23, %s530_s23 }
  0x2a   : > { %p5968_p4 = scmp.lt.s32.totalorder %s5966_s29, %s5959_s4 }
  0x2b   : > { %p5962_p13 = pnand %p5960_p12, %p6546_p7 }
  0x2c   : > { %p5969_p2 = por %p5968_p4, %p5967_p1 }
  0x2d   : > { %p5963_p0 = pneg %p5962_p13 }
  0x2f   : > { %p5970_p3 = pnand %p5969_p2, %p5963_p0 }
  0x31   : > { %5973 = shalt.err (!%p5970_p3)
}
  0x32   : > { %5538 = dma.hbm_to_vmem [thread:$0]  (!%p6532_p5), %s7265_s5, 16, %s530_s23, [#allocation5]  }
  0x33   : > { %s5974_s27 = scalar_lea.hbm %s7223_s8, 2048 }
  0x34   : > { %p5975_p6 = scmp.ne.s32.totalorder %s7223_s8, %s5974_s27  ;;  %p5981_p2 = scmp.lt.u32.totalorder %s5974_s27, %s7223_s8 }
  0x36   : > { %p5977_p8 = pnand %p5975_p6, %p6546_p7 }
  0x38   : > { %p5978_p9 = pneg %p5977_p8 }
  0x3a   : > { %p5983_p3 = pnand %p5981_p2, %p5978_p9 }
  0x3c   : > { %5986 = shalt.err (!%p5983_p3)
}
  0x3d   : > { %s5987_s23 = scalar_lea.vmem %s6528_s3, 2048  ;;  %p5995_p13 = scmp.lt.s32.totalorder %s6528_s3, %s6528_s3 }
  0x3e   : > { %p5988_p10 = scmp.ne.s32.totalorder %s6528_s3, %s5987_s23  ;;  %p5996_p0 = scmp.lt.s32.totalorder %s5987_s23, %s5987_s23 }
  0x40   : > { %p5990_p11 = pnand %p5988_p10, %p6546_p7  ;;  %p5997_p1 = por %p5996_p0, %p5995_p13 }
  0x42   : > { %p5991_p12 = pneg %p5990_p11 }
  0x44   : > { %p5998_p4 = pnand %p5997_p1, %p5991_p12 }
  0x46   : > { %6001 = shalt.err (!%p5998_p4)
}
  0x47   : > { %s7243_s20 = smov 64   ;;  %s7245_s1 = smov 4  }
  0x48   : > { %5544 = dma.hbm_to_vmem [thread:$0]  (!%p6532_p5), %s7223_s8, 2048, %s6528_s3, [#allocation8], %s7243_s20, %s7243_s20, %s7245_s1  }
  0x49   : > { %s6383_s30 = smov [#allocation13]   ;;  %s6002_s29 = scalar_lea.hbm %s7225_s10, 32 }
  0x4a   : > { %s607_s25 = sshll.u32 %s6383_s30, 4  ;;  %p6003_p6 = scmp.ne.s32.totalorder %s7225_s10, %s6002_s29  ;;  %s608_s25 = int_to_ptr.vmem [resolvable:$true] %s607_s25 }
  0x4b   : > { %p6009_p2 = scmp.lt.u32.totalorder %s6002_s29, %s7225_s10 }
  0x4c   : > { %p6005_p8 = pnand %p6003_p6, %p6546_p7 }
  0x4e   : > { %p6006_p9 = pneg %p6005_p8 }
  0x50   : > { %p6011_p3 = pnand %p6009_p2, %p6006_p9 }
  0x52   : > { %6014 = shalt.err (!%p6011_p3)
}
  0x53   : > { %s6015_s3 = scalar_lea.vmem %s582_s28, 32  ;;  %p6023_p13 = scmp.lt.s32.totalorder %s582_s28, %s582_s28 }
  0x54   : > { %p6016_p10 = scmp.ne.s32.totalorder %s582_s28, %s6015_s3  ;;  %p6024_p0 = scmp.lt.s32.totalorder %s6015_s3, %s6015_s3 }
  0x56   : > { %p6018_p11 = pnand %p6016_p10, %p6546_p7  ;;  %p6025_p1 = por %p6024_p0, %p6023_p13 }
  0x58   : > { %p6019_p12 = pneg %p6018_p11 }
  0x5a   : > { %p6026_p4 = pnand %p6025_p1, %p6019_p12 }
  0x5c   : > { %6029 = shalt.err (!%p6026_p4)
}
  0x5d   : > { %s7247_s5 = smov 16   ;;  %s7249_s0 = smov 1  }
  0x5e   : > { %5550 = dma.hbm_to_vmem [thread:$0]  (!%p6532_p5), %s7225_s10, 32, %s582_s28, [#allocation11], %s7247_s5, %s7247_s5, %s7249_s0  }
  0x5f   : > { %s6030_s27 = scalar_lea.hbm %s7227_s12, 8192 }
  0x60   : > { %p6031_p6 = scmp.ne.s32.totalorder %s7227_s12, %s6030_s27  ;;  %p6037_p2 = scmp.lt.u32.totalorder %s6030_s27, %s7227_s12 }
  0x62   : > { %p6033_p8 = pnand %p6031_p6, %p6546_p7 }
  0x64   : > { %p6034_p9 = pneg %p6033_p8 }
  0x66   : > { %p6039_p3 = pnand %p6037_p2, %p6034_p9 }
  0x68   : > { %6042 = shalt.err (!%p6039_p3)
}
  0x69   : > { %s6043_s7 = scalar_lea.vmem %s608_s25, 8192  ;;  %p6051_p13 = scmp.lt.s32.totalorder %s608_s25, %s608_s25 }
  0x6a   : > { %p6044_p10 = scmp.ne.s32.totalorder %s608_s25, %s6043_s7  ;;  %p6052_p0 = scmp.lt.s32.totalorder %s6043_s7, %s6043_s7 }
  0x6c   : > { %p6046_p11 = pnand %p6044_p10, %p6546_p7  ;;  %p6053_p1 = por %p6052_p0, %p6051_p13 }
  0x6e   : > { %p6047_p12 = pneg %p6046_p11 }
  0x70   : > { %p6054_p4 = pnand %p6053_p1, %p6047_p12 }
  0x72   : > { %6057 = shalt.err (!%p6054_p4)
}
  0x73   : > { %s6386_s28 = smov 256   ;;  %s6387_s30 = smov [#allocation16]  }
  0x74   : > { %5556 = dma.hbm_to_vmem [thread:$0]  (!%p6532_p5), %s7227_s12, 8192, %s608_s25, [#allocation14], %s6386_s28, %s6386_s28, %s7247_s5  }
  0x75   : > { %s636_s27 = sshll.u32 %s6387_s30, 4  ;;  %s6388_s4 = smov [#allocation19]   ;;  %s637_s27 = int_to_ptr.vmem [resolvable:$true] %s636_s27 }
  0x76   : > { %s662_s29 = sshll.u32 %s6388_s4, 4  ;;  %s6058_s7 = scalar_lea.hbm %s7230_s15, 32  ;;  %s6629_s29 = int_to_ptr.vmem [resolvable:$true] %s662_s29 }
  0x77   : > { %p6059_p6 = scmp.ne.s32.totalorder %s7230_s15, %s6058_s7  ;;  %p6065_p2 = scmp.lt.u32.totalorder %s6058_s7, %s7230_s15 }
  0x79   : > { %p6061_p8 = pnand %p6059_p6, %p6546_p7 }
  0x7b   : > { %p6062_p9 = pneg %p6061_p8 }
  0x7d   : > { %p6067_p3 = pnand %p6065_p2, %p6062_p9 }
  0x7f   : > { %6070 = shalt.err (!%p6067_p3)
}
  0x80   : > { %s6071_s28 = scalar_lea.vmem %s637_s27, 32  ;;  %p6079_p13 = scmp.lt.s32.totalorder %s637_s27, %s637_s27 }
  0x81   : > { %p6072_p10 = scmp.ne.s32.totalorder %s637_s27, %s6071_s28  ;;  %p6080_p0 = scmp.lt.s32.totalorder %s6071_s28, %s6071_s28 }
  0x83   : > { %p6074_p11 = pnand %p6072_p10, %p6546_p7  ;;  %p6081_p1 = por %p6080_p0, %p6079_p13 }
  0x85   : > { %p6075_p12 = pneg %p6074_p11 }
  0x87   : > { %p6082_p4 = pnand %p6081_p1, %p6075_p12 }
  0x89   : > { %6085 = shalt.err (!%p6082_p4)
}
  0x8a   : > { %5562 = dma.hbm_to_vmem [thread:$0]  (!%p6532_p5), %s7230_s15, 32, %s637_s27, [#allocation17], %s7247_s5, %s7247_s5, %s7249_s0  }
  0x8b   : > { %s6086_s4 = scalar_lea.hbm %s7232_s17, 32 }
  0x8c   : > { %p6087_p6 = scmp.ne.s32.totalorder %s7232_s17, %s6086_s4  ;;  %p6093_p2 = scmp.lt.u32.totalorder %s6086_s4, %s7232_s17 }
  0x8e   : > { %p6089_p8 = pnand %p6087_p6, %p6546_p7 }
  0x90   : > { %p6090_p9 = pneg %p6089_p8 }
  0x92   : > { %p6095_p3 = pnand %p6093_p2, %p6090_p9 }
  0x94   : > { %6098 = shalt.err (!%p6095_p3)
}
  0x95   : > { %s6099_s27 = scalar_lea.vmem %s6629_s29, 32  ;;  %p6107_p13 = scmp.lt.s32.totalorder %s6629_s29, %s6629_s29 }
  0x96   : > { %p6100_p10 = scmp.ne.s32.totalorder %s6629_s29, %s6099_s27  ;;  %p6108_p0 = scmp.lt.s32.totalorder %s6099_s27, %s6099_s27 }
  0x98   : > { %p6102_p11 = pnand %p6100_p10, %p6546_p7  ;;  %p6109_p1 = por %p6108_p0, %p6107_p13 }
  0x9a   : > { %p6103_p12 = pneg %p6102_p11 }
  0x9c   : > { %p6110_p4 = pnand %p6109_p1, %p6103_p12 }
  0x9e   : > { %6113 = shalt.err (!%p6110_p4)
}
  0x9f   : > { %5568 = dma.hbm_to_vmem [thread:$0]  (!%p6532_p5), %s7232_s17, 32, %s6629_s29, [#allocation20], %s7247_s5, %s7247_s5, %s7249_s0  }
  0xa0   : > { %s6389_s20 = smov [#allocation2]   ;;  %s6390_s21 = smov [#allocation6]  }
  0xa1   : > { %s518_s1 = sshll.u32 %s6389_s20, 4  ;;  %s539_s30 = sshll.u32 %s6390_s21, 4  ;;  %s519_s1 = int_to_ptr.vmem [resolvable:$true] %s518_s1  ;;  %s6678_s30 = int_to_ptr.vmem [resolvable:$true] %s539_s30 }
  0xa2   : > { %s7267_s3 = sld [smem:[#allocation37_spill]] }
  0xa8   : > { %s6114_s7 = scalar_lea.hbm %s7267_s3, 16 }
  0xa9   : > { %p6115_p6 = scmp.ne.s32.totalorder %s7267_s3, %s6114_s7  ;;  %p6121_p2 = scmp.lt.u32.totalorder %s6114_s7, %s7267_s3 }
  0xab   : > { %p6117_p8 = pnand %p6115_p6, %p6546_p7 }
  0xad   : > { %p6118_p9 = pneg %p6117_p8 }
  0xaf   : > { %p6123_p3 = pnand %p6121_p2, %p6118_p9 }
  0xb1   : > { %6126 = shalt.err (!%p6123_p3)
}
  0xb2   : > { %s6127_s28 = scalar_lea.vmem %s519_s1, 16  ;;  %s6134_s20 = scalar_lea.vmem %s519_s1, 32 }
  0xb3   : > { %p6128_p10 = scmp.ne.s32.totalorder %s519_s1, %s6127_s28  ;;  %p6135_p13 = scmp.lt.s32.totalorder %s519_s1, %s519_s1 }
  0xb4   : > { %p6136_p0 = scmp.lt.s32.totalorder %s6134_s20, %s6127_s28 }
  0xb5   : > { %p6130_p11 = pnand %p6128_p10, %p6546_p7 }
  0xb6   : > { %p6137_p1 = por %p6136_p0, %p6135_p13 }
  0xb7   : > { %p6131_p12 = pneg %p6130_p11 }
  0xb9   : > { %p6138_p4 = pnand %p6137_p1, %p6131_p12 }
  0xbb   : > { %6141 = shalt.err (!%p6138_p4)
}
  0xbc   : > { %5535 = dma.hbm_to_vmem [thread:$0]  (!%p6532_p5), %s7267_s3, 16, %s519_s1, [#allocation3]  }
  0xbd   : > { %s7268_s6 = sld [smem:[#allocation39_spill]] }
  0xc3   : > { %s6142_s13 = scalar_lea.hbm %s7268_s6, 6144 }
  0xc4   : > { %p6143_p6 = scmp.ne.s32.totalorder %s7268_s6, %s6142_s13  ;;  %p6149_p2 = scmp.lt.u32.totalorder %s6142_s13, %s7268_s6 }
  0xc6   : > { %p6145_p8 = pnand %p6143_p6, %p6546_p7 }
  0xc8   : > { %p6146_p9 = pneg %p6145_p8 }
  0xca   : > { %p6151_p3 = pnand %p6149_p2, %p6146_p9 }
  0xcc   : > { %6154 = shalt.err (!%p6151_p3)
}
  0xcd   : > { %s6155_s1 = scalar_lea.vmem %s6678_s30, 6144  ;;  %p6163_p13 = scmp.lt.s32.totalorder %s6678_s30, %s6678_s30 }
  0xce   : > { %p6156_p10 = scmp.ne.s32.totalorder %s6678_s30, %s6155_s1  ;;  %p6164_p0 = scmp.lt.s32.totalorder %s6155_s1, %s6155_s1 }
  0xd0   : > { %p6158_p11 = pnand %p6156_p10, %p6546_p7  ;;  %p6165_p1 = por %p6164_p0, %p6163_p13 }
  0xd2   : > { %p6159_p12 = pneg %p6158_p11 }
  0xd4   : > { %p6166_p4 = pnand %p6165_p1, %p6159_p12 }
  0xd6   : > { %6169 = shalt.err (!%p6166_p4)
}
  0xd7   : > { %s6391_s20 = smov 192   ;;  %s6392_s21 = smov 12  }
  0xd8   : > { %5541 = dma.hbm_to_vmem [thread:$0]  (!%p6532_p5), %s7268_s6, 6144, %s6678_s30, [#allocation5], %s6391_s20, %s6391_s20, %s6392_s21  }
  0xd9   : > { %s6393_s7 = smov [#allocation9]   ;;  %s6394_s27 = smov [#allocation12]  }
  0xda   : > { %s568_s13 = sshll.u32 %s6393_s7, 4  ;;  %s594_s25 = sshll.u32 %s6394_s27, 4  ;;  %s569_s13 = int_to_ptr.vmem [resolvable:$true] %s568_s13  ;;  %s6721_s25 = int_to_ptr.vmem [resolvable:$true] %s594_s25 }
  0xdb   : > { %s6170_s1 = scalar_lea.hbm %s7224_s9, 32 }
  0xdc   : > { %p6171_p6 = scmp.ne.s32.totalorder %s7224_s9, %s6170_s1  ;;  %p6177_p2 = scmp.lt.u32.totalorder %s6170_s1, %s7224_s9 }
  0xde   : > { %p6173_p8 = pnand %p6171_p6, %p6546_p7 }
  0xe0   : > { %p6174_p9 = pneg %p6173_p8 }
  0xe2   : > { %p6179_p3 = pnand %p6177_p2, %p6174_p9 }
  0xe4   : > { %6182 = shalt.err (!%p6179_p3)
}
  0xe5   : > { %s6183_s20 = scalar_lea.vmem %s569_s13, 32  ;;  %p6191_p13 = scmp.lt.s32.totalorder %s569_s13, %s569_s13 }
  0xe6   : > { %p6184_p10 = scmp.ne.s32.totalorder %s569_s13, %s6183_s20  ;;  %p6192_p0 = scmp.lt.s32.totalorder %s6183_s20, %s6183_s20 }
  0xe8   : > { %p6186_p11 = pnand %p6184_p10, %p6546_p7  ;;  %p6193_p1 = por %p6192_p0, %p6191_p13 }
  0xea   : > { %p6187_p12 = pneg %p6186_p11 }
  0xec   : > { %p6194_p4 = pnand %p6193_p1, %p6187_p12 }
  0xee   : > { %6197 = shalt.err (!%p6194_p4)
}
  0xef   : > { %s7269_s5 = smov 1   ;;  %s7270_s0 = smov 16  }
  0xf0   : > { %5547 = dma.hbm_to_vmem [thread:$0]  (!%p6532_p5), %s7224_s9, 32, %s569_s13, [#allocation8], %s7270_s0, %s7270_s0, %s7269_s5  }
  0xf1   : > { %s6198_s29 = scalar_lea.hbm %s7226_s11, 32 }
  0xf2   : > { %p6199_p6 = scmp.ne.s32.totalorder %s7226_s11, %s6198_s29  ;;  %p6205_p2 = scmp.lt.u32.totalorder %s6198_s29, %s7226_s11 }
  0xf4   : > { %p6201_p8 = pnand %p6199_p6, %p6546_p7 }
  0xf6   : > { %p6202_p9 = pneg %p6201_p8 }
  0xf8   : > { %p6207_p3 = pnand %p6205_p2, %p6202_p9 }
  0xfa   : > { %6210 = shalt.err (!%p6207_p3)
}
  0xfb   : > { %s6211_s13 = scalar_lea.vmem %s6721_s25, 32  ;;  %p6219_p13 = scmp.lt.s32.totalorder %s6721_s25, %s6721_s25 }
  0xfc   : > { %p6212_p10 = scmp.ne.s32.totalorder %s6721_s25, %s6211_s13  ;;  %p6220_p0 = scmp.lt.s32.totalorder %s6211_s13, %s6211_s13 }
  0xfe   : > { %p6214_p11 = pnand %p6212_p10, %p6546_p7  ;;  %p6221_p1 = por %p6220_p0, %p6219_p13 }
 0x100   : > { %p6215_p12 = pneg %p6214_p11 }
 0x102   : > { %p6222_p4 = pnand %p6221_p1, %p6215_p12 }
 0x104   : > { %6225 = shalt.err (!%p6222_p4)
}
 0x105   : > { %5553 = dma.hbm_to_vmem [thread:$0]  (!%p6532_p5), %s7226_s11, 32, %s6721_s25, [#allocation11], %s7270_s0, %s7270_s0, %s7269_s5  }
 0x106   : > { %s6395_s23 = smov [#allocation15]   ;;  %s6396_s27 = smov [#allocation18]  }
 0x107   : > { %s623_s7 = sshll.u32 %s6395_s23, 4  ;;  %s649_s29 = sshll.u32 %s6396_s27, 4  ;;  %s624_s7 = int_to_ptr.vmem [resolvable:$true] %s623_s7  ;;  %s6770_s29 = int_to_ptr.vmem [resolvable:$true] %s649_s29 }
 0x108   : > { %s6226_s4 = scalar_lea.hbm %s7229_s14, 8192 }
 0x109   : > { %p6227_p6 = scmp.ne.s32.totalorder %s7229_s14, %s6226_s4  ;;  %p6233_p2 = scmp.lt.u32.totalorder %s6226_s4, %s7229_s14 }
 0x10b   : > { %p6229_p8 = pnand %p6227_p6, %p6546_p7 }
 0x10d   : > { %p6230_p9 = pneg %p6229_p8 }
 0x10f   : > { %p6235_p3 = pnand %p6233_p2, %p6230_p9 }
 0x111   : > { %6238 = shalt.err (!%p6235_p3)
}
 0x112   : > { %s6239_s21 = scalar_lea.vmem %s624_s7, 8192  ;;  %p6247_p13 = scmp.lt.s32.totalorder %s624_s7, %s624_s7 }
 0x113   : > { %p6240_p10 = scmp.ne.s32.totalorder %s624_s7, %s6239_s21  ;;  %p6248_p0 = scmp.lt.s32.totalorder %s6239_s21, %s6239_s21 }
 0x115   : > { %p6242_p11 = pnand %p6240_p10, %p6546_p7  ;;  %p6249_p1 = por %p6248_p0, %p6247_p13 }
 0x117   : > { %p6243_p12 = pneg %p6242_p11 }
 0x119   : > { %p6250_p4 = pnand %p6249_p1, %p6243_p12 }
 0x11b   : > { %6253 = shalt.err (!%p6250_p4)
}
 0x11c   : > { %s7271_s23 = smov 4   ;;  %s7272_s27 = smov 64  }
 0x11d   : > { %5559 = dma.hbm_to_vmem [thread:$0]  (!%p6532_p5), %s7229_s14, 8192, %s624_s7, [#allocation14], %s7272_s27, %s7272_s27, %s7271_s23  }
 0x11e   : > { %s6254_s13 = scalar_lea.hbm %s7231_s16, 32 }
 0x11f   : > { %p6255_p6 = scmp.ne.s32.totalorder %s7231_s16, %s6254_s13  ;;  %p6261_p2 = scmp.lt.u32.totalorder %s6254_s13, %s7231_s16 }
 0x121   : > { %p6257_p8 = pnand %p6255_p6, %p6546_p7 }
 0x123   : > { %p6258_p9 = pneg %p6257_p8 }
 0x125   : > { %p6263_p3 = pnand %p6261_p2, %p6258_p9 }
 0x127   : > { %6266 = shalt.err (!%p6263_p3)
}
 0x128   : > { %s6267_s7 = scalar_lea.vmem %s6770_s29, 32  ;;  %p6275_p13 = scmp.lt.s32.totalorder %s6770_s29, %s6770_s29 }
 0x129   : > { %p6268_p10 = scmp.ne.s32.totalorder %s6770_s29, %s6267_s7  ;;  %p6276_p0 = scmp.lt.s32.totalorder %s6267_s7, %s6267_s7 }
 0x12b   : > { %p6270_p11 = pnand %p6268_p10, %p6546_p7  ;;  %p6277_p1 = por %p6276_p0, %p6275_p13 }
 0x12d   : > { %p6271_p12 = pneg %p6270_p11 }
 0x12f   : > { %p6278_p4 = pnand %p6277_p1, %p6271_p12 }
 0x131   : > { %6281 = shalt.err (!%p6278_p4)
}
 0x132   : > { %5565 = dma.hbm_to_vmem [thread:$0]  (!%p6532_p5), %s7231_s16, 32, %s6770_s29, [#allocation17], %s7270_s0, %s7270_s0, %s7269_s5  }
 0x133   : > { %s6397_s1 = smov [#allocation21]   ;;  %s6398_s30 = smov [#allocation22]  }
 0x134   : > { %s675_s4 = sshll.u32 %s6397_s1, 4  ;;  %s689_s13 = sshll.u32 %s6398_s30, 4  ;;  %s676_s4 = int_to_ptr.vmem [resolvable:$true] %s675_s4  ;;  %s6819_s13 = int_to_ptr.vmem [resolvable:$true] %s689_s13 }
 0x135   : > { %s6282_s21 = scalar_lea.hbm %s7233_s18, 1024 }
 0x136   : > { %p6283_p6 = scmp.ne.s32.totalorder %s7233_s18, %s6282_s21  ;;  %p6289_p2 = scmp.lt.u32.totalorder %s6282_s21, %s7233_s18 }
 0x138   : > { %p6285_p8 = pnand %p6283_p6, %p6546_p7 }
 0x13a   : > { %p6286_p9 = pneg %p6285_p8 }
 0x13c   : > { %p6291_p3 = pnand %p6289_p2, %p6286_p9 }
 0x13e   : > { %6294 = shalt.err (!%p6291_p3)
}
 0x13f   : > { %s6295_s0 = scalar_lea.vmem %s676_s4, 1024  ;;  %p6303_p13 = scmp.lt.s32.totalorder %s676_s4, %s676_s4 }
 0x140   : > { %p6296_p10 = scmp.ne.s32.totalorder %s676_s4, %s6295_s0  ;;  %p6304_p0 = scmp.lt.s32.totalorder %s6295_s0, %s6295_s0 }
 0x142   : > { %p6298_p11 = pnand %p6296_p10, %p6546_p7  ;;  %p6305_p1 = por %p6304_p0, %p6303_p13 }
 0x144   : > { %p6299_p12 = pneg %p6298_p11 }
 0x146   : > { %p6306_p4 = pnand %p6305_p1, %p6299_p12 }
 0x148   : > { %6309 = shalt.err (!%p6306_p4)
}
 0x149   : > { %5571 = dma.hbm_to_vmem [thread:$0]  (!%p6532_p5), %s7233_s18, 1024, %s676_s4, [#allocation20], %s7272_s27, %s7272_s27, %s7271_s23  }
 0x14a   : > { %s6310_s30 = scalar_lea.hbm %s7234_s19, 16 }
 0x14b   : > { %p6311_p6 = scmp.ne.s32.totalorder %s7234_s19, %s6310_s30  ;;  %p6317_p2 = scmp.lt.u32.totalorder %s6310_s30, %s7234_s19 }
 0x14d   : > { %p6313_p8 = pnand %p6311_p6, %p6546_p7 }
 0x14f   : > { %p6314_p9 = pneg %p6313_p8 }
 0x151   : > { %p6319_p3 = pnand %p6317_p2, %p6314_p9 }
 0x153   : > { %6322 = shalt.err (!%p6319_p3)
}
 0x154   : > { %s6323_s23 = scalar_lea.vmem %s6819_s13, 16  ;;  %s6330_s27 = scalar_lea.vmem %s6819_s13, 32 }
 0x155   : > { %p6324_p10 = scmp.ne.s32.totalorder %s6819_s13, %s6323_s23  ;;  %p6331_p13 = scmp.lt.s32.totalorder %s6819_s13, %s6819_s13 }
 0x156   : > { %p6332_p0 = scmp.lt.s32.totalorder %s6330_s27, %s6323_s23 }
 0x157   : > { %p6326_p11 = pnand %p6324_p10, %p6546_p7 }
 0x158   : > { %p6333_p1 = por %p6332_p0, %p6331_p13 }
 0x159   : > { %p6327_p12 = pneg %p6326_p11 }
 0x15b   : > { %p6334_p4 = pnand %p6333_p1, %p6327_p12 }
 0x15d   : > { %6337 = shalt.err (!%p6334_p4)
}
 0x15e   : > { %5574 = dma.hbm_to_vmem [thread:$0]  (!%p6532_p5), %s7234_s19, 16, %s6819_s13, [#allocation23]  }
 0x15f   : > { %p7273_p6 = scmp.ne.s32.totalorder %s7263_s2, 0 }
 0x160   : > { %p7274_p7 = scmp.eq.s32.totalorder (!%p7273_p6), %s6517_s24, 0 }
 0x161   : > { %715 = sbr.rel (%p7273_p6) target bundleno = 5276 (0x149c), region = 100 }
 0x168   : > { %6343 = dma.done.wait (%p7274_p7), [#allocation3], 16   ;;  %p7275_p8 = pmov %p7274_p7 }
 0x169   : > { %p7276_p9 = pmov %p7274_p7 }
 0x16a   : > { %6345 = vsyncadd (%p7275_p8), [#allocation3], 4294967280 }
 0x16b   : > { %6347 = dma.done.wait (%p7276_p9), [#allocation5], 6160   ;;  %p7277_p2 = pmov %p7274_p7 }
 0x16d   : > { %6349 = vsyncadd (%p7277_p2), [#allocation5], 4294961136  ;;  %p7278_p3 = pmov %p7277_p2 }
 0x16e   : > { %p7279_p5 = pmov %p7277_p2 }
 0x16f   : > { %6351 = dma.done.wait (%p7278_p3), [#allocation8], 2080  }
 0x170   : > { %6353 = vsyncadd (%p7279_p5), [#allocation8], 4294965216  ;;  %p7280_p10 = pmov %p7277_p2 }
 0x171   : > { %p7281_p11 = pmov %p7277_p2 }
 0x172   : > { %6355 = dma.done.wait (%p7280_p10), [#allocation11], 64  }
 0x173   : > { %6357 = vsyncadd (%p7281_p11), [#allocation11], 4294967232  ;;  %p7282_p12 = pmov %p7277_p2 }
 0x174   : > { %p7283_p13 = pmov %p7277_p2 }
 0x175   : > { %6359 = dma.done.wait (%p7282_p12), [#allocation14], 16384  }
 0x176   : > { %6361 = vsyncadd (%p7283_p13), [#allocation14], 4294950912  ;;  %p7284_p0 = pmov %p7277_p2 }
 0x178   : > { %6363 = dma.done.wait (%p7284_p0), [#allocation17], 64   ;;  %p7285_p1 = pmov %p7284_p0 }
 0x179   : > { %p7286_p4 = pmov %p7284_p0 }
 0x17a   : > { %6365 = vsyncadd (%p7285_p1), [#allocation17], 4294967232 }
 0x17b   : > { %6367 = dma.done.wait (%p7286_p4), [#allocation20], 1056   ;;  %p7287_p6 = pmov %p7284_p0 }
 0x17c   : > { %p7288_p7 = pmov %p7284_p0 }
 0x17d   : > { %6369 = vsyncadd (%p7287_p6), [#allocation20], 4294966240 }
 0x17e   : > { %6371 = dma.done.wait (%p7288_p7), [#allocation23], 16   ;;  %p7289_p8 = pmov %p7284_p0 }
 0x17f   : > { %p825_p9 = scmp.lt.s32.totalorder %s6517_s24, 1  ;;  %v6399_v0 = vmov 0   ;;  %v6400_v1 = vmov 0.0|0.0   ;;  %s7290_s13 = sld [smem:[#allocation33_spill]]  ;;  %vm6401_vm0 = vmmov 0   ;;  %v6402_v8 = vmov 0.0  }
 0x180   : > { %6373 = vsyncadd (%p7289_p8), [#allocation23], 4294967280  ;;  %5639 = vset.pattern.permute.xlu0 %v6399_v0  ;;  %5464 = vmatprep.subr.bf16.mxu0 %v6400_v1  ;;  %s7291_s29 = sld [smem:[#allocation35_spill]]  ;;  %v837_v16 = vlaneseq  ;;  %vm854_vm1 = vcmask 523264   ;;  %v5640_v20 = vld [vmem:[#allocation6 + $0x4] ss:$12 sps:$4 sm:$0xff]  }
 0x181   : > { %s7300_s24 = smov (!%p825_p9, %s6517_s24), 1  ;;  %1171 = vmatprep.mubr.bf16.mxu1 %v6399_v0  ;;  %5281 = vmatprep.mubr.msk.f32.mxu0 %vm6401_vm0, %v6402_v8  ;;  %v5642_v21 = vld [vmem:[#allocation6] ss:$12 sps:$4 sm:$0xff]   ;;  %v5643_v22 = vld [vmem:[#allocation6 + $0x8] ss:$12 sps:$4 sm:$0xff]   ;;  %s7292_s0 = sld [smem:[#allocation36_spill]] }
 0x182   : > { %s4846_s2 = sshll.u32 %s7300_s24, 3  ;;  %v838_v17 = vand.u32 127, %v837_v16  ;;  %v5644_v23 = vld [vmem:[#allocation6 + $0x1c] ss:$12 sps:$4 sm:$0xff]   ;;  %1139 = vmatprep.subr.bf16.mxu1 %v5640_v20  ;;  %v5646_v29 = vld [vmem:[#allocation6 + $0x18] ss:$12 sps:$4 sm:$0xff]  }
 0x183   : > { %1140 = vmatpush1.bf16.msra.mxu1 %v5642_v21  ;;  %v5647_v30 = vld [vmem:[#allocation6 + $0x20] ss:$12 sps:$4 sm:$0xff]   ;;  %v5650_v32 = vld [vmem:[#allocation6 + $0x30] ss:$12 sps:$4 sm:$0xff]   ;;  %v5651_v33 = vld [vmem:[#allocation6 + $0x38] ss:$12 sps:$4 sm:$0xff]  }
 0x184   : > { %1141 = vmatprep.subr.bf16.mxu1 %v5644_v23  ;;  %v5648_v31 = vld [vmem:[#allocation6 + $0x34] ss:$12 sps:$4 sm:$0xff]   ;;  %v5652_v34 = vld [vmem:[#allocation6 + $0x4c] ss:$12 sps:$4 sm:$0xff]   ;;  %v5655_v36 = vld [vmem:[#allocation6 + $0x50] ss:$12 sps:$4 sm:$0xff]  }
 0x185   : > { %s828_s5 = scalar_lea.vmem %s7290_s13, %s4846_s2  ;;  %v5654_v35 = vld [vmem:[#allocation6 + $0x48] ss:$12 sps:$4 sm:$0xff]   ;;  %v5656_v37 = vld [vmem:[#allocation6 + $0x64] ss:$12 sps:$4 sm:$0xff]   ;;  %v5658_v38 = vld [vmem:[#allocation6 + $0x60] ss:$12 sps:$4 sm:$0xff]  }
 0x186   : > { %v836_v2 = vld [vmem:[%s828_s5] sm:$0xff]  ;;  %v846_v4 = vld [vmem:[%s7291_s29 + $0x8] sm:$0xff]  ;;  %v847_v5 = vld [vmem:[%s7291_s29 + $0x10] sm:$0xff]  ;;  %s7293_s1 = sld [smem:[#allocation40_spill]]  ;;  %vm1250_vm3 = vcmask 261120   ;;  %s6403_s20 = smov 32  }
 0x187   : > { %v845_v3 = vld [vmem:[%s7291_s29] sm:$0xff]  ;;  %840 = vperm.xlu0 %5639, %v836_v2   ;;  %v848_v6 = vld [vmem:[%s7291_s29 + $0x18] sm:$0xff]  ;;  %v850_v10 = vld [vmem:[%s7291_s29 + $0x28] sm:$0xff]  ;;  %1142 = vmatpush1.bf16.msra.mxu1 %v5646_v29  ;;  %s6404_s25 = smov 96   ;;  %s6405_s21 = smov 64   ;;  %vm1555_vm5 = vcmask 64512  }
 0x188   : > { %v5465_v7 = vpack.c.bf16 %v846_v4, %v845_v3  ;;  %v849_v9 = vld [vmem:[%s7291_s29 + $0x20] sm:$0xff]  ;;  %v5468_v11 = vpack.c.bf16 %v848_v6, %v847_v5  ;;  %v851_v12 = vld [vmem:[%s7291_s29 + $0x30] sm:$0xff]  ;;  %v852_v13 = vld [vmem:[%s7291_s29 + $0x38] sm:$0xff]  ;;  %1143 = vmatprep.subr.bf16.mxu1 %v5648_v31  ;;  %s7295_s27 = sld [smem:[#allocation34_spill]]  ;;  %vm1882_vm6 = vcmask 785408   ;;  %s7296_s26 = sld [smem:[#allocation41_spill]] }
 0x189   : > { %v5471_v14 = vpack.c.bf16 %v850_v10, %v849_v9  ;;  %v5474_v15 = vpack.c.bf16 %v852_v13, %v851_v12  ;;  %v853_v24 = vld [vmem:[%s7292_s0] sm:$0xff]  ;;  %v5659_v39 = vld [vmem:[#allocation6 + $0x68] ss:$12 sps:$4 sm:$0xff]   ;;  %v5662_v41 = vld [vmem:[#allocation6 + $0x78] ss:$12 sps:$4 sm:$0xff]  }
 0x18a   : > { %5466 = vmatpush3.bf16.msra.mxu0 %v5465_v7  ;;  %v5660_v40 = vld [vmem:[#allocation6 + $0x7c] ss:$12 sps:$4 sm:$0xff]   ;;  %v5663_v42 = vld [vmem:[#allocation6 + $0x80] ss:$12 sps:$4 sm:$0xff]   ;;  %v5667_v45 = vld [vmem:[#allocation6 + $0x98] ss:$12 sps:$4 sm:$0xff]  }
 0x18b   : > { %5467 = vmatprep.subr.bf16.mxu0 %v6400_v1  ;;  %1144 = vmatpush1.bf16.msra.mxu1 %v5650_v32  ;;  %v5664_v43 = vld [vmem:[#allocation6 + $0x94] ss:$12 sps:$4 sm:$0xff]   ;;  %v5666_v44 = vld [vmem:[#allocation6 + $0x90] ss:$12 sps:$4 sm:$0xff]   ;;  %v5668_v46 = vld [vmem:[#allocation6 + $0xac] ss:$12 sps:$4 sm:$0xff]  }
 0x18c   : > { %1145 = vmatprep.subr.bf16.mxu1 %v5652_v34  ;;  %v5670_v47 = vld [vmem:[#allocation6 + $0xa8] ss:$12 sps:$4 sm:$0xff]   ;;  %v5671_v48 = vld [vmem:[#allocation6 + $0xb0] ss:$12 sps:$4 sm:$0xff]   ;;  %s7294_s30 = smov %s7293_s1 }
 0x18d   : > { %v4849_v58 = vld [vmem:[#allocation2] ss:$0 sm:$0xff]  ;;  %v4850_v60 = vld [vmem:[#allocation4] ss:$0 sm:$0xff] }
 0x18e   : > { %5469 = vmatpush3.bf16.msra.mxu0 %v5468_v11  ;;  %v994_v4 = vld [vmem:[%s7293_s1] sm:$0x7]  ;;  %s831_s4 = scalar_lea.vmem %s7295_s27, %s7300_s24  ;;  %s7297_s1 = sld [smem:[#allocation42_spill]] }
 0x18f   : > { %5470 = vmatprep.subr.bf16.mxu0 %v6400_v1  ;;  %1146 = vmatpush1.bf16.msra.mxu1 %v5654_v35 }
 0x190   : > { %1147 = vmatprep.subr.bf16.mxu1 %v5656_v37 }
 0x192   : > { %5472 = vmatpush3.bf16.msra.mxu0 %v5471_v14 }
 0x193   : > { %5473 = vmatprep.subr.bf16.mxu0 %v6400_v1  ;;  %1148 = vmatpush1.bf16.msra.mxu1 %v5658_v38  ;;  %v6969_v1 = vshrl.u32 %v837_v16, 7 }
 0x194   : > { %1149 = vmatprep.subr.bf16.mxu1 %v5660_v40 }
 0x195   : > { %v6972_v2 = vsub.s32 0, %v6969_v1  ;;  %v6975_v3 = vsub.s32 2, %v6969_v1  ;;  %v6981_v5 = vsub.s32 1, %v6969_v1 }
 0x196   : > { %5475 = vmatpush3.bf16.msra.mxu0 %v5474_v15 }
 0x197   : > { %5284 = vmatprep.subr.bf16.mxu0 %v6402_v8  ;;  %1150 = vmatpush1.bf16.msra.mxu1 %v5662_v41  ;;  %v999_v6 = vrot.slane %v994_v4, %v6972_v2  ;;  %v1007_v7 = vrot.slane %v994_v4, %v6975_v3  ;;  %v1003_v9 = vrot.slane %v994_v4, %v6981_v5 }
 0x198   : > { %1151 = vmatprep.subr.bf16.mxu1 %v5664_v43 }
 0x19b   : > { %1152 = vmatpush1.bf16.msra.mxu1 %v5666_v44 }
 0x19c   : > { %1153 = vmatprep.subr.bf16.mxu1 %v5668_v46 }
 0x19f   : > { %1154 = vmatpush1.bf16.msra.mxu1 %v5670_v47 }
 0x1a0   : > { %5304 = vmatprep.subr.mxu1 %v6402_v8 }
 0x206   : > { %v841_v18 = vpop.permute.xlu0 %840 }
 0x207   : > { %vm842_vm2 = vcmp.eq.s32.totalorder %v838_v17, %v841_v18 }
 0x208   : > { %v4847_v19 = vsel %vm842_vm2, 1.0, %v6402_v8 }
 0x209   : > { %5282 = vmatmul.mubr.msk.f32.vlgmr.msra.gmra.mrb[0].mxu0 %vm854_vm1, %v4847_v19 }
 0x20a   : > { %5300 = vmatprep.mubr.msk.bf16.mxu0 %vm6401_vm0, %v6402_v8  ;;  %5285 = vmatpush3.bf16.msra.mxu0 %v5643_v22 }
 0x20b   : > { %5286 = vmatprep.subr.bf16.mxu0 %v6402_v8 }
 0x20e   : > { %5287 = vmatpush3.bf16.msra.mxu0 %v5647_v30 }
 0x20f   : > { %5288 = vmatprep.subr.bf16.mxu0 %v6402_v8 }
 0x212   : > { %5289 = vmatpush3.bf16.msra.mxu0 %v5651_v33 }
 0x213   : > { %5290 = vmatprep.subr.bf16.mxu0 %v6402_v8 }
 0x216   : > { %5291 = vmatpush3.bf16.msra.mxu0 %v5655_v36 }
 0x217   : > { %5292 = vmatprep.subr.bf16.mxu0 %v6402_v8 }
 0x21a   : > { %5293 = vmatpush3.bf16.msra.mxu0 %v5659_v39 }
 0x21b   : > { %5294 = vmatprep.subr.bf16.mxu0 %v6402_v8 }
 0x21e   : > { %5295 = vmatpush3.bf16.msra.mxu0 %v5663_v42 }
 0x21f   : > { %5296 = vmatprep.subr.bf16.mxu0 %v6402_v8 }
 0x222   : > { %5297 = vmatpush3.bf16.msra.mxu0 %v5667_v45 }
 0x223   : > { %5298 = vmatprep.subr.bf16.mxu0 %v6402_v8 }
 0x226   : > { %5299 = vmatpush3.bf16.msra.mxu0 %v5671_v48 }
 0x227   : > { %5324 = vmatprep.subr.mxu0 %v6402_v8 }
 0x2dc   : > { %v924_v25 = vpop.f32.mrb[0].mxu0 }
 0x2dd   : > { %v6946_v26 = vadd.f32 %v924_v25, %v853_v24  ;;  %v5283_v27 = vpop.f32.mrb[1].mxu0 }
 0x2df   : > { %930 = vadd.xlane.f32.xlu0 %v6946_v26  ;;  %v934_v28 = vmul.f32 %v6946_v26, %v6946_v26 }
 0x2e1   : > { %935 = vadd.xlane.f32.xlu1 %v934_v28  ;;  %v958_v28 = vld [vmem:[%s831_s4] sm:$0x1] }
 0x2e2   : > { %vm959_vm4 = vcmp.eq.s32.totalorder %v958_v28, 0 }
 0x2e3   : > { %v960_v29 = vsel %vm959_vm4, -1e+09, %v6402_v8 }
 0x2e4   : > { %v7025_v30 = vrot.slane %v960_v29, %v6972_v2 }
 0x36c   : > { %v931_v49 = vpop.xlane.xlu0 %930 }
 0x36d   : > { %v933_v50 = vmul.f32 0.0078125, %v931_v49 }
 0x36e   : > { %v936_v51 = vpop.xlane.xlu1 %935 }
 0x36f   : > { %v938_v52 = vmul.f32 %v933_v50, %v933_v50  ;;  %v937_v53 = vmul.f32 0.0078125, %v936_v51  ;;  %v940_v56 = vsub.f32 %v6946_v26, %v933_v50 }
 0x371   : > { %v939_v54 = vsub.f32 %v937_v53, %v938_v52 }
 0x373   : > { %v941_v55 = vadd.f32 1e-12, %v939_v54 }
 0x375   : > { %5888 = vrsqrt.f32 %v941_v55 }
 0x37f   : > { %v5889_v57 = vpop.eup %5888 }
 0x380   : > { %v943_v59 = vmul.f32 %v5889_v57, %v940_v56 }
 0x382   : > { %v950_v61 = vmul.f32 %v4849_v58, %v943_v59 }
 0x384   : > { %v6960_v62 = vadd.f32 %v4850_v60, %v950_v61 }
 0x386   : > { %v993_v63 = vpack.c.bf16 %v6960_v62, %v6960_v62 }
 0x388   : > { %1172 = vmatmul.mubr.bf16.vlgmr.msra.gmra.mrb[0].mxu1 %v993_v63  ;;  %5301 = vmatmul.mubr.bf16.vlgmr.msra.gmra.mrb[4].mxu0 %v993_v63 }
 0x389   : > { %5306 = vmatprep.mubr.msk.f32.mxu1 %vm6401_vm0, %v6402_v8  ;;  %5326 = vmatprep.mubr.msk.f32.mxu0 %vm6401_vm0, %v6402_v8 }
 0x45b   : > { %v1173_v10 = vpop.f32.mrb[0].mxu1  ;;  %v1214_v11 = vpop.f32.mrb[4].mxu0 }
 0x45c   : > { %v1174_v12 = vadd.f32 %v1173_v10, %v999_v6  ;;  %v6986_v13 = vadd.f32 %v1214_v11, %v1007_v7  ;;  %v1175_v14 = vpop.f32.mrb[1].mxu1  ;;  %v5302_v15 = vpop.f32.mrb[5].mxu0 }
 0x45d   : > { %v1176_v16 = vadd.f32 %v1175_v14, %v1003_v9  ;;  %v1177_v17 = vpop.f32.mrb[2].mxu1  ;;  %v1217_v18 = vpop.f32.mrb[6].mxu0  ;;  %v5672_v14 = vld [vmem:[#allocation7] sm:$0xff]   ;;  %v5673_v15 = vld [vmem:[#allocation7 + $0x8] sm:$0xff]  }
 0x45e   : > { %v1178_v19 = vpop.f32.mrb[3].mxu1  ;;  %1225 = vrot.lane.b32.xlu0 %v1174_v12, %s6403_s20  ;;  %1221 = vrot.lane.b32.xlu1 %v1174_v12, %s6404_s25  ;;  %v5303_v20 = vpop.f32.mrb[7].mxu0  ;;  %v5675_v17 = vld [vmem:[#allocation7 + $0x18] sm:$0xff]   ;;  %v5676_v18 = vld [vmem:[#allocation7 + $0x20] sm:$0xff]  }
 0x45f   : > { %5325 = vmatpush3.msra.mxu0 %v6986_v13  ;;  %5305 = vmatpush3.xpose.msk.msra.mxu1 %vm1250_vm3, %v1176_v16  ;;  %v5677_v19 = vld [vmem:[#allocation7 + $0x28] sm:$0xff]   ;;  %v5678_v20 = vld [vmem:[#allocation7 + $0x30] sm:$0xff]  }
 0x460   : > { %5309 = vmatprep.subr.mxu1 %v6402_v8  ;;  %5334 = vmatprep.subr.mxu0 %v6402_v8 }
 0x462   : > { %1223 = vrot.lane.b32.xlu1 %v1174_v12, %s6405_s21  ;;  %5307 = vmatmul.mubr.msk.f32.vlgmr.msra.gmra.mrb[4].mxu1 %vm1250_vm3, %v1174_v12 }
 0x463   : > { %5311 = vmatprep.mubr.msk.f32.mxu1 %vm6401_vm0, %v6402_v8 }
 0x466   : > { %1228 = vrot.lane.b32.xlu1 %v1176_v16, %s6404_s25 }
 0x46a   : > { %1230 = vrot.lane.b32.xlu1 %v1176_v16, %s6405_s21 }
 0x46e   : > { %1232 = vrot.lane.b32.xlu1 %v1176_v16, %s6403_s20  ;;  %v5674_v16 = vld [vmem:[#allocation7 + $0x10] sm:$0xff]  }
 0x472   : > { %1235 = vrot.lane.b32.xlu1 %v6986_v13, %s6404_s25 }
 0x4d0   : > { %v1222_v21 = vpop.permute.xlu1 %1221  ;;  %v1226_v26 = vpop.permute.xlu0 %1225 }
 0x4d4   : > { %v1224_v22 = vpop.permute.xlu1 %1223 }
 0x4d8   : > { %v1229_v23 = vpop.permute.xlu1 %1228 }
 0x4d9   : > { %5310 = vmatpush3.xpose.msk.msra.mxu1 %vm1250_vm3, %v1229_v23 }
 0x4da   : > { %5314 = vmatprep.subr.mxu1 %v6402_v8 }
 0x4dc   : > { %v1231_v24 = vpop.permute.xlu1 %1230  ;;  %5312 = vmatmul.mubr.msk.f32.vlgmr.msra.gmra.mrb[6].mxu1 %vm1250_vm3, %v1222_v21  ;;  %v5679_v21 = vld [vmem:[#allocation7 + $0x38] sm:$0xff]  }
 0x4dd   : > { %5315 = vmatpush3.xpose.msk.msra.mxu1 %vm1250_vm3, %v1231_v24  ;;  %5316 = vmatprep.mubr.msk.f32.mxu1 %vm6401_vm0, %v6402_v8 }
 0x4de   : > { %5319 = vmatprep.subr.mxu1 %v6402_v8 }
 0x4e0   : > { %v1233_v25 = vpop.permute.xlu1 %1232  ;;  %5317 = vmatmul.mubr.msk.f32.vlgmr.msra.gmra.mrb[8].mxu1 %vm1250_vm3, %v1224_v22 }
 0x4e1   : > { %5320 = vmatpush3.xpose.msk.msra.mxu1 %vm1250_vm3, %v1233_v25  ;;  %5321 = vmatprep.mubr.msk.f32.mxu1 %vm6401_vm0, %v6402_v8 }
 0x4e2   : > { %5329 = vmatprep.subr.mxu1 %v6402_v8 }
 0x4e4   : > { %5322 = vmatmul.mubr.msk.f32.vlgmr.msra.gmra.mrb[10].mxu1 %vm1250_vm3, %v1226_v26  ;;  %v1236_v27 = vpop.permute.xlu1 %1235 }
 0x4e5   : > { %5330 = vmatpush3.msra.mxu1 %v1236_v27  ;;  %5331 = vmatprep.mubr.msk.f32.mxu1 %vm6401_vm0, %v6402_v8 }
 0x4e6   : > { %5339 = vmatprep.subr.mxu1 %v6402_v8 }
 0x535   : > { %v1321_v31 = vpop.f32.mrb[4].mxu1 }
 0x536   : > { %v1322_v32 = vadd.f32 %v1321_v31, %v7025_v30  ;;  %v5308_v33 = vpop.f32.mrb[5].mxu1 }
 0x538   : > { %v1547_v34 = vmul.f32 1.442695, %v1322_v32 }
 0x53a   : > { %5890 = vpow2.f32 %v1547_v34 }
 0x544   : > { %v5891_v35 = vpop.eup %5890 }
 0x545   : > { %v1556_v36 = vsel %vm1555_vm5, %v5891_v35, 0.0 }
 0x546   : > { %1557 = vadd.xlane.f32.xlu1 %v1556_v36  ;;  %v5680_v36 = vld [vmem:[#allocation13] ss:$16 sps:$4 sm:$0xff]  }
 0x5af   : > { %v1395_v37 = vpop.f32.mrb[6].mxu1 }
 0x5b0   : > { %v1396_v38 = vadd.f32 %v1395_v37, %v7025_v30  ;;  %v5313_v39 = vpop.f32.mrb[7].mxu1  ;;  %v5682_v37 = vld [vmem:[#allocation13 + $0x4] ss:$16 sps:$4 sm:$0xff]  }
 0x5b1   : > { %v5685_v39 = vld [vmem:[#allocation13 + $0xc] ss:$16 sps:$4 sm:$0xff]  }
 0x5b2   : > { %v1549_v40 = vmul.f32 1.442695, %v1396_v38  ;;  %v5683_v38 = vld [vmem:[#allocation13 + $0x8] ss:$16 sps:$4 sm:$0xff]  }
 0x5b3   : > { %v1469_v41 = vpop.f32.mrb[8].mxu1 }
 0x5b4   : > { %5892 = vpow2.f32 %v1549_v40  ;;  %v1470_v42 = vadd.f32 %v1469_v41, %v7025_v30  ;;  %v5318_v43 = vpop.f32.mrb[9].mxu1  ;;  %v5688_v40 = vld [vmem:[#allocation13 + $0x24] ss:$16 sps:$4 sm:$0xff]   ;;  %v5691_v41 = vld [vmem:[#allocation13 + $0x2c] ss:$16 sps:$4 sm:$0xff]  }
 0x5b5   : > { %v5689_v43 = vld [vmem:[#allocation13 + $0x28] ss:$16 sps:$4 sm:$0xff]  }
 0x5b6   : > { %v1551_v44 = vmul.f32 1.442695, %v1470_v42  ;;  %v5686_v42 = vld [vmem:[#allocation13 + $0x20] ss:$16 sps:$4 sm:$0xff]  }
 0x5b7   : > { %v1543_v45 = vpop.f32.mrb[10].mxu1 }
 0x5b8   : > { %5894 = vpow2.f32 %v1551_v44  ;;  %v1544_v46 = vadd.f32 %v1543_v45, %v7025_v30  ;;  %v5323_v47 = vpop.f32.mrb[11].mxu1  ;;  %v4887_v44 = vld [vmem:[#allocation9] ss:$0 sm:$0xff] }
 0x5ba   : > { %v1553_v48 = vmul.f32 1.442695, %v1544_v46 }
 0x5bc   : > { %5896 = vpow2.f32 %v1553_v48 }
 0x5be   : > { %v5893_v49 = vpop.eup %5892 }
 0x5bf   : > { %v1559_v50 = vsel %vm1555_vm5, %v5893_v49, 0.0 }
 0x5c0   : > { %1560 = vadd.xlane.f32.xlu0 %v1559_v50 }
 0x5c2   : > { %v5895_v51 = vpop.eup %5894 }
 0x5c3   : > { %v1562_v52 = vsel %vm1555_vm5, %v5895_v51, 0.0 }
 0x5c4   : > { %1563 = vadd.xlane.f32.xlu1 %v1562_v52  ;;  %v5694_v52 = vld [vmem:[#allocation13 + $0x44] ss:$16 sps:$4 sm:$0xff]  }
 0x5c6   : > { %v5897_v53 = vpop.eup %5896 }
 0x5c7   : > { %v1565_v54 = vsel %vm1555_vm5, %v5897_v53, 0.0 }
 0x5c8   : > { %1566 = vadd.xlane.f32.xlu1 %v1565_v54  ;;  %v5692_v54 = vld [vmem:[#allocation13 + $0x40] ss:$16 sps:$4 sm:$0xff]  }
 0x5d3   : > { %v1558_v55 = vpop.xlane.xlu1 %1557 }
 0x5d4   : > { %5898 = vrcp.f32 %v1558_v55  ;;  %v5695_v55 = vld [vmem:[#allocation13 + $0x48] ss:$16 sps:$4 sm:$0xff]  }
 0x5d6   : > { %1238 = vrot.lane.b32.xlu0 %v6986_v13, %s6405_s21 }
 0x5d9   : > { %1241 = vrot.lane.b32.xlu1 %v6986_v13, %s6403_s20 }
 0x5de   : > { %v5899_v56 = vpop.eup %5898 }
 0x5df   : > { %v1572_v57 = vmul.f32 %v5899_v56, %v5891_v35  ;;  %v5700_v56 = vld [vmem:[#allocation13 + $0x64] ss:$16 sps:$4 sm:$0xff]  }
 0x5e1   : > { %5327 = vmatmul.mubr.msk.f32.vlgmr.msra.gmra.mrb[2].mxu0 %vm1555_vm5, %v1572_v57  ;;  %v5703_v57 = vld [vmem:[#allocation13 + $0x6c] ss:$16 sps:$4 sm:$0xff]  }
 0x5e2   : > { %5336 = vmatprep.mubr.msk.f32.mxu0 %vm6401_vm0, %v6402_v8 }
 0x64d   : > { %v1561_v58 = vpop.xlane.xlu0 %1560 }
 0x64e   : > { %5900 = vrcp.f32 %v1561_v58  ;;  %v5698_v58 = vld [vmem:[#allocation13 + $0x60] ss:$16 sps:$4 sm:$0xff]  }
 0x651   : > { %v1239_v59 = vpop.permute.xlu0 %1238  ;;  %v1564_v60 = vpop.xlane.xlu1 %1563 }
 0x652   : > { %5902 = vrcp.f32 %v1564_v60  ;;  %5335 = vmatpush3.msra.mxu0 %v1239_v59  ;;  %v5706_v59 = vld [vmem:[#allocation13 + $0x84] ss:$16 sps:$4 sm:$0xff]   ;;  %v5704_v60 = vld [vmem:[#allocation13 + $0x80] ss:$16 sps:$4 sm:$0xff]  }
 0x653   : > { %5344 = vmatprep.subr.bf16.mxu0 %v6402_v8 }
 0x655   : > { %v1567_v61 = vpop.xlane.xlu1 %1566 }
 0x656   : > { %5904 = vrcp.f32 %v1567_v61  ;;  %v5707_v61 = vld [vmem:[#allocation13 + $0x88] ss:$16 sps:$4 sm:$0xff]  }
 0x658   : > { %v5901_v63 = vpop.eup %5900 }
 0x659   : > { %v1573_v4 = vmul.f32 %v5901_v63, %v5893_v49  ;;  %v1242_v6 = vpop.permute.xlu1 %1241  ;;  %v5709_v63 = vld [vmem:[#allocation13 + $0x8c] ss:$16 sps:$4 sm:$0xff]  }
 0x65b   : > { %5332 = vmatmul.mubr.msk.f32.vlgmr.msra.gmra.mrb[12].mxu1 %vm1555_vm5, %v1573_v4  ;;  %v5712_v4 = vld [vmem:[#allocation13 + $0xa4] ss:$16 sps:$4 sm:$0xff]  }
 0x65c   : > { %v5903_v7 = vpop.eup %5902  ;;  %5340 = vmatpush3.msra.mxu1 %v1242_v6  ;;  %5341 = vmatprep.mubr.msk.f32.mxu1 %vm6401_vm0, %v6402_v8  ;;  %v5715_v6 = vld [vmem:[#allocation13 + $0xac] ss:$16 sps:$4 sm:$0xff]  }
 0x65d   : > { %v1574_v9 = vmul.f32 %v5903_v7, %v5895_v51  ;;  %2241 = vmatprep.subr.bf16.mxu1 %v5682_v37  ;;  %v5710_v7 = vld [vmem:[#allocation13 + $0xa0] ss:$16 sps:$4 sm:$0xff]  }
 0x65e   : > { %v5731_v37 = vld [vmem:[#allocation15 + $0x80] sm:$0xff]  }
 0x65f   : > { %5337 = vmatmul.mubr.msk.f32.vlgmr.msra.gmra.mrb[8].mxu0 %vm1555_vm5, %v1574_v9  ;;  %v5713_v9 = vld [vmem:[#allocation13 + $0xa8] ss:$16 sps:$4 sm:$0xff]  }
 0x660   : > { %v5905_v10 = vpop.eup %5904  ;;  %5360 = vmatprep.mubr.msk.bf16.mxu0 %vm6401_vm0, %v6402_v8  ;;  %5345 = vmatpush3.bf16.msra.mxu0 %v5672_v14  ;;  %v5724_v14 = vld [vmem:[#allocation13 + $0xe4] ss:$16 sps:$4 sm:$0xff]  }
 0x661   : > { %v1575_v11 = vmul.f32 %v5905_v10, %v5897_v53  ;;  %5346 = vmatprep.subr.bf16.mxu0 %v6402_v8  ;;  %v5697_v53 = vld [vmem:[#allocation13 + $0x4c] ss:$16 sps:$4 sm:$0xff]   ;;  %v5718_v10 = vld [vmem:[#allocation13 + $0xc4] ss:$16 sps:$4 sm:$0xff]  }
 0x663   : > { %5342 = vmatmul.mubr.msk.f32.vlgmr.msra.gmra.mrb[14].mxu1 %vm1555_vm5, %v1575_v11  ;;  %v5721_v11 = vld [vmem:[#allocation13 + $0xcc] ss:$16 sps:$4 sm:$0xff]  }
 0x664   : > { %2273 = vmatprep.mubr.bf16.mxu1 %v6399_v0  ;;  %5347 = vmatpush3.bf16.msra.mxu0 %v5673_v15  ;;  %v5727_v15 = vld [vmem:[#allocation13 + $0xec] ss:$16 sps:$4 sm:$0xff]  }
 0x665   : > { %5348 = vmatprep.subr.bf16.mxu0 %v6402_v8  ;;  %2242 = vmatpush1.bf16.msra.mxu1 %v5680_v36  ;;  %v5730_v36 = vld [vmem:[#allocation15] sm:$0xff]  }
 0x666   : > { %2243 = vmatprep.subr.bf16.mxu1 %v5688_v40  ;;  %v5734_v40 = vld [vmem:[#allocation15 + $0x8] sm:$0xff]  }
 0x668   : > { %5349 = vmatpush3.bf16.msra.mxu0 %v5674_v16  ;;  %v5722_v16 = vld [vmem:[#allocation13 + $0xe0] ss:$16 sps:$4 sm:$0xff]  }
 0x669   : > { %5350 = vmatprep.subr.bf16.mxu0 %v6402_v8  ;;  %2244 = vmatpush1.bf16.msra.mxu1 %v5686_v42  ;;  %v5736_v42 = vld [vmem:[#allocation15 + $0x50] sm:$0xff]  }
 0x66a   : > { %2245 = vmatprep.subr.bf16.mxu1 %v5694_v52  ;;  %v5746_v52 = vld [vmem:[#allocation15 + $0x20] sm:$0xff]  }
 0x66c   : > { %5351 = vmatpush3.bf16.msra.mxu0 %v5675_v17  ;;  %v5725_v17 = vld [vmem:[#allocation13 + $0xe8] ss:$16 sps:$4 sm:$0xff]  }
 0x66d   : > { %5352 = vmatprep.subr.bf16.mxu0 %v6402_v8  ;;  %2246 = vmatpush1.bf16.msra.mxu1 %v5692_v54  ;;  %v5748_v54 = vld [vmem:[#allocation15 + $0x68] sm:$0xff]  }
 0x66e   : > { %2247 = vmatprep.subr.bf16.mxu1 %v5700_v56  ;;  %v5750_v56 = vld [vmem:[#allocation15 + $0x28] sm:$0xff]  }
 0x670   : > { %5353 = vmatpush3.bf16.msra.mxu0 %v5676_v18 }
 0x671   : > { %5354 = vmatprep.subr.bf16.mxu0 %v6402_v8  ;;  %2248 = vmatpush1.bf16.msra.mxu1 %v5698_v58  ;;  %v5752_v58 = vld [vmem:[#allocation15 + $0x70] sm:$0xff]  }
 0x672   : > { %2249 = vmatprep.subr.bf16.mxu1 %v5706_v59  ;;  %v5754_v59 = vld [vmem:[#allocation15 + $0x30] sm:$0xff]  }
 0x674   : > { %5355 = vmatpush3.bf16.msra.mxu0 %v5677_v19 }
 0x675   : > { %5356 = vmatprep.subr.bf16.mxu0 %v6402_v8  ;;  %2250 = vmatpush1.bf16.msra.mxu1 %v5704_v60  ;;  %v5755_v60 = vld [vmem:[#allocation15 + $0xb0] sm:$0xff]  }
 0x676   : > { %2251 = vmatprep.subr.bf16.mxu1 %v5712_v4  ;;  %v5758_v4 = vld [vmem:[#allocation15 + $0x38] sm:$0xff]  }
 0x678   : > { %5357 = vmatpush3.bf16.msra.mxu0 %v5678_v20 }
 0x679   : > { %5358 = vmatprep.subr.bf16.mxu0 %v6402_v8  ;;  %2252 = vmatpush1.bf16.msra.mxu1 %v5710_v7  ;;  %v2059_v7 = vld [vmem:[%s7296_s26] sm:$0xf] }
 0x67a   : > { %2253 = vmatprep.subr.bf16.mxu1 %v5718_v10  ;;  %v2064_v10 = vrot.slane %v2059_v7, %v6972_v2 }
 0x67c   : > { %5359 = vmatpush3.bf16.msra.mxu0 %v5679_v21 }
 0x67d   : > { %2282 = vmatprep.subr.bf16.mxu0 %v5685_v39  ;;  %v5733_v39 = vld [vmem:[#allocation15 + $0xc8] sm:$0xff]  }
 0x6b4   : > { %v1645_v12 = vpop.f32.mrb[2].mxu0 }
 0x6b5   : > { %v5328_v13 = vpop.f32.mrb[3].mxu0 }
 0x6b6   : > { %v5719_v13 = vld [vmem:[#allocation13 + $0xc8] ss:$16 sps:$4 sm:$0xff]  }
 0x72e   : > { %v1718_v22 = vpop.f32.mrb[12].mxu1 }
 0x72f   : > { %1869 = vrot.lane.b32.xlu1 %v1718_v22, %s6403_s20  ;;  %v5333_v23 = vpop.f32.mrb[13].mxu1 }
 0x732   : > { %v1791_v24 = vpop.f32.mrb[8].mxu0 }
 0x733   : > { %1873 = vrot.lane.b32.xlu1 %v1791_v24, %s6405_s21  ;;  %v5338_v25 = vpop.f32.mrb[9].mxu0 }
 0x736   : > { %v1864_v26 = vpop.f32.mrb[14].mxu1 }
 0x737   : > { %1877 = vrot.lane.b32.xlu0 %v1864_v26, %s6404_s25  ;;  %v5343_v27 = vpop.f32.mrb[15].mxu1 }
 0x738   : > { %v4896_v27 = vld [vmem:[#allocation10] ss:$0 sm:$0xff] }
 0x7a1   : > { %v1870_v28 = vpop.permute.xlu1 %1869 }
 0x7a2   : > { %v1880_v31 = vsel %vm1250_vm3, %v1645_v12, %v1870_v28  ;;  %v5716_v12 = vld [vmem:[#allocation13 + $0xc0] ss:$16 sps:$4 sm:$0xff]  }
 0x7a3   : > { %2254 = vmatpush1.bf16.msra.mxu1 %v5716_v12  ;;  %v2068_v12 = vrot.slane %v2059_v7, %v6981_v5 }
 0x7a4   : > { %2255 = vmatprep.subr.bf16.mxu1 %v5724_v14 }
 0x7a5   : > { %v1874_v29 = vpop.permute.xlu1 %1873 }
 0x7a6   : > { %v1881_v32 = vsel %vm854_vm1, %v1880_v31, %v1874_v29  ;;  %v4897_v29 = vld [vmem:[#allocation12] ss:$0 sm:$0xff] }
 0x7a7   : > { %2256 = vmatpush1.bf16.msra.mxu1 %v5722_v16 }
 0x7a9   : > { %v1878_v33 = vpop.permute.xlu0 %1877 }
 0x7aa   : > { %v1883_v34 = vsel %vm1882_vm6, %v1881_v32, %v1878_v33 }
 0x7ab   : > { %v1900_v35 = vpack.c.bf16 %v1883_v34, %v1883_v34  ;;  %v5728_v34 = vld [vmem:[#allocation15 + $0x40] sm:$0xff]  }
 0x7ac   : > { %5134 = vmatprep.subr.bf16.mxu1 %v5728_v34 }
 0x7ad   : > { %5361 = vmatmul.mubr.bf16.vlgmr.msra.gmra.mrb[12].mxu0 %v1900_v35  ;;  %v5729_v35 = vld [vmem:[#allocation15 + $0xc0] sm:$0xff]  }
 0x7ae   : > { %2314 = vmatprep.mubr.bf16.mxu0 %v6399_v0  ;;  %2283 = vmatpush1.bf16.msra.mxu0 %v5683_v38  ;;  %v5732_v38 = vld [vmem:[#allocation15 + $0x48] sm:$0xff]  }
 0x7af   : > { %2284 = vmatprep.subr.bf16.mxu0 %v5691_v41  ;;  %v5735_v41 = vld [vmem:[#allocation15 + $0x88] sm:$0xff]  }
 0x7b2   : > { %2285 = vmatpush1.bf16.msra.mxu0 %v5689_v43  ;;  %v5737_v43 = vld [vmem:[#allocation15 + $0xd0] sm:$0xff]  }
 0x7b3   : > { %2286 = vmatprep.subr.bf16.mxu0 %v5697_v53  ;;  %v5747_v53 = vld [vmem:[#allocation15 + $0xa0] sm:$0xff]  }
 0x7b6   : > { %2287 = vmatpush1.bf16.msra.mxu0 %v5695_v55  ;;  %v5749_v55 = vld [vmem:[#allocation15 + $0xe8] sm:$0xff]  }
 0x7b7   : > { %2288 = vmatprep.subr.bf16.mxu0 %v5703_v57  ;;  %v5751_v57 = vld [vmem:[#allocation15 + $0xa8] sm:$0xff]  }
 0x880   : > { %v1990_v45 = vpop.f32.mrb[12].mxu0 }
 0x881   : > { %v1991_v46 = vadd.f32 %v4887_v44, %v1990_v45  ;;  %v5362_v47 = vpop.f32.mrb[13].mxu0  ;;  %v5738_v44 = vld [vmem:[#allocation15 + $0x10] sm:$0xff]  }
 0x882   : > { %v1993_v48 = vpop.f32.mrb[14].mxu0  ;;  %v5739_v45 = vld [vmem:[#allocation15 + $0x90] sm:$0xff]   ;;  %v5741_v47 = vld [vmem:[#allocation15 + $0xd8] sm:$0xff]  }
 0x883   : > { %v7066_v49 = vadd.f32 %v1991_v46, %v6960_v62  ;;  %v5363_v50 = vpop.f32.mrb[15].mxu0  ;;  %v5701_v62 = vld [vmem:[#allocation13 + $0x68] ss:$16 sps:$4 sm:$0xff]  }
 0x884   : > { %2289 = vmatpush1.bf16.msra.mxu0 %v5701_v62  ;;  %v5740_v46 = vld [vmem:[#allocation15 + $0x58] sm:$0xff]   ;;  %v5744_v50 = vld [vmem:[#allocation15 + $0x60] sm:$0xff]   ;;  %v5753_v62 = vld [vmem:[#allocation15 + $0xf0] sm:$0xff]  }
 0x885   : > { %1999 = vadd.xlane.f32.xlu1 %v7066_v49  ;;  %v2002_v51 = vmul.f32 %v7066_v49, %v7066_v49  ;;  %2290 = vmatprep.subr.bf16.mxu0 %v5709_v63  ;;  %v5742_v48 = vld [vmem:[#allocation15 + $0x18] sm:$0xff]  }
 0x886   : > { %v5757_v63 = vld [vmem:[#allocation15 + $0xf8] sm:$0xff]  }
 0x887   : > { %2003 = vadd.xlane.f32.xlu0 %v2002_v51  ;;  %v5745_v51 = vld [vmem:[#allocation15 + $0xe0] sm:$0xff]  }
 0x888   : > { %2291 = vmatpush1.bf16.msra.mxu0 %v5707_v61  ;;  %v5756_v61 = vld [vmem:[#allocation15 + $0x78] sm:$0xff]  }
 0x889   : > { %2292 = vmatprep.subr.bf16.mxu0 %v5715_v6  ;;  %v5759_v6 = vld [vmem:[#allocation15 + $0xb8] sm:$0xff]  }
 0x88c   : > { %2293 = vmatpush1.bf16.msra.mxu0 %v5713_v9  ;;  %v2075_v9 = vsub.s32 3, %v6969_v1 }
 0x88d   : > { %2294 = vmatprep.subr.bf16.mxu0 %v5721_v11  ;;  %v2072_v11 = vrot.slane %v2059_v7, %v6975_v3 }
 0x890   : > { %2295 = vmatpush1.bf16.msra.mxu0 %v5719_v13  ;;  %v2076_v13 = vrot.slane %v2059_v7, %v2075_v9 }
 0x891   : > { %2296 = vmatprep.subr.bf16.mxu0 %v5727_v15 }
 0x894   : > { %2297 = vmatpush1.bf16.msra.mxu0 %v5725_v17 }
 0x895   : > { %5156 = vmatprep.subr.bf16.mxu0 %v5729_v35 }
 0x912   : > { %v2000_v18 = vpop.xlane.xlu1 %1999 }
 0x913   : > { %v2001_v19 = vmul.f32 0.0078125, %v2000_v18 }
 0x914   : > { %v2004_v20 = vpop.xlane.xlu0 %2003 }
 0x915   : > { %v2006_v21 = vmul.f32 %v2001_v19, %v2001_v19  ;;  %v2005_v22 = vmul.f32 0.0078125, %v2004_v20  ;;  %v2008_v25 = vsub.f32 %v7066_v49, %v2001_v19  ;;  %v5743_v49 = vld [vmem:[#allocation15 + $0x98] sm:$0xff]  }
 0x917   : > { %v2007_v23 = vsub.f32 %v2005_v22, %v2006_v21 }
 0x919   : > { %v2009_v24 = vadd.f32 1e-12, %v2007_v23 }
 0x91b   : > { %5906 = vrsqrt.f32 %v2009_v24 }
 0x925   : > { %v5907_v26 = vpop.eup %5906 }
 0x926   : > { %v2011_v28 = vmul.f32 %v5907_v26, %v2008_v25 }
 0x928   : > { %v2018_v31 = vmul.f32 %v4896_v27, %v2011_v28 }
 0x92a   : > { %v7072_v32 = vadd.f32 %v4897_v29, %v2018_v31 }
 0x92c   : > { %v2058_v33 = vpack.c.bf16 %v7072_v32, %v7072_v32 }
 0x92e   : > { %2274 = vmatmul.mubr.bf16.vlgmr.msra.gmra.mrb[16].mxu1 %v2058_v33  ;;  %2315 = vmatmul.mubr.bf16.vlgmr.msra.gmra.mrb[16].mxu0 %v2058_v33 }
 0x92f   : > { %5135 = vmatpush3.bf16.msra.mxu1 %v5730_v36  ;;  %5157 = vmatpush3.bf16.msra.mxu0 %v5731_v37 }
 0x930   : > { %5136 = vmatprep.subr.bf16.mxu1 %v5732_v38  ;;  %5158 = vmatprep.subr.bf16.mxu0 %v5733_v39 }
 0x933   : > { %5137 = vmatpush3.bf16.msra.mxu1 %v5734_v40  ;;  %5159 = vmatpush3.bf16.msra.mxu0 %v5735_v41 }
 0x934   : > { %5138 = vmatprep.subr.bf16.mxu1 %v5736_v42  ;;  %5160 = vmatprep.subr.bf16.mxu0 %v5737_v43 }
 0x937   : > { %5139 = vmatpush3.bf16.msra.mxu1 %v5738_v44  ;;  %5161 = vmatpush3.bf16.msra.mxu0 %v5739_v45 }
 0x938   : > { %5140 = vmatprep.subr.bf16.mxu1 %v5740_v46  ;;  %5162 = vmatprep.subr.bf16.mxu0 %v5741_v47 }
 0x93b   : > { %5141 = vmatpush3.bf16.msra.mxu1 %v5742_v48  ;;  %5163 = vmatpush3.bf16.msra.mxu0 %v5743_v49 }
 0x93c   : > { %5142 = vmatprep.subr.bf16.mxu1 %v5744_v50  ;;  %5164 = vmatprep.subr.bf16.mxu0 %v5745_v51 }
 0x93f   : > { %5143 = vmatpush3.bf16.msra.mxu1 %v5746_v52  ;;  %5165 = vmatpush3.bf16.msra.mxu0 %v5747_v53 }
 0x940   : > { %5144 = vmatprep.subr.bf16.mxu1 %v5748_v54  ;;  %5166 = vmatprep.subr.bf16.mxu0 %v5749_v55 }
 0x943   : > { %5145 = vmatpush3.bf16.msra.mxu1 %v5750_v56  ;;  %5167 = vmatpush3.bf16.msra.mxu0 %v5751_v57 }
 0x944   : > { %5146 = vmatprep.subr.bf16.mxu1 %v5752_v58  ;;  %5168 = vmatprep.subr.bf16.mxu0 %v5753_v62 }
 0x947   : > { %5147 = vmatpush3.bf16.msra.mxu1 %v5754_v59  ;;  %5169 = vmatpush3.bf16.msra.mxu0 %v5755_v60 }
 0x948   : > { %5148 = vmatprep.subr.bf16.mxu1 %v5756_v61  ;;  %5170 = vmatprep.subr.bf16.mxu0 %v5757_v63 }
 0x94b   : > { %5149 = vmatpush3.bf16.msra.mxu1 %v5758_v4  ;;  %5171 = vmatpush3.bf16.msra.mxu0 %v5759_v6 }
 0x94c   : > { %5364 = vmatprep.subr.bf16.mxu0 %v6402_v8 }
 0xa01   : > { %v2275_v14 = vpop.f32.mrb[16].mxu1  ;;  %v2316_v15 = vpop.f32.mrb[16].mxu0 }
 0xa02   : > { %v2276_v16 = vadd.f32 %v2275_v14, %v2064_v10  ;;  %v2317_v17 = vadd.f32 %v2316_v15, %v2072_v11  ;;  %v2277_v18 = vpop.f32.mrb[17].mxu1  ;;  %v2318_v19 = vpop.f32.mrb[17].mxu0  ;;  %v5760_v11 = vld [vmem:[#allocation6 + $0xc0] ss:$12 sps:$4 sm:$0xff]   ;;  %v5766_v14 = vld [vmem:[#allocation6 + $0xdc] ss:$12 sps:$4 sm:$0xff]  }
 0xa03   : > { %v2278_v20 = vadd.f32 %v2277_v18, %v2068_v12  ;;  %v2319_v21 = vadd.f32 %v2318_v19, %v2076_v13  ;;  %v2279_v22 = vpop.f32.mrb[18].mxu1  ;;  %v2320_v23 = vpop.f32.mrb[18].mxu0  ;;  %v5762_v12 = vld [vmem:[#allocation6 + $0xc4] ss:$12 sps:$4 sm:$0xff]   ;;  %v5763_v13 = vld [vmem:[#allocation6 + $0xc8] ss:$12 sps:$4 sm:$0xff]  }
 0xa04   : > { %v2323_v24 = vmul.f32 %v2276_v16, %v2276_v16  ;;  %v2325_v25 = vmul.f32 %v2317_v17, %v2317_v17  ;;  %v2280_v26 = vpop.f32.mrb[19].mxu1  ;;  %v2321_v27 = vpop.f32.mrb[19].mxu0  ;;  %2916 = vmatprep.subr.bf16.mxu1 %v5762_v12  ;;  %v5764_v15 = vld [vmem:[#allocation6 + $0xd8] ss:$12 sps:$4 sm:$0xff]  }
 0xa05   : > { %v2324_v28 = vmul.f32 %v2278_v20, %v2278_v20  ;;  %v2326_v29 = vmul.f32 %v2319_v21, %v2319_v21  ;;  %v4930_v18 = vld [vmem:[#allocation16] ss:$0 sm:$0xff] }
 0xa06   : > { %v2327_v31 = vmul.f32 %v2323_v24, %v2276_v16  ;;  %v2329_v33 = vmul.f32 %v2325_v25, %v2317_v17 }
 0xa07   : > { %v2328_v34 = vmul.f32 %v2324_v28, %v2278_v20  ;;  %v2330_v35 = vmul.f32 %v2326_v29, %v2319_v21 }
 0xa08   : > { %v2331_v36 = vmul.f32 0.044715, %v2327_v31  ;;  %v2333_v37 = vmul.f32 0.044715, %v2329_v33  ;;  %v5767_v33 = vld [vmem:[#allocation6 + $0xe0] ss:$12 sps:$4 sm:$0xff]  }
 0xa09   : > { %v2332_v38 = vmul.f32 0.044715, %v2328_v34  ;;  %v2334_v39 = vmul.f32 0.044715, %v2330_v35  ;;  %v5770_v34 = vld [vmem:[#allocation6 + $0xf4] ss:$12 sps:$4 sm:$0xff]  }
 0xa0a   : > { %v2335_v40 = vadd.f32 %v2331_v36, %v2276_v16  ;;  %v2337_v41 = vadd.f32 %v2333_v37, %v2317_v17  ;;  %v5768_v35 = vld [vmem:[#allocation6 + $0xf0] ss:$12 sps:$4 sm:$0xff]   ;;  %v5771_v36 = vld [vmem:[#allocation6 + $0xf8] ss:$12 sps:$4 sm:$0xff]  }
 0xa0b   : > { %v2336_v42 = vadd.f32 %v2332_v38, %v2278_v20  ;;  %v2338_v43 = vadd.f32 %v2334_v39, %v2319_v21  ;;  %v5774_v37 = vld [vmem:[#allocation6 + $0x10c] ss:$12 sps:$4 sm:$0xff]   ;;  %v5772_v38 = vld [vmem:[#allocation6 + $0x108] ss:$12 sps:$4 sm:$0xff]   ;;  %v5775_v39 = vld [vmem:[#allocation6 + $0x110] ss:$12 sps:$4 sm:$0xff]  }
 0xa0c   : > { %v2339_v44 = vmul.f32 0.7978846, %v2335_v40  ;;  %v2341_v45 = vmul.f32 0.7978846, %v2337_v41  ;;  %v5776_v40 = vld [vmem:[#allocation6 + $0x120] ss:$12 sps:$4 sm:$0xff]  }
 0xa0d   : > { %v2340_v46 = vmul.f32 0.7978846, %v2336_v42  ;;  %v2342_v47 = vmul.f32 0.7978846, %v2338_v43  ;;  %v5779_v41 = vld [vmem:[#allocation6 + $0x128] ss:$12 sps:$4 sm:$0xff]  }
 0xa0e   : > { %5908 = vtanh.f32 %v2339_v44  ;;  %v5782_v42 = vld [vmem:[#allocation6 + $0x13c] ss:$12 sps:$4 sm:$0xff]   ;;  %v5780_v43 = vld [vmem:[#allocation6 + $0x138] ss:$12 sps:$4 sm:$0xff]   ;;  %v5783_v44 = vld [vmem:[#allocation6 + $0x140] ss:$12 sps:$4 sm:$0xff]  }
 0xa0f   : > { %5910 = vtanh.f32 %v2341_v45  ;;  %v5786_v45 = vld [vmem:[#allocation6 + $0x154] ss:$12 sps:$4 sm:$0xff]  }
 0xa10   : > { %5912 = vtanh.f32 %v2340_v46  ;;  %v5784_v46 = vld [vmem:[#allocation6 + $0x150] ss:$12 sps:$4 sm:$0xff]  }
 0xa11   : > { %5914 = vtanh.f32 %v2342_v47  ;;  %v5787_v47 = vld [vmem:[#allocation6 + $0x158] ss:$12 sps:$4 sm:$0xff]  }
 0xa18   : > { %v5909_v48 = vpop.eup %5908 }
 0xa19   : > { %v5911_v49 = vpop.eup %5910  ;;  %v2347_v50 = vadd.f32 1.0, %v5909_v48  ;;  %v5790_v48 = vld [vmem:[#allocation6 + $0x16c] ss:$12 sps:$4 sm:$0xff]  }
 0xa1a   : > { %v5913_v51 = vpop.eup %5912  ;;  %v2349_v52 = vadd.f32 1.0, %v5911_v49  ;;  %v5788_v49 = vld [vmem:[#allocation6 + $0x168] ss:$12 sps:$4 sm:$0xff]  }
 0xa1b   : > { %v5915_v53 = vpop.eup %5914  ;;  %v2348_v54 = vadd.f32 1.0, %v5913_v51  ;;  %v2351_v55 = vmul.f32 0.5, %v2347_v50  ;;  %v5791_v50 = vld [vmem:[#allocation6 + $0x170] ss:$12 sps:$4 sm:$0xff]  }
 0xa1c   : > { %v2350_v56 = vadd.f32 1.0, %v5915_v53  ;;  %v2353_v57 = vmul.f32 0.5, %v2349_v52 }
 0xa1d   : > { %v2352_v58 = vmul.f32 0.5, %v2348_v54  ;;  %v2355_v59 = vmul.f32 %v2351_v55, %v2276_v16 }
 0xa1e   : > { %v2354_v62 = vmul.f32 0.5, %v2350_v56  ;;  %v2357_v61 = vmul.f32 %v2353_v57, %v2317_v17 }
 0xa1f   : > { %v2356_v60 = vmul.f32 %v2352_v58, %v2278_v20  ;;  %v2423_v7 = vpack.c.bf16 %v2355_v59, %v2355_v59  ;;  %v4963_v59 = vld [vmem:[#allocation18] ss:$0 sm:$0xff] }
 0xa20   : > { %v2358_v63 = vmul.f32 %v2354_v62, %v2319_v21  ;;  %v2425_v10 = vpack.c.bf16 %v2357_v61, %v2357_v61  ;;  %v4964_v61 = vld [vmem:[#allocation19] ss:$0 sm:$0xff] }
 0xa21   : > { %v2424_v4 = vpack.c.bf16 %v2356_v60, %v2356_v60 }
 0xa22   : > { %v2426_v6 = vpack.c.bf16 %v2358_v63, %v2358_v63 }
 0xa23   : > { %2658 = vmatprep.mubr.bf16.mxu1 %v2424_v4 }
 0xa24   : > { %2698 = vmatprep.mubr.bf16.mxu0 %v2426_v6  ;;  %2659 = vmatmul.mubr.bf16.vlgmr.msra.gmra.mrb[20].mxu1 %v2423_v7  ;;  %v4965_v7 = vld [vmem:[%s7294_s30 + $0x3] sm:$0x7] }
 0xa25   : > { %2699 = vmatmul.mubr.bf16.vlgmr.msra.gmra.mrb[20].mxu0 %v2425_v10  ;;  %2948 = vmatprep.mubr.bf16.mxu1 %v6399_v0  ;;  %v2776_v10 = vrot.slane %v4965_v7, %v6972_v2 }
 0xa26   : > { %5380 = vmatprep.mubr.msk.bf16.mxu0 %vm6401_vm0, %v6402_v8  ;;  %5365 = vmatpush3.bf16.msra.mxu0 %v5763_v13 }
 0xa27   : > { %2917 = vmatpush1.bf16.msra.mxu1 %v5760_v11  ;;  %5366 = vmatprep.subr.bf16.mxu0 %v6402_v8  ;;  %v2780_v11 = vrot.slane %v4965_v7, %v6981_v5 }
 0xa28   : > { %2918 = vmatprep.subr.bf16.mxu1 %v5766_v14 }
 0xa2a   : > { %5367 = vmatpush3.bf16.msra.mxu0 %v5767_v33 }
 0xa2b   : > { %2919 = vmatpush1.bf16.msra.mxu1 %v5764_v15  ;;  %5368 = vmatprep.subr.bf16.mxu0 %v6402_v8 }
 0xa2c   : > { %2920 = vmatprep.subr.bf16.mxu1 %v5770_v34 }
 0xa2e   : > { %5369 = vmatpush3.bf16.msra.mxu0 %v5771_v36 }
 0xa2f   : > { %2921 = vmatpush1.bf16.msra.mxu1 %v5768_v35  ;;  %5370 = vmatprep.subr.bf16.mxu0 %v6402_v8 }
 0xa30   : > { %2922 = vmatprep.subr.bf16.mxu1 %v5774_v37 }
 0xa32   : > { %5371 = vmatpush3.bf16.msra.mxu0 %v5775_v39 }
 0xa33   : > { %2923 = vmatpush1.bf16.msra.mxu1 %v5772_v38  ;;  %5372 = vmatprep.subr.bf16.mxu0 %v6402_v8 }
 0xa36   : > { %5373 = vmatpush3.bf16.msra.mxu0 %v5779_v41 }
 0xa37   : > { %5374 = vmatprep.subr.bf16.mxu0 %v6402_v8 }
 0xa3a   : > { %5375 = vmatpush3.bf16.msra.mxu0 %v5783_v44 }
 0xa3b   : > { %5376 = vmatprep.subr.bf16.mxu0 %v6402_v8 }
 0xa3e   : > { %5377 = vmatpush3.bf16.msra.mxu0 %v5787_v47 }
 0xa3f   : > { %5378 = vmatprep.subr.bf16.mxu0 %v6402_v8 }
 0xa42   : > { %5379 = vmatpush3.bf16.msra.mxu0 %v5791_v50 }
 0xa43   : > { %5424 = vmatprep.subr.bf16.mxu0 %v6402_v8 }
 0xaf7   : > { %v5150_v16 = vpop.f32.mrb[20].mxu1 }
 0xaf8   : > { %v5172_v17 = vpop.f32.mrb[20].mxu0  ;;  %v5151_v19 = vpop.f32.mrb[21].mxu1 }
 0xaf9   : > { %v5152_v20 = vadd.f32 %v5151_v19, %v5150_v16  ;;  %v5173_v21 = vpop.f32.mrb[21].mxu0  ;;  %v5153_v22 = vpop.f32.mrb[22].mxu1 }
 0xafa   : > { %v5174_v23 = vadd.f32 %v5173_v21, %v5172_v17  ;;  %v5175_v24 = vpop.f32.mrb[22].mxu0  ;;  %v5154_v25 = vpop.f32.mrb[23].mxu1 }
 0xafb   : > { %v2661_v26 = vadd.f32 %v5152_v20, %v4930_v18  ;;  %v5176_v27 = vpop.f32.mrb[23].mxu0 }
 0xafd   : > { %v2701_v28 = vadd.f32 %v5174_v23, %v2661_v26  ;;  %v2784_v26 = vrot.slane %v4965_v7, %v6975_v3 }
 0xaff   : > { %v2706_v29 = vadd.f32 %v2701_v28, %v7072_v32  ;;  %v5778_v32 = vld [vmem:[#allocation6 + $0x124] ss:$12 sps:$4 sm:$0xff]  }
 0xb00   : > { %2924 = vmatprep.subr.bf16.mxu1 %v5778_v32 }
 0xb01   : > { %2709 = vadd.xlane.f32.xlu0 %v2706_v29  ;;  %v2712_v31 = vmul.f32 %v2706_v29, %v2706_v29  ;;  %2925 = vmatpush1.bf16.msra.mxu1 %v5776_v40 }
 0xb02   : > { %2926 = vmatprep.subr.bf16.mxu1 %v5782_v42 }
 0xb03   : > { %2713 = vadd.xlane.f32.xlu1 %v2712_v31 }
 0xb05   : > { %2927 = vmatpush1.bf16.msra.mxu1 %v5780_v43 }
 0xb06   : > { %2928 = vmatprep.subr.bf16.mxu1 %v5786_v45 }
 0xb09   : > { %2929 = vmatpush1.bf16.msra.mxu1 %v5784_v46 }
 0xb0a   : > { %2930 = vmatprep.subr.bf16.mxu1 %v5790_v48 }
 0xb0d   : > { %2931 = vmatpush1.bf16.msra.mxu1 %v5788_v49 }
 0xb0e   : > { %5384 = vmatprep.subr.mxu1 %v6402_v8 }
 0xb8e   : > { %v2710_v51 = vpop.xlane.xlu0 %2709 }
 0xb8f   : > { %v2711_v52 = vmul.f32 0.0078125, %v2710_v51 }
 0xb90   : > { %v2714_v53 = vpop.xlane.xlu1 %2713 }
 0xb91   : > { %v2716_v54 = vmul.f32 %v2711_v52, %v2711_v52  ;;  %v2715_v55 = vmul.f32 0.0078125, %v2714_v53  ;;  %v2718_v58 = vsub.f32 %v2706_v29, %v2711_v52 }
 0xb93   : > { %v2717_v56 = vsub.f32 %v2715_v55, %v2716_v54 }
 0xb95   : > { %v2719_v57 = vadd.f32 1e-12, %v2717_v56 }
 0xb97   : > { %5916 = vrsqrt.f32 %v2719_v57 }
 0xba1   : > { %v5917_v62 = vpop.eup %5916 }
 0xba2   : > { %v2721_v60 = vmul.f32 %v5917_v62, %v2718_v58 }
 0xba4   : > { %v2728_v63 = vmul.f32 %v4963_v59, %v2721_v60 }
 0xba6   : > { %v7099_v4 = vadd.f32 %v4964_v61, %v2728_v63 }
 0xba8   : > { %v2769_v6 = vpack.c.bf16 %v7099_v4, %v7099_v4 }
 0xbaa   : > { %2949 = vmatmul.mubr.bf16.vlgmr.msra.gmra.mrb[24].mxu1 %v2769_v6  ;;  %5381 = vmatmul.mubr.bf16.vlgmr.msra.gmra.mrb[24].mxu0 %v2769_v6 }
 0xbab   : > { %5386 = vmatprep.mubr.msk.f32.mxu1 %vm6401_vm0, %v6402_v8  ;;  %5440 = vmatprep.mubr.msk.bf16.mxu0 %vm6401_vm0, %v6402_v8 }
 0xc7d   : > { %v2950_v12 = vpop.f32.mrb[24].mxu1  ;;  %v2991_v13 = vpop.f32.mrb[24].mxu0 }
 0xc7e   : > { %v2951_v14 = vadd.f32 %v2950_v12, %v2776_v10  ;;  %v2952_v15 = vpop.f32.mrb[25].mxu1  ;;  %v5382_v16 = vpop.f32.mrb[25].mxu0  ;;  %v2992_v28 = vadd.f32 %v2991_v13, %v2784_v26  ;;  %v5792_v13 = vld [vmem:[#allocation7 + $0x40] sm:$0xff]  }
 0xc7f   : > { %v2953_v17 = vadd.f32 %v2952_v15, %v2780_v11  ;;  %v2954_v18 = vpop.f32.mrb[26].mxu1  ;;  %v2994_v19 = vpop.f32.mrb[26].mxu0  ;;  %5425 = vmatpush3.bf16.msra.mxu0 %v5792_v13  ;;  %v5839_v13 = vld [vmem:[#allocation13 + $0x1c8] ss:$16 sps:$4 sm:$0xff]  }
 0xc80   : > { %v2955_v20 = vpop.f32.mrb[27].mxu1  ;;  %v5383_v21 = vpop.f32.mrb[27].mxu0  ;;  %2998 = vrot.lane.b32.xlu1 %v2951_v14, %s6404_s25  ;;  %5426 = vmatprep.subr.bf16.mxu0 %v6402_v8  ;;  %v5795_v18 = vld [vmem:[#allocation7 + $0x58] sm:$0xff]   ;;  %v5796_v19 = vld [vmem:[#allocation7 + $0x60] sm:$0xff]  }
 0xc81   : > { %3005 = vrot.lane.b32.xlu0 %v2953_v17, %s6404_s25  ;;  %5385 = vmatpush3.xpose.msk.msra.mxu1 %vm1250_vm3, %v2953_v17  ;;  %v5797_v20 = vld [vmem:[#allocation7 + $0x68] sm:$0xff]   ;;  %v5798_v21 = vld [vmem:[#allocation7 + $0x70] sm:$0xff]  }
 0xc82   : > { %5389 = vmatprep.subr.mxu1 %v6402_v8 }
 0xc84   : > { %3007 = vrot.lane.b32.xlu1 %v2953_v17, %s6405_s21  ;;  %5387 = vmatmul.mubr.msk.f32.vlgmr.msra.gmra.mrb[28].mxu1 %vm1250_vm3, %v2951_v14 }
 0xc85   : > { %3000 = vrot.lane.b32.xlu0 %v2951_v14, %s6405_s21  ;;  %5391 = vmatprep.mubr.msk.f32.mxu1 %vm6401_vm0, %v6402_v8 }
 0xc88   : > { %3009 = vrot.lane.b32.xlu1 %v2953_v17, %s6403_s20  ;;  %v5794_v17 = vld [vmem:[#allocation7 + $0x50] sm:$0xff]  }
 0xc89   : > { %3002 = vrot.lane.b32.xlu0 %v2951_v14, %s6403_s20  ;;  %v5793_v14 = vld [vmem:[#allocation7 + $0x48] sm:$0xff]  }
 0xc8a   : > { %5427 = vmatpush3.bf16.msra.mxu0 %v5793_v14  ;;  %v5844_v14 = vld [vmem:[#allocation13 + $0x1e4] ss:$16 sps:$4 sm:$0xff]  }
 0xc8b   : > { %5428 = vmatprep.subr.bf16.mxu0 %v6402_v8 }
 0xc8e   : > { %5429 = vmatpush3.bf16.msra.mxu0 %v5794_v17  ;;  %v5845_v17 = vld [vmem:[#allocation13 + $0x1e8] ss:$16 sps:$4 sm:$0xff]  }
 0xc8f   : > { %5430 = vmatprep.subr.bf16.mxu0 %v6402_v8 }
 0xc92   : > { %5431 = vmatpush3.bf16.msra.mxu0 %v5795_v18 }
 0xc93   : > { %5432 = vmatprep.subr.bf16.mxu0 %v6402_v8 }
 0xc96   : > { %5433 = vmatpush3.bf16.msra.mxu0 %v5796_v19 }
 0xc97   : > { %5434 = vmatprep.subr.bf16.mxu0 %v6402_v8 }
 0xc9a   : > { %5435 = vmatpush3.bf16.msra.mxu0 %v5797_v20 }
 0xc9b   : > { %5436 = vmatprep.subr.bf16.mxu0 %v6402_v8 }
 0xc9e   : > { %5437 = vmatpush3.bf16.msra.mxu0 %v5798_v21 }
 0xc9f   : > { %5438 = vmatprep.subr.bf16.mxu0 %v6402_v8 }
 0xcf2   : > { %v2999_v22 = vpop.permute.xlu1 %2998 }
 0xcf3   : > { %v3006_v23 = vpop.permute.xlu0 %3005 }
 0xcf4   : > { %5390 = vmatpush3.xpose.msk.msra.mxu1 %vm1250_vm3, %v3006_v23 }
 0xcf5   : > { %5394 = vmatprep.subr.mxu1 %v6402_v8 }
 0xcf6   : > { %v3008_v24 = vpop.permute.xlu1 %3007 }
 0xcf7   : > { %5392 = vmatmul.mubr.msk.f32.vlgmr.msra.gmra.mrb[30].mxu1 %vm1250_vm3, %v2999_v22  ;;  %v3001_v25 = vpop.permute.xlu0 %3000  ;;  %v5799_v22 = vld [vmem:[#allocation7 + $0x78] sm:$0xff]  }
 0xcf8   : > { %5395 = vmatpush3.xpose.msk.msra.mxu1 %vm1250_vm3, %v3008_v24  ;;  %5396 = vmatprep.mubr.msk.f32.mxu1 %vm6401_vm0, %v6402_v8 }
 0xcf9   : > { %5399 = vmatprep.subr.mxu1 %v6402_v8  ;;  %5439 = vmatpush3.bf16.msra.mxu0 %v5799_v22 }
 0xcfa   : > { %v3010_v27 = vpop.permute.xlu1 %3009 }
 0xcfb   : > { %5397 = vmatmul.mubr.msk.f32.vlgmr.msra.gmra.mrb[32].mxu1 %vm1250_vm3, %v3001_v25  ;;  %v3003_v29 = vpop.permute.xlu0 %3002 }
 0xcfc   : > { %5400 = vmatpush3.xpose.msk.msra.mxu1 %vm1250_vm3, %v3010_v27  ;;  %5401 = vmatprep.mubr.msk.f32.mxu1 %vm6401_vm0, %v6402_v8 }
 0xcfd   : > { %5404 = vmatprep.subr.mxu1 %v6402_v8 }
 0xcff   : > { %5402 = vmatmul.mubr.msk.f32.vlgmr.msra.gmra.mrb[34].mxu1 %vm1250_vm3, %v3003_v29 }
 0xd00   : > { %5405 = vmatpush3.msra.mxu1 %v2992_v28  ;;  %5406 = vmatprep.mubr.msk.f32.mxu1 %vm6401_vm0, %v6402_v8 }
 0xd01   : > { %5409 = vmatprep.subr.mxu1 %v6402_v8 }
 0xd57   : > { %v3091_v31 = vpop.f32.mrb[28].mxu1 }
 0xd58   : > { %v3092_v33 = vadd.f32 %v3091_v31, %v7025_v30  ;;  %v5388_v34 = vpop.f32.mrb[29].mxu1 }
 0xd5a   : > { %v3317_v35 = vmul.f32 1.442695, %v3092_v33 }
 0xd5c   : > { %5918 = vpow2.f32 %v3317_v35 }
 0xd66   : > { %v5919_v36 = vpop.eup %5918 }
 0xd67   : > { %v3325_v37 = vsel %vm1555_vm5, %v5919_v36, 0.0 }
 0xd68   : > { %3326 = vadd.xlane.f32.xlu1 %v3325_v37 }
 0xd79   : > { %3015 = vrot.lane.b32.xlu1 %v2992_v28, %s6405_s21 }
 0xdca   : > { %v3165_v38 = vpop.f32.mrb[30].mxu1 }
 0xdcb   : > { %v3166_v39 = vadd.f32 %v3165_v38, %v7025_v30  ;;  %v5393_v32 = vpop.f32.mrb[31].mxu1  ;;  %v5800_v38 = vld [vmem:[#allocation13 + $0x100] ss:$16 sps:$4 sm:$0xff]  }
 0xdcc   : > { %v5803_v32 = vld [vmem:[#allocation13 + $0x108] ss:$16 sps:$4 sm:$0xff]  }
 0xdcd   : > { %v3319_v40 = vmul.f32 1.442695, %v3166_v39  ;;  %v5802_v39 = vld [vmem:[#allocation13 + $0x104] ss:$16 sps:$4 sm:$0xff]  }
 0xdce   : > { %v3239_v41 = vpop.f32.mrb[32].mxu1 }
 0xdcf   : > { %5920 = vpow2.f32 %v3319_v40  ;;  %v3240_v42 = vadd.f32 %v3239_v41, %v7025_v30  ;;  %v5398_v43 = vpop.f32.mrb[33].mxu1  ;;  %v5805_v40 = vld [vmem:[#allocation13 + $0x10c] ss:$16 sps:$4 sm:$0xff]   ;;  %v5808_v41 = vld [vmem:[#allocation13 + $0x124] ss:$16 sps:$4 sm:$0xff]  }
 0xdd0   : > { %4056 = vmatprep.subr.bf16.mxu0 %v5805_v40  ;;  %v5806_v43 = vld [vmem:[#allocation13 + $0x120] ss:$16 sps:$4 sm:$0xff]   ;;  %v5854_v40 = vld [vmem:[#allocation15 + $0x108] sm:$0xff]  }
 0xdd1   : > { %v3321_v44 = vmul.f32 1.442695, %v3240_v42  ;;  %v5811_v42 = vld [vmem:[#allocation13 + $0x12c] ss:$16 sps:$4 sm:$0xff]  }
 0xdd2   : > { %v3313_v45 = vpop.f32.mrb[34].mxu1 }
 0xdd3   : > { %5922 = vpow2.f32 %v3321_v44  ;;  %v3314_v46 = vadd.f32 %v3313_v45, %v7025_v30  ;;  %v5403_v47 = vpop.f32.mrb[35].mxu1  ;;  %v5809_v44 = vld [vmem:[#allocation13 + $0x128] ss:$16 sps:$4 sm:$0xff]  }
 0xdd4   : > { %v5002_v45 = vld [vmem:[#allocation9 + $0x1] ss:$0 sm:$0xff] }
 0xdd5   : > { %v3323_v48 = vmul.f32 1.442695, %v3314_v46 }
 0xdd7   : > { %5924 = vpow2.f32 %v3323_v48 }
 0xdd9   : > { %v5921_v49 = vpop.eup %5920 }
 0xdda   : > { %v3328_v50 = vsel %vm1555_vm5, %v5921_v49, 0.0 }
 0xddb   : > { %3329 = vadd.xlane.f32.xlu0 %v3328_v50 }
 0xddd   : > { %v5923_v51 = vpop.eup %5922 }
 0xdde   : > { %v3331_v52 = vsel %vm1555_vm5, %v5923_v51, 0.0 }
 0xddf   : > { %3332 = vadd.xlane.f32.xlu0 %v3331_v52  ;;  %v5814_v52 = vld [vmem:[#allocation13 + $0x144] ss:$16 sps:$4 sm:$0xff]  }
 0xde1   : > { %v5925_v53 = vpop.eup %5924 }
 0xde2   : > { %v3334_v54 = vsel %vm1555_vm5, %v5925_v53, 0.0 }
 0xde3   : > { %3335 = vadd.xlane.f32.xlu1 %v3334_v54  ;;  %v5812_v54 = vld [vmem:[#allocation13 + $0x140] ss:$16 sps:$4 sm:$0xff]  }
 0xdf4   : > { %3018 = vrot.lane.b32.xlu1 %v2992_v28, %s6403_s20 }
 0xdf5   : > { %v3327_v55 = vpop.xlane.xlu1 %3326  ;;  %3012 = vrot.lane.b32.xlu0 %v2992_v28, %s6404_s25 }
 0xdf6   : > { %5926 = vrcp.f32 %v3327_v55  ;;  %v5815_v55 = vld [vmem:[#allocation13 + $0x148] ss:$16 sps:$4 sm:$0xff]  }
 0xdf9   : > { %v3016_v58 = vpop.permute.xlu1 %3015 }
 0xe00   : > { %v5927_v30 = vpop.eup %5926 }
 0xe01   : > { %v3341_v56 = vmul.f32 %v5927_v30, %v5919_v36  ;;  %v5820_v30 = vld [vmem:[#allocation13 + $0x164] ss:$16 sps:$4 sm:$0xff]  }
 0xe03   : > { %5407 = vmatmul.mubr.msk.f32.vlgmr.msra.gmra.mrb[36].mxu1 %vm1555_vm5, %v3341_v56  ;;  %v5823_v56 = vld [vmem:[#allocation13 + $0x16c] ss:$16 sps:$4 sm:$0xff]  }
 0xe04   : > { %5411 = vmatprep.mubr.msk.f32.mxu1 %vm6401_vm0, %v6402_v8 }
 0xe68   : > { %v3330_v57 = vpop.xlane.xlu0 %3329 }
 0xe69   : > { %5928 = vrcp.f32 %v3330_v57  ;;  %v5818_v57 = vld [vmem:[#allocation13 + $0x160] ss:$16 sps:$4 sm:$0xff]  }
 0xe6c   : > { %v3333_v62 = vpop.xlane.xlu0 %3332 }
 0xe6d   : > { %5930 = vrcp.f32 %v3333_v62  ;;  %v5824_v62 = vld [vmem:[#allocation13 + $0x180] ss:$16 sps:$4 sm:$0xff]  }
 0xe70   : > { %v3013_v59 = vpop.permute.xlu0 %3012  ;;  %v3336_v60 = vpop.xlane.xlu1 %3335 }
 0xe71   : > { %5932 = vrcp.f32 %v3336_v60  ;;  %5410 = vmatpush3.msra.mxu1 %v3013_v59  ;;  %v5827_v59 = vld [vmem:[#allocation13 + $0x188] ss:$16 sps:$4 sm:$0xff]   ;;  %v5829_v60 = vld [vmem:[#allocation13 + $0x18c] ss:$16 sps:$4 sm:$0xff]  }
 0xe72   : > { %5414 = vmatprep.subr.mxu1 %v6402_v8 }
 0xe73   : > { %v5929_v61 = vpop.eup %5928 }
 0xe74   : > { %v3342_v63 = vmul.f32 %v5929_v61, %v5921_v49  ;;  %v3019_v10 = vpop.permute.xlu1 %3018  ;;  %v5832_v61 = vld [vmem:[#allocation13 + $0x1a4] ss:$16 sps:$4 sm:$0xff]  }
 0xe76   : > { %5412 = vmatmul.mubr.msk.f32.vlgmr.msra.gmra.mrb[38].mxu1 %vm1555_vm5, %v3342_v63  ;;  %v5835_v63 = vld [vmem:[#allocation13 + $0x1ac] ss:$16 sps:$4 sm:$0xff]  }
 0xe77   : > { %v5931_v6 = vpop.eup %5930  ;;  %5415 = vmatpush3.msra.mxu1 %v3016_v58  ;;  %5416 = vmatprep.mubr.msk.f32.mxu1 %vm6401_vm0, %v6402_v8  ;;  %v5826_v58 = vld [vmem:[#allocation13 + $0x184] ss:$16 sps:$4 sm:$0xff]  }
 0xe78   : > { %v3343_v7 = vmul.f32 %v5931_v6, %v5923_v51  ;;  %5419 = vmatprep.subr.mxu1 %v6402_v8  ;;  %v5830_v6 = vld [vmem:[#allocation13 + $0x1a0] ss:$16 sps:$4 sm:$0xff]  }
 0xe7a   : > { %5417 = vmatmul.mubr.msk.f32.vlgmr.msra.gmra.mrb[40].mxu1 %vm1555_vm5, %v3343_v7  ;;  %v5833_v7 = vld [vmem:[#allocation13 + $0x1a8] ss:$16 sps:$4 sm:$0xff]  }
 0xe7b   : > { %v5933_v11 = vpop.eup %5932  ;;  %5420 = vmatpush3.msra.mxu1 %v3019_v10  ;;  %5421 = vmatprep.mubr.msk.f32.mxu1 %vm6401_vm0, %v6402_v8  ;;  %v5838_v10 = vld [vmem:[#allocation13 + $0x1c4] ss:$16 sps:$4 sm:$0xff]  }
 0xe7c   : > { %v3344_v12 = vmul.f32 %v5933_v11, %v5925_v53  ;;  %4015 = vmatprep.subr.bf16.mxu1 %v5802_v39  ;;  %v5817_v53 = vld [vmem:[#allocation13 + $0x14c] ss:$16 sps:$4 sm:$0xff]  }
 0xe7d   : > { %v5841_v11 = vld [vmem:[#allocation13 + $0x1cc] ss:$16 sps:$4 sm:$0xff]  }
 0xe7e   : > { %5422 = vmatmul.mubr.msk.f32.vlgmr.msra.gmra.mrb[42].mxu1 %vm1555_vm5, %v3344_v12  ;;  %v5836_v12 = vld [vmem:[#allocation13 + $0x1c0] ss:$16 sps:$4 sm:$0xff]   ;;  %v5852_v39 = vld [vmem:[#allocation15 + $0x148] sm:$0xff]  }
 0xe7f   : > { %4047 = vmatprep.mubr.bf16.mxu1 %v6399_v0  ;;  %4016 = vmatpush1.bf16.msra.mxu1 %v5800_v38  ;;  %v5851_v38 = vld [vmem:[#allocation15 + $0x180] sm:$0xff]  }
 0xe80   : > { %4017 = vmatprep.subr.bf16.mxu1 %v5808_v41  ;;  %v5855_v41 = vld [vmem:[#allocation15 + $0x188] sm:$0xff]  }
 0xe83   : > { %4018 = vmatpush1.bf16.msra.mxu1 %v5806_v43  ;;  %v5857_v43 = vld [vmem:[#allocation15 + $0x1d0] sm:$0xff]  }
 0xe84   : > { %4019 = vmatprep.subr.bf16.mxu1 %v5814_v52  ;;  %v5867_v52 = vld [vmem:[#allocation15 + $0x1a0] sm:$0xff]  }
 0xe87   : > { %4020 = vmatpush1.bf16.msra.mxu1 %v5812_v54  ;;  %v5869_v54 = vld [vmem:[#allocation15 + $0x1e8] sm:$0xff]  }
 0xe88   : > { %4021 = vmatprep.subr.bf16.mxu1 %v5820_v30  ;;  %v5871_v30 = vld [vmem:[#allocation15 + $0x1a8] sm:$0xff]  }
 0xe8b   : > { %4022 = vmatpush1.bf16.msra.mxu1 %v5818_v57  ;;  %v5873_v57 = vld [vmem:[#allocation15 + $0x1f0] sm:$0xff]  }
 0xe8c   : > { %4023 = vmatprep.subr.bf16.mxu1 %v5826_v58  ;;  %v5875_v58 = vld [vmem:[#allocation15 + $0x1b0] sm:$0xff]  }
 0xe8f   : > { %4024 = vmatpush1.bf16.msra.mxu1 %v5824_v62  ;;  %v5876_v62 = vld [vmem:[#allocation15 + $0x178] sm:$0xff]  }
 0xe90   : > { %4025 = vmatprep.subr.bf16.mxu1 %v5832_v61  ;;  %v5879_v61 = vld [vmem:[#allocation15 + $0x1b8] sm:$0xff]  }
 0xe93   : > { %4026 = vmatpush1.bf16.msra.mxu1 %v5830_v6 }
 0xe94   : > { %4027 = vmatprep.subr.bf16.mxu1 %v5838_v10 }
 0xe97   : > { %4028 = vmatpush1.bf16.msra.mxu1 %v5836_v12 }
 0xe98   : > { %4029 = vmatprep.subr.bf16.mxu1 %v5844_v14 }
 0xed6   : > { %v3414_v15 = vpop.f32.mrb[36].mxu1 }
 0xed7   : > { %v5408_v16 = vpop.f32.mrb[37].mxu1 }
 0xed8   : > { %v5842_v16 = vld [vmem:[#allocation13 + $0x1e0] ss:$16 sps:$4 sm:$0xff]  }
 0xed9   : > { %4030 = vmatpush1.bf16.msra.mxu1 %v5842_v16 }
 0xf49   : > { %v3487_v23 = vpop.f32.mrb[38].mxu1 }
 0xf4a   : > { %3638 = vrot.lane.b32.xlu0 %v3487_v23, %s6403_s20  ;;  %v5413_v24 = vpop.f32.mrb[39].mxu1  ;;  %s834_s20 = scalar_lea.vmem %s7297_s1, %s7300_s24 }
 0xf4d   : > { %v3560_v25 = vpop.f32.mrb[40].mxu1 }
 0xf4e   : > { %3642 = vrot.lane.b32.xlu1 %v3560_v25, %s6405_s21  ;;  %v5418_v26 = vpop.f32.mrb[41].mxu1 }
 0xf51   : > { %v3633_v27 = vpop.f32.mrb[42].mxu1 }
 0xf52   : > { %3646 = vrot.lane.b32.xlu0 %v3633_v27, %s6404_s25  ;;  %v5423_v28 = vpop.f32.mrb[43].mxu1  ;;  %v5011_v27 = vld [vmem:[#allocation10 + $0x1] ss:$0 sm:$0xff] }
 0xfbc   : > { %v3639_v29 = vpop.permute.xlu0 %3638 }
 0xfbd   : > { %v3649_v33 = vsel %vm1250_vm3, %v3414_v15, %v3639_v29  ;;  %v5847_v15 = vld [vmem:[#allocation13 + $0x1ec] ss:$16 sps:$4 sm:$0xff]  }
 0xfbe   : > { %v5012_v29 = vld [vmem:[#allocation12 + $0x1] ss:$0 sm:$0xff] }
 0xfc0   : > { %v3643_v31 = vpop.permute.xlu1 %3642 }
 0xfc1   : > { %v3650_v34 = vsel %vm854_vm1, %v3649_v33, %v3643_v31 }
 0xfc4   : > { %v3647_v35 = vpop.permute.xlu0 %3646 }
 0xfc5   : > { %v3651_v36 = vsel %vm1882_vm6, %v3650_v34, %v3647_v35  ;;  %v5848_v35 = vld [vmem:[#allocation15 + $0x140] sm:$0xff]  }
 0xfc6   : > { %v3669_v37 = vpack.c.bf16 %v3651_v36, %v3651_v36  ;;  %v5849_v36 = vld [vmem:[#allocation15 + $0x1c0] sm:$0xff]   ;;  %5212 = vmatprep.subr.bf16.mxu1 %v5848_v35 }
 0xfc8   : > { %5441 = vmatmul.mubr.bf16.vlgmr.msra.gmra.mrb[28].mxu0 %v3669_v37  ;;  %v5850_v37 = vld [vmem:[#allocation15 + $0x100] sm:$0xff]  }
 0xfc9   : > { %4088 = vmatprep.mubr.bf16.mxu0 %v6399_v0  ;;  %4057 = vmatpush1.bf16.msra.mxu0 %v5803_v32  ;;  %v5853_v32 = vld [vmem:[#allocation15 + $0x1c8] sm:$0xff]  }
 0xfca   : > { %4058 = vmatprep.subr.bf16.mxu0 %v5811_v42  ;;  %v5856_v42 = vld [vmem:[#allocation15 + $0x150] sm:$0xff]  }
 0xfcd   : > { %4059 = vmatpush1.bf16.msra.mxu0 %v5809_v44  ;;  %v5858_v44 = vld [vmem:[#allocation15 + $0x110] sm:$0xff]  }
 0xfce   : > { %4060 = vmatprep.subr.bf16.mxu0 %v5817_v53  ;;  %v5868_v53 = vld [vmem:[#allocation15 + $0x168] sm:$0xff]  }
 0xfd1   : > { %4061 = vmatpush1.bf16.msra.mxu0 %v5815_v55  ;;  %v5870_v55 = vld [vmem:[#allocation15 + $0x128] sm:$0xff]  }
 0xfd2   : > { %4062 = vmatprep.subr.bf16.mxu0 %v5823_v56  ;;  %v5872_v56 = vld [vmem:[#allocation15 + $0x170] sm:$0xff]  }
0x109b   : > { %v3760_v46 = vpop.f32.mrb[28].mxu0 }
0x109c   : > { %v3761_v47 = vadd.f32 %v5002_v45, %v3760_v46  ;;  %v5442_v0 = vpop.f32.mrb[29].mxu0  ;;  %v5859_v45 = vld [vmem:[#allocation15 + $0x190] sm:$0xff]   ;;  %v5860_v46 = vld [vmem:[#allocation15 + $0x158] sm:$0xff]  }
0x109d   : > { %v3763_v48 = vpop.f32.mrb[30].mxu0  ;;  %v5862_v0 = vld [vmem:[#allocation15 + $0x118] sm:$0xff]  }
0x109e   : > { %v7179_v49 = vadd.f32 %v3761_v47, %v7099_v4  ;;  %v5443_v50 = vpop.f32.mrb[31].mxu0  ;;  %v5821_v4 = vld [vmem:[#allocation13 + $0x168] ss:$16 sps:$4 sm:$0xff]  }
0x109f   : > { %4063 = vmatpush1.bf16.msra.mxu0 %v5821_v4  ;;  %v5861_v47 = vld [vmem:[#allocation15 + $0x1d8] sm:$0xff]   ;;  %v5865_v50 = vld [vmem:[#allocation15 + $0x1e0] sm:$0xff]   ;;  %v5874_v4 = vld [vmem:[#allocation15 + $0x130] sm:$0xff]  }
0x10a0   : > { %3771 = vadd.xlane.f32.xlu1 %v7179_v49  ;;  %v3774_v51 = vmul.f32 %v7179_v49, %v7179_v49  ;;  %4064 = vmatprep.subr.bf16.mxu0 %v5829_v60  ;;  %v5863_v48 = vld [vmem:[#allocation15 + $0x198] sm:$0xff]  }
0x10a1   : > { %v5878_v60 = vld [vmem:[#allocation15 + $0x138] sm:$0xff]  }
0x10a2   : > { %3775 = vadd.xlane.f32.xlu0 %v3774_v51  ;;  %v5866_v51 = vld [vmem:[#allocation15 + $0x120] sm:$0xff]  }
0x10a3   : > { %4065 = vmatpush1.bf16.msra.mxu0 %v5827_v59  ;;  %v5877_v59 = vld [vmem:[#allocation15 + $0x1f8] sm:$0xff]  }
0x10a4   : > { %4066 = vmatprep.subr.bf16.mxu0 %v5835_v63  ;;  %v5013_v63 = vld [vmem:[%s7296_s26 + $0x4] sm:$0xf] }
0x10a5   : > { %v3838_v6 = vrot.slane %v5013_v63, %v6972_v2  ;;  %v3842_v10 = vrot.slane %v5013_v63, %v6981_v5 }
0x10a7   : > { %4067 = vmatpush1.bf16.msra.mxu0 %v5833_v7  ;;  %v3846_v7 = vrot.slane %v5013_v63, %v6975_v3 }
0x10a8   : > { %4068 = vmatprep.subr.bf16.mxu0 %v5841_v11  ;;  %v3850_v11 = vrot.slane %v5013_v63, %v2075_v9 }
0x10ab   : > { %4069 = vmatpush1.bf16.msra.mxu0 %v5839_v13 }
0x10ac   : > { %4070 = vmatprep.subr.bf16.mxu0 %v5847_v15 }
0x10af   : > { %4071 = vmatpush1.bf16.msra.mxu0 %v5845_v17 }
0x10b0   : > { %5234 = vmatprep.subr.bf16.mxu0 %v5849_v36 }
0x112d   : > { %v3772_v18 = vpop.xlane.xlu1 %3771 }
0x112e   : > { %v3773_v19 = vmul.f32 0.0078125, %v3772_v18 }
0x112f   : > { %v3776_v20 = vpop.xlane.xlu0 %3775 }
0x1130   : > { %v3778_v21 = vmul.f32 %v3773_v19, %v3773_v19  ;;  %v3777_v22 = vmul.f32 0.0078125, %v3776_v20  ;;  %v3780_v25 = vsub.f32 %v7179_v49, %v3773_v19  ;;  %v5864_v49 = vld [vmem:[#allocation15 + $0x160] sm:$0xff]  }
0x1132   : > { %v3779_v23 = vsub.f32 %v3777_v22, %v3778_v21 }
0x1134   : > { %v3781_v24 = vadd.f32 1e-12, %v3779_v23 }
0x1136   : > { %5934 = vrsqrt.f32 %v3781_v24 }
0x1140   : > { %v5935_v26 = vpop.eup %5934 }
0x1141   : > { %v3783_v28 = vmul.f32 %v5935_v26, %v3780_v25 }
0x1143   : > { %v3790_v31 = vmul.f32 %v5011_v27, %v3783_v28 }
0x1145   : > { %v7185_v33 = vadd.f32 %v5012_v29, %v3790_v31 }
0x1147   : > { %v3831_v34 = vpack.c.bf16 %v7185_v33, %v7185_v33 }
0x1149   : > { %4048 = vmatmul.mubr.bf16.vlgmr.msra.gmra.mrb[44].mxu1 %v3831_v34  ;;  %4089 = vmatmul.mubr.bf16.vlgmr.msra.gmra.mrb[32].mxu0 %v3831_v34 }
0x114a   : > { %5213 = vmatpush3.bf16.msra.mxu1 %v5850_v37  ;;  %5235 = vmatpush3.bf16.msra.mxu0 %v5851_v38 }
0x114b   : > { %5214 = vmatprep.subr.bf16.mxu1 %v5852_v39  ;;  %5236 = vmatprep.subr.bf16.mxu0 %v5853_v32 }
0x114e   : > { %5215 = vmatpush3.bf16.msra.mxu1 %v5854_v40  ;;  %5237 = vmatpush3.bf16.msra.mxu0 %v5855_v41 }
0x114f   : > { %5216 = vmatprep.subr.bf16.mxu1 %v5856_v42  ;;  %5238 = vmatprep.subr.bf16.mxu0 %v5857_v43 }
0x1152   : > { %5217 = vmatpush3.bf16.msra.mxu1 %v5858_v44  ;;  %5239 = vmatpush3.bf16.msra.mxu0 %v5859_v45 }
0x1153   : > { %5218 = vmatprep.subr.bf16.mxu1 %v5860_v46  ;;  %5240 = vmatprep.subr.bf16.mxu0 %v5861_v47 }
0x1156   : > { %5219 = vmatpush3.bf16.msra.mxu1 %v5862_v0  ;;  %5241 = vmatpush3.bf16.msra.mxu0 %v5863_v48 }
0x1157   : > { %5220 = vmatprep.subr.bf16.mxu1 %v5864_v49  ;;  %5242 = vmatprep.subr.bf16.mxu0 %v5865_v50 }
0x115a   : > { %5221 = vmatpush3.bf16.msra.mxu1 %v5866_v51  ;;  %5243 = vmatpush3.bf16.msra.mxu0 %v5867_v52 }
0x115b   : > { %5222 = vmatprep.subr.bf16.mxu1 %v5868_v53  ;;  %5244 = vmatprep.subr.bf16.mxu0 %v5869_v54 }
0x115e   : > { %5223 = vmatpush3.bf16.msra.mxu1 %v5870_v55  ;;  %5245 = vmatpush3.bf16.msra.mxu0 %v5871_v30 }
0x115f   : > { %5224 = vmatprep.subr.bf16.mxu1 %v5872_v56  ;;  %5246 = vmatprep.subr.bf16.mxu0 %v5873_v57 }
0x1162   : > { %5225 = vmatpush3.bf16.msra.mxu1 %v5874_v4  ;;  %5247 = vmatpush3.bf16.msra.mxu0 %v5875_v58  ;;  %v5880_v58 = vld [vmem:[#allocation21] sm:$0xff]  }
0x1163   : > { %5226 = vmatprep.subr.bf16.mxu1 %v5876_v62  ;;  %5248 = vmatprep.subr.bf16.mxu0 %v5877_v59 }
0x1166   : > { %5227 = vmatpush3.bf16.msra.mxu1 %v5878_v60  ;;  %5249 = vmatpush3.bf16.msra.mxu0 %v5879_v61  ;;  %v5046_v60 = vld [vmem:[#allocation16 + $0x1] ss:$0 sm:$0xff] }
0x1167   : > { %5444 = vmatprep.subr.bf16.mxu1 %v6402_v8 }
0x121c   : > { %v4049_v12 = vpop.f32.mrb[44].mxu1  ;;  %v4090_v13 = vpop.f32.mrb[32].mxu0 }
0x121d   : > { %v4050_v14 = vadd.f32 %v4049_v12, %v3838_v6  ;;  %v4091_v15 = vadd.f32 %v4090_v13, %v3846_v7  ;;  %v4051_v16 = vpop.f32.mrb[45].mxu1  ;;  %v4092_v17 = vpop.f32.mrb[33].mxu0 }
0x121e   : > { %v4052_v18 = vadd.f32 %v4051_v16, %v3842_v10  ;;  %v4093_v19 = vadd.f32 %v4092_v17, %v3850_v11  ;;  %v4053_v20 = vpop.f32.mrb[46].mxu1  ;;  %v4094_v21 = vpop.f32.mrb[34].mxu0 }
0x121f   : > { %v4097_v22 = vmul.f32 %v4050_v14, %v4050_v14  ;;  %v4099_v23 = vmul.f32 %v4091_v15, %v4091_v15  ;;  %v4054_v2 = vpop.f32.mrb[47].mxu1  ;;  %v4095_v24 = vpop.f32.mrb[35].mxu0  ;;  %v5883_v20 = vld [vmem:[#allocation21 + $0x18] sm:$0xff]   ;;  %v5884_v21 = vld [vmem:[#allocation21 + $0x20] sm:$0xff]  }
0x1220   : > { %v4098_v3 = vmul.f32 %v4052_v18, %v4052_v18  ;;  %v4100_v25 = vmul.f32 %v4093_v19, %v4093_v19 }
0x1221   : > { %v4101_v5 = vmul.f32 %v4097_v22, %v4050_v14  ;;  %v4103_v26 = vmul.f32 %v4099_v23, %v4091_v15  ;;  %v5885_v22 = vld [vmem:[#allocation21 + $0x28] sm:$0xff]   ;;  %v5887_v23 = vld [vmem:[#allocation21 + $0x38] sm:$0xff]  }
0x1222   : > { %v4102_v1 = vmul.f32 %v4098_v3, %v4052_v18  ;;  %v4104_v9 = vmul.f32 %v4100_v25, %v4093_v19 }
0x1223   : > { %v4105_v27 = vmul.f32 0.044715, %v4101_v5  ;;  %v4107_v28 = vmul.f32 0.044715, %v4103_v26 }
0x1224   : > { %v4106_v29 = vmul.f32 0.044715, %v4102_v1  ;;  %v4108_v31 = vmul.f32 0.044715, %v4104_v9 }
0x1225   : > { %v4109_v34 = vadd.f32 %v4105_v27, %v4050_v14  ;;  %v4111_v35 = vadd.f32 %v4107_v28, %v4091_v15  ;;  %v5079_v28 = vld [vmem:[#allocation18 + $0x1] ss:$0 sm:$0xff] }
0x1226   : > { %v4110_v36 = vadd.f32 %v4106_v29, %v4052_v18  ;;  %v4112_v37 = vadd.f32 %v4108_v31, %v4093_v19  ;;  %v5080_v31 = vld [vmem:[#allocation19 + $0x1] ss:$0 sm:$0xff] }
0x1227   : > { %v4113_v38 = vmul.f32 0.7978846, %v4109_v34  ;;  %v4115_v39 = vmul.f32 0.7978846, %v4111_v35 }
0x1228   : > { %v4114_v32 = vmul.f32 0.7978846, %v4110_v36  ;;  %v4116_v40 = vmul.f32 0.7978846, %v4112_v37 }
0x1229   : > { %5936 = vtanh.f32 %v4113_v38 }
0x122a   : > { %5938 = vtanh.f32 %v4115_v39 }
0x122b   : > { %5940 = vtanh.f32 %v4114_v32 }
0x122c   : > { %5942 = vtanh.f32 %v4116_v40 }
0x1233   : > { %v5937_v41 = vpop.eup %5936 }
0x1234   : > { %v5939_v42 = vpop.eup %5938  ;;  %v4121_v43 = vadd.f32 1.0, %v5937_v41 }
0x1235   : > { %v5941_v44 = vpop.eup %5940  ;;  %v4123_v45 = vadd.f32 1.0, %v5939_v42 }
0x1236   : > { %v5943_v46 = vpop.eup %5942  ;;  %v4122_v47 = vadd.f32 1.0, %v5941_v44  ;;  %v4125_v0 = vmul.f32 0.5, %v4121_v43 }
0x1237   : > { %v4124_v48 = vadd.f32 1.0, %v5943_v46  ;;  %v4127_v49 = vmul.f32 0.5, %v4123_v45 }
0x1238   : > { %v4126_v50 = vmul.f32 0.5, %v4122_v47  ;;  %v4129_v52 = vmul.f32 %v4125_v0, %v4050_v14 }
0x1239   : > { %v4128_v51 = vmul.f32 0.5, %v4124_v48  ;;  %v4131_v54 = vmul.f32 %v4127_v49, %v4091_v15 }
0x123a   : > { %v4130_v53 = vmul.f32 %v4126_v50, %v4052_v18  ;;  %v4198_v57 = vpack.c.bf16 %v4129_v52, %v4129_v52  ;;  %v5881_v18 = vld [vmem:[#allocation21 + $0x8] sm:$0xff]  }
0x123b   : > { %v4132_v55 = vmul.f32 %v4128_v51, %v4093_v19  ;;  %v4200_v4 = vpack.c.bf16 %v4131_v54, %v4131_v54  ;;  %v5882_v19 = vld [vmem:[#allocation21 + $0x10] sm:$0xff]  }
0x123c   : > { %v4199_v30 = vpack.c.bf16 %v4130_v53, %v4130_v53 }
0x123d   : > { %v4201_v56 = vpack.c.bf16 %v4132_v55, %v4132_v55 }
0x123e   : > { %4434 = vmatprep.mubr.bf16.mxu1 %v4199_v30 }
0x123f   : > { %4474 = vmatprep.mubr.bf16.mxu0 %v4201_v56  ;;  %4435 = vmatmul.mubr.bf16.vlgmr.msra.gmra.mrb[48].mxu1 %v4198_v57 }
0x1240   : > { %4475 = vmatmul.mubr.bf16.vlgmr.msra.gmra.mrb[36].mxu0 %v4200_v4  ;;  %5460 = vmatprep.mubr.msk.bf16.mxu1 %vm6401_vm0, %v6402_v8 }
0x1241   : > { %5445 = vmatpush3.bf16.msra.mxu1 %v5880_v58 }
0x1242   : > { %5446 = vmatprep.subr.bf16.mxu1 %v6402_v8 }
0x1245   : > { %5447 = vmatpush3.bf16.msra.mxu1 %v5881_v18 }
0x1246   : > { %5448 = vmatprep.subr.bf16.mxu1 %v6402_v8 }
0x1249   : > { %5449 = vmatpush3.bf16.msra.mxu1 %v5882_v19 }
0x124a   : > { %5450 = vmatprep.subr.bf16.mxu1 %v6402_v8 }
0x124d   : > { %5451 = vmatpush3.bf16.msra.mxu1 %v5883_v20 }
0x124e   : > { %5452 = vmatprep.subr.bf16.mxu1 %v6402_v8 }
0x1251   : > { %5453 = vmatpush3.bf16.msra.mxu1 %v5884_v21 }
0x1252   : > { %5454 = vmatprep.subr.bf16.mxu1 %v6402_v8 }
0x1255   : > { %5455 = vmatpush3.bf16.msra.mxu1 %v5885_v22 }
0x1256   : > { %5456 = vmatprep.subr.bf16.mxu1 %v6402_v8 }
0x1312   : > { %v5228_v62 = vpop.f32.mrb[48].mxu1 }
0x1313   : > { %v5250_v59 = vpop.f32.mrb[36].mxu0  ;;  %v5229_v61 = vpop.f32.mrb[49].mxu1 }
0x1314   : > { %v5230_v63 = vadd.f32 %v5229_v61, %v5228_v62  ;;  %v5251_v6 = vpop.f32.mrb[37].mxu0  ;;  %v5231_v7 = vpop.f32.mrb[50].mxu1 }
0x1315   : > { %v5252_v10 = vadd.f32 %v5251_v6, %v5250_v59  ;;  %v5253_v11 = vpop.f32.mrb[38].mxu0  ;;  %v5232_v12 = vpop.f32.mrb[51].mxu1 }
0x1316   : > { %v4437_v13 = vadd.f32 %v5230_v63, %v5046_v60  ;;  %v5254_v14 = vpop.f32.mrb[39].mxu0 }
0x1318   : > { %v4477_v15 = vadd.f32 %v5252_v10, %v4437_v13 }
0x131a   : > { %v4482_v16 = vadd.f32 %v4477_v15, %v7185_v33  ;;  %v5886_v33 = vld [vmem:[#allocation21 + $0x30] sm:$0xff]  }
0x131b   : > { %5457 = vmatpush3.bf16.msra.mxu1 %v5886_v33 }
0x131c   : > { %4487 = vadd.xlane.f32.xlu0 %v4482_v16  ;;  %v4490_v17 = vmul.f32 %v4482_v16, %v4482_v16  ;;  %5458 = vmatprep.subr.bf16.mxu1 %v6402_v8  ;;  %v4531_v8 = vld [vmem:[#allocation22] sm:$0x1] }
0x131e   : > { %4491 = vadd.xlane.f32.xlu1 %v4490_v17 }
0x131f   : > { %5459 = vmatpush3.bf16.msra.mxu1 %v5887_v23 }
0x13a9   : > { %v4488_v2 = vpop.xlane.xlu0 %4487 }
0x13aa   : > { %v4489_v24 = vmul.f32 0.0078125, %v4488_v2 }
0x13ab   : > { %v4492_v3 = vpop.xlane.xlu1 %4491 }
0x13ac   : > { %v4494_v25 = vmul.f32 %v4489_v24, %v4489_v24  ;;  %v4493_v5 = vmul.f32 0.0078125, %v4492_v3  ;;  %v4496_v9 = vsub.f32 %v4482_v16, %v4489_v24 }
0x13ae   : > { %v4495_v26 = vsub.f32 %v4493_v5, %v4494_v25 }
0x13b0   : > { %v4497_v1 = vadd.f32 1e-12, %v4495_v26 }
0x13b2   : > { %5944 = vrsqrt.f32 %v4497_v1 }
0x13bc   : > { %v5945_v27 = vpop.eup %5944 }
0x13bd   : > { %v4499_v29 = vmul.f32 %v5945_v27, %v4496_v9 }
0x13bf   : > { %v4506_v34 = vmul.f32 %v5079_v28, %v4499_v29 }
0x13c1   : > { %v4513_v35 = vadd.f32 %v5080_v31, %v4506_v34 }
0x13c3   : > { %v4530_v36 = vpack.c.bf16 %v4513_v35, %v4513_v35 }
0x13c5   : > { %5461 = vmatmul.mubr.bf16.vlgmr.msra.gmra.mrb[52].mxu1 %v4530_v36 }
0x1498   : > { %v4614_v37 = vpop.f32.mrb[52].mxu1 }
0x1499   : > { %v4615_v38 = vadd.f32 %v4614_v37, %v4531_v8  ;;  %v5462_v39 = vpop.f32.mrb[53].mxu1 }
0x149a   : > { %v4617_v32 = vpop.f32.mrb[54].mxu1 }
0x149b   : > { %4620 = vst [vmem:[%s834_s20] sm:$0x1] %v4615_v38  ;;  %v5463_v40 = vpop.f32.mrb[55].mxu1 }
0x149c PF: > { %s7298_s25 = sld [smem:[#allocation32_spill]] }
0x14a2   : > { %s38_s1 = sadd.s32 1, %s7298_s25  }
0x14a3   : > { %p35_p2 = scmp.ge.s32.totalorder %s38_s1, 4  }
0x14a5   :  { %37 = sbr.rel (!%p35_p2) target bundleno = 19 (0x13), region = 202 }
0x14ac   :  { %4638 = vsyncpa [#allocation3], 1 }
0x14ad   :  { %4640 = vsyncpa [#allocation3 + $0x1], 1 }
0x14ae   :  { %4641 = vsyncpa [#allocation5], 1 }
0x14af   :  { %4642 = vsyncpa [#allocation8], 1 }
0x14b0   :  { %4643 = vsyncpa [#allocation11], 1 }
0x14b1   :  { %4644 = vsyncpa [#allocation14], 1 }
0x14b2   :  { %4645 = vsyncpa [#allocation17], 1 }
0x14b3   :  { %4646 = vsyncpa [#allocation20], 1 }
0x14b4   :  { %4647 = vsyncpa [#allocation23], 1 }

</bundles_post_ra>
